<compile_context>
chip_gen: v7x
topology: tpu7x:2x2x1
jax: 0.10.0
libtpu: 0.0.40
codegen_flags: <defaults>
</compile_context>

<pallas_src>
import functools

import jax
import jax.numpy as jnp
from jax.experimental import pallas as pl
from jax.experimental.pallas import tpu as pltpu


CTX_PAD = 128  # contexts zero-padded to one full lane group

# Small synthetic configuration consistent with the module (scaled-down dims).
CFG = dict(
    num_freq_bands=2,
    depth=1,
    max_freq=10.0,
    first_img_channels=3,
    img_input_channels=16,   # conv stack: 3 -> 4 -> 8 -> 16 channels
    img_input_axis=2,
    text_input_channels=32,
    text_input_axis=1,
    num_latents=8,
    latent_dim=32,
    cross_heads=1,
    latent_heads=4,
    cross_dim_head=16,
    latent_dim_head=8,
    self_per_cross_attn=1,
)


# ----------------------------------------------------------------------------
# In-kernel math helpers (bf16 MXU matmuls, f32 accumulation / elementwise)
# ----------------------------------------------------------------------------
def _bf16(x):
    return x.astype(jnp.bfloat16)


def _mm(a, b_bf16):
    """(n, k) f32/bf16 @ (k, m) bf16 -> (n, m) f32."""
    return jnp.dot(_bf16(a), b_bf16, preferred_element_type=jnp.float32)


def _bmm(a, b):
    """(g, n, k) @ (g, k, m) -> (g, n, m): single-leading-batch matmul."""
    return jax.lax.dot_general(
        _bf16(a), _bf16(b), (((2,), (1,)), ((0,), (0,))),
        preferred_element_type=jnp.float32)


def _bmm_nt(a, b):
    """(g, n, k) @ (g, m, k)^T -> (g, n, m)."""
    return jax.lax.dot_general(
        _bf16(a), _bf16(b), (((2,), (2,)), ((0,), (0,))),
        preferred_element_type=jnp.float32)


def _layernorm(x, g, b, valid=None, eps=1e-5):
    """LayerNorm over the last dim.  `valid` = true feature count when the last
    dim is zero-padded; statistics then ignore the pad columns (pad columns of
    x are zero by construction, so the mean is exact; variance uses a masked
    two-pass form)."""
    if valid is None:
        mu = jnp.mean(x, axis=-1, keepdims=True)
        d = x - mu
        var = jnp.mean(d * d, axis=-1, keepdims=True)
    else:
        inv = 1.0 / float(valid)
        mu = jnp.sum(x, axis=-1, keepdims=True) * inv
        mask = jax.lax.broadcasted_iota(jnp.int32, x.shape, x.ndim - 1) < valid
        d = jnp.where(mask, x - mu, 0.0)
        var = jnp.sum(d * d, axis=-1, keepdims=True) * inv
    return (x - mu) * jax.lax.rsqrt(var + eps) * g + b


def _softmax(s):
    s = s - jnp.max(s, axis=-1, keepdims=True)
    e = jnp.exp(s)
    return e * pl.reciprocal(jnp.sum(e, axis=-1, keepdims=True), approx=True)


def _split_heads(t, B, rows, heads, dh):
    """(B*rows, heads*dh) -> (heads*B, rows, dh), head-major leading blocks."""
    tb = t.reshape(B, rows, heads * dh)
    if heads == 1:
        return tb
    return jnp.concatenate(
        [tb[:, :, i * dh:(i + 1) * dh] for i in range(heads)], axis=0)


def _merge_heads(o, B, rows, heads, dh):
    """(heads*B, rows, dh) -> (B*rows, heads*dh) (== PyTorch concat heads)."""
    if heads == 1:
        return o.reshape(B * rows, dh)
    parts = [o[i * B:(i + 1) * B].reshape(B * rows, dh) for i in range(heads)]
    return jnp.concatenate(parts, axis=-1)


def _attention(xn, cn, wq, wkv, wo, bo, *, B, nq, nk, heads, dim_head):
    """Multi-head attention on pre-normed inputs (residual added by caller).

    xn: (B*nq, d); cn: (B*nk, cd).
    wq: (d, h*dh) bf16; wkv: (cd, 2*h*dh) bf16; wo: (h*dh, d) bf16; bo: (1, d).
    Q/KV projections are single matmuls over the folded (B*rows, feat)
    operands; score/PV matmuls fold batch and head into one leading batch dim
    (h*B); the output projection is a single matmul on the head-concatenated
    vectors.  No per-batch / per-head Python matmul loops.
    """
    H = heads * dim_head
    scale = dim_head ** -0.5
    q = _mm(xn, wq)                       # (B*nq, H)
    kv = _mm(cn, wkv)                     # (B*nk, 2H)
    k = kv[:, :H]
    v = kv[:, H:]
    qh = _split_heads(q, B, nq, heads, dim_head)   # (h*B, nq, dh)
    kh = _split_heads(k, B, nk, heads, dim_head)   # (h*B, nk, dh)
    vh = _split_heads(v, B, nk, heads, dim_head)   # (h*B, nk, dh)
    s = _bmm_nt(qh, kh) * scale                    # (h*B, nq, nk)
    p = _softmax(s)
    o = _bmm(p, vh)                                # (h*B, nq, dh)
    om = _merge_heads(o, B, nq, heads, dim_head)   # (B*nq, H)
    return _mm(om, wo) + bo


def _geglu_ff(x, g, bt, w1, b1, w2, b2):
    """PreNorm + Linear -> GEGLU -> Linear (residual added by caller)."""
    hidden = w2.shape[0]
    xn = _layernorm(x, g, bt)
    h = _mm(xn, w1) + b1
    a = h[:, :hidden]
    gate = h[:, hidden:]
    gelu = 0.5 * gate * (1.0 + jax.lax.erf(gate * (2.0 ** -0.5)))  # exact GELU
    return _mm(a * gelu, w2) + b2


# ----------------------------------------------------------------------------
# Fused Perceiver-stage kernel (all layers, latents resident on-chip)
# ----------------------------------------------------------------------------
def _make_perceiver_kernel(*, B, n, m, ctx_valid, cross_heads, cross_dim_head,
                           latent_heads, latent_dim_head, depth, self_per_cross):
    def kernel(lat_ref, ctx_ref, *rest):
        prm = rest[:-1]
        o_ref = rest[-1]
        x = lat_ref[...]                    # (B*n, d) latents, stay on-chip
        ctx = ctx_ref[...]                  # (B*m, CTX_PAD)
        idx = [0]

        def take(k):
            vals = tuple(r[...] for r in prm[idx[0]:idx[0] + k])
            idx[0] += k
            return vals

        for _ in range(depth):
            gx, bx, gc, bc, wq, wkv, wo, bo = take(8)
            xn = _layernorm(x, gx, bx)
            cn = _layernorm(ctx, gc, bc, valid=ctx_valid)
            x = x + _attention(xn, cn, wq, wkv, wo, bo, B=B, nq=n, nk=m,
                               heads=cross_heads, dim_head=cross_dim_head)
            x = x + _geglu_ff(x, *take(6))
            for _ in range(self_per_cross):
                sg, sb, swq, swkv, swo, sbo = take(6)
                xn = _layernorm(x, sg, sb)
                # self-attention: context == the (already) normed x.
                x = x + _attention(xn, xn, swq, swkv, swo, sbo, B=B, nq=n,
                                   nk=n, heads=latent_heads,
                                   dim_head=latent_dim_head)
                x = x + _geglu_ff(x, *take(6))
        o_ref[...] = x
    return kernel


def fused_perceiver(lat_flat, ctx_flat, flat_params, *, ctx_valid, cfg, B):
    n = lat_flat.shape[0] // B
    d = lat_flat.shape[1]
    m = ctx_flat.shape[0] // B
    kern = _make_perceiver_kernel(
        B=B, n=n, m=m, ctx_valid=ctx_valid,
        cross_heads=cfg["cross_heads"], cross_dim_head=cfg["cross_dim_head"],
        latent_heads=cfg["latent_heads"], latent_dim_head=cfg["latent_dim_head"],
        depth=cfg["depth"], self_per_cross=cfg["self_per_cross_attn"])
    return pl.pallas_call(
        kern,
        out_shape=jax.ShapeDtypeStruct((B * n, d), jnp.float32),
        compiler_params=pltpu.CompilerParams(vmem_limit_bytes=32 * 1024 * 1024),
    )(lat_flat, ctx_flat, *flat_params)


# ----------------------------------------------------------------------------
# Conv stack: GEMM kernels (patches passed (M, K), no host transpose)
# ----------------------------------------------------------------------------
def _conv_gemm_kernel(w_ref, p_ref, b_ref, o_ref, *, relu):
    # w: (cout, K) bf16, p: (M, K), b: (cout, 1)  ->  o: (cout, M) lane-dense.
    y = jax.lax.dot_general(w_ref[...], _bf16(p_ref[...]),
                            (((1,), (1,)), ((), ())),
                            preferred_element_type=jnp.float32) + b_ref[...]
    if relu:
        y = jnp.maximum(y, 0.0)
    o_ref[...] = y


def _conv_ctx_kernel(p_ref, w_ref, b_ref, pos_ref, o_ref):
    # Last conv: write the (M, 128) img-context slab directly:
    # columns [0:cout) = conv output, [cout:) = Fourier-pos features + zero pad.
    y = jax.lax.dot_general(_bf16(p_ref[...]), w_ref[...],
                            (((1,), (1,)), ((), ())),
                            preferred_element_type=jnp.float32) + b_ref[...]
    o_ref[...] = jnp.concatenate([y, pos_ref[...]], axis=-1)


def _im2col(x, k=3, stride=2, pad=1):
    B, H, W, C = x.shape
    xp = jnp.pad(x, ((0, 0), (pad, pad), (pad, pad), (0, 0)))
    Ho = (H + 2 * pad - k) // stride + 1
    Wo = (W + 2 * pad - k) // stride + 1
    cols = []
    for kh in range(k):
        for kw in range(k):
            cols.append(xp[:, kh:kh + stride * Ho:stride,
                           kw:kw + stride * Wo:stride, :])
    patches = jnp.concatenate(cols, axis=-1)           # feature order (kh, kw, cin)
    return patches.reshape(B * Ho * Wo, k * k * C), (B, Ho, Wo)


def conv2d_s2(x, w, b, *, relu):
    patches, (B, Ho, Wo) = _im2col(x)
    cout = w.shape[0]
    y_t = pl.pallas_call(
        functools.partial(_conv_gemm_kernel, relu=relu),
        out_shape=jax.ShapeDtypeStruct((cout, patches.shape[0]), jnp.float32),
    )(w, patches, b)
    return y_t.T.reshape(B, Ho, Wo, cout)


def conv2d_s2_to_ctx(x, w, b, pos_slab):
    """Final conv: emit the (B*Ho*Wo, CTX_PAD) img-context slab directly."""
    patches, (B, Ho, Wo) = _im2col(x)
    ctx = pl.pallas_call(
        _conv_ctx_kernel,
        out_shape=jax.ShapeDtypeStruct((patches.shape[0], CTX_PAD), jnp.float32),
    )(patches, w, b, pos_slab)
    return ctx, (Ho, Wo)


# ----------------------------------------------------------------------------
# Fourier positional features / padding (data-independent XLA glue)
# ----------------------------------------------------------------------------
def fourier_encode(x, max_freq, num_bands):
    x = x[..., None]
    scales = jnp.linspace(1.0, max_freq / 2.0, num_bands, dtype=x.dtype)
    scales = scales.reshape((1,) * (x.ndim - 1) + (num_bands,))
    xs = x * scales * jnp.pi
    return jnp.concatenate([jnp.sin(xs), jnp.cos(xs), x], axis=-1)


def _positional_features(axis_sizes, max_freq, num_bands, dtype=jnp.float32):
    axis_sizes = tuple(axis_sizes)
    axis_pos = [jnp.linspace(-1.0, 1.0, s, dtype=dtype) for s in axis_sizes]
    pos = jnp.stack(jnp.meshgrid(*axis_pos, indexing="ij"), axis=-1)
    enc = fourier_encode(pos, max_freq, num_bands)
    return enc.reshape(axis_sizes + (len(axis_sizes) * (2 * num_bands + 1),))


def _pad_last(x, width):
    pad = width - x.shape[-1]
    if pad <= 0:
        return x
    return jnp.pad(x, [(0, 0)] * (x.ndim - 1) + [(0, pad)])


# ----------------------------------------------------------------------------
# Parameter init (deterministic, synthetic; flattened multi-head weights, bf16)
# ----------------------------------------------------------------------------
def init_params(key, cfg):
    state = {"key": key}

    def nxt():
        state["key"], sub = jax.random.split(state["key"])
        return sub

    def nrm(shape, scale=0.05):
        return scale * jax.random.normal(nxt(), shape, dtype=jnp.float32)

    d = cfg["latent_dim"]
    fb = cfg["num_freq_bands"]
    C = cfg["img_input_channels"]
    img_ctx_dim = cfg["img_input_axis"] * (2 * fb + 1) + C                      # 26
    text_ctx_dim = cfg["text_input_axis"] * (2 * fb + 1) + cfg["text_input_channels"]  # 37
    c0, c1, c2 = cfg["first_img_channels"], C // 4, C // 2

    # Conv weights stored directly in GEMM layout (Cout, 9*Cin) bf16,
    # K ordering (kh, kw, cin).
    # TODO(synk): loading real PyTorch conv weights requires a
    #             (cin, kh, kw) -> (kh, kw, cin) permutation of the K axis.
    conv = [
        (nrm((c1, 9 * c0)).astype(jnp.bfloat16), nrm((c1, 1))),
        (nrm((c2, 9 * c1)).astype(jnp.bfloat16), nrm((c2, 1))),
        (nrm((C, 9 * c2)).astype(jnp.bfloat16), nrm((1, C))),   # last conv: bias (1, Cout)
    ]

    ones_d = jnp.ones((1, d), jnp.float32)
    zeros_d = jnp.zeros((1, d), jnp.float32)

    def cross_attn_p(ctx_valid):
        h, dh = cfg["cross_heads"], cfg["cross_dim_head"]
        H = h * dh
        gc = jnp.zeros((1, CTX_PAD), jnp.float32).at[:, :ctx_valid].set(1.0)
        bc = jnp.zeros((1, CTX_PAD), jnp.float32)
        wkv = jnp.zeros((CTX_PAD, 2 * H), jnp.float32).at[:ctx_valid, :].set(
            nrm((ctx_valid, 2 * H)))
        return [ones_d, zeros_d, gc, bc,
                nrm((d, H)).astype(jnp.bfloat16),
                wkv.astype(jnp.bfloat16),
                nrm((H, d)).astype(jnp.bfloat16),
                nrm((1, d))]

    def self_attn_p():
        h, dh = cfg["latent_heads"], cfg["latent_dim_head"]
        H = h * dh
        return [ones_d, zeros_d,
                nrm((d, H)).astype(jnp.bfloat16),
                nrm((d, 2 * H)).astype(jnp.bfloat16),
                nrm((H, d)).astype(jnp.bfloat16),
                nrm((1, d))]

    def ff_p(mult=4):
        return [ones_d, zeros_d,
                nrm((d, d * mult * 2)).astype(jnp.bfloat16),
                nrm((1, d * mult * 2)),
                nrm((d * mult, d)).astype(jnp.bfloat16),
                nrm((1, d))]

    def perceiver_flat(ctx_valid):
        flat = []
        for _ in range(cfg["depth"]):
            flat += cross_attn_p(ctx_valid)
            flat += ff_p()
            for _ in range(cfg["self_per_cross_attn"]):
                flat += self_attn_p()
                flat += ff_p()
        return flat

    return {
        "conv": conv,
        "text": {
            "latents": jax.random.normal(nxt(), (cfg["num_latents"], d), jnp.float32),
            "flat": perceiver_flat(text_ctx_dim),
        },
        "img": {"flat": perceiver_flat(img_ctx_dim)},
        "dims": {"text_valid": text_ctx_dim, "img_valid": img_ctx_dim},
    }


# ----------------------------------------------------------------------------
# Full forward pass (default path: mask=None, return_embeddings=True)
# ----------------------------------------------------------------------------
def forward(params, img, text, cfg):
    B = img.shape[0]
    fb = cfg["num_freq_bands"]
    n = cfg["num_latents"]
    d = cfg["latent_dim"]
    C = cfg["img_input_channels"]

    # -------- Stage 1: text Perceiver (produces latent embeddings z) ---------
    T = text.shape[1]
    tpos = _positional_features((T,), cfg["max_freq"], fb)
    text_ctx = jnp.concatenate(
        [text, jnp.broadcast_to(tpos[None], (B,) + tpos.shape)], axis=-1)
    text_valid = text_ctx.shape[-1]
    text_ctx = _pad_last(text_ctx, CTX_PAD).reshape(B * T, CTX_PAD)

    lat0 = jnp.broadcast_to(params["text"]["latents"][None], (B, n, d))
    lat0 = lat0.reshape(B * n, d).astype(jnp.float32)
    z = fused_perceiver(lat0, text_ctx, params["text"]["flat"],
                        ctx_valid=text_valid, cfg=cfg, B=B)

    # -------- Conv stack: Conv(s2)+ReLU -> Conv(s2)+ReLU -> Conv(s2) ---------
    (w1, b1), (w2, b2), (w3, b3) = params["conv"]
    x = conv2d_s2(img, w1, b1, relu=True)
    x = conv2d_s2(x, w2, b2, relu=True)

    # Last conv writes the img-context slab (conv channels + pos + zero pad)
    # in one lane-dense 128-wide output.
    Ho = x.shape[1] // 2
    Wo = x.shape[2] // 2
    ipos = _positional_features((Ho, Wo), cfg["max_freq"], fb)       # (Ho, Wo, P)
    P = ipos.shape[-1]
    pos_rows = jnp.broadcast_to(ipos.reshape(1, Ho * Wo, P),
                                (B, Ho * Wo, P)).reshape(B * Ho * Wo, P)
    pos_slab = _pad_last(pos_rows, CTX_PAD - C)                      # (M, 128 - C)
    img_ctx, _ = conv2d_s2_to_ctx(x, w3, b3, pos_slab)               # (B*Ho*Wo, 128)
    img_valid = C + P

    # -------- Stage 2: img ReceivePerceiver (latents = z) ---------------------
    out = fused_perceiver(z, img_ctx, params["img"]["flat"],
                          ctx_valid=img_valid, cfg=cfg, B=B)
    return out.reshape(B, n, d)


# ----------------------------------------------------------------------------
if __name__ == "__main__":
    key = jax.random.PRNGKey(0)
    k_img, k_txt, k_par = jax.random.split(key, 3)

    # img_data: NHWC (b, H, W, first_img_channels); text_data: (b, T, C_text)
    img_data = jax.random.normal(k_img, (2, 32, 32, CFG["first_img_channels"]),
                                 jnp.float32)
    text_data = jax.random.normal(k_txt, (2, 8, CFG["text_input_channels"]),
                                  jnp.float32)

    params = init_params(k_par, CFG)

    fwd = jax.jit(functools.partial(forward, cfg=CFG))
    out = jax.block_until_ready(fwd(params, img_data, text_data))

    assert out.shape == (2, CFG["num_latents"], CFG["latent_dim"]), out.shape
    assert bool(jnp.all(jnp.isfinite(out)))
    print("KERNEL_OK")
</pallas_src>

<mosaic_0001>
module attributes {stable_mosaic.version = 11 : i64} {
  func.func @_conv_gemm_kernel(%arg0: memref<4x27xbf16, #tpu.memory_space<vmem>>, %arg1: memref<512x27xf32, #tpu.memory_space<vmem>>, %arg2: memref<4x1xf32, #tpu.memory_space<vmem>>, %arg3: memref<4x512xf32, #tpu.memory_space<vmem>>) attributes {dimension_semantics = [], scalar_prefetch = 0 : i64, scratch_operands = 0 : i64, tpu.core_type = #tpu.core_type<tc>} {
    %c0 = arith.constant 0 : index
    %c0_0 = arith.constant 0 : index
    %0 = vector.load %arg0[%c0, %c0_0] : memref<4x27xbf16, #tpu.memory_space<vmem>>, vector<4x27xbf16>
    %c0_1 = arith.constant 0 : index
    %c0_2 = arith.constant 0 : index
    %1 = vector.load %arg1[%c0_1, %c0_2] : memref<512x27xf32, #tpu.memory_space<vmem>>, vector<512x27xf32>
    %2 = arith.truncf %1 : vector<512x27xf32> to vector<512x27xbf16>
    %cst = arith.constant dense<0.000000e+00> : vector<4x512xf32>
    %3 = tpu.matmul %0, %2, %cst {dimension_numbers = #tpu.dot_dimension_numbers<[1], [1], [0], [0], [0, 0, 1, 0], [], []>} : vector<4x27xbf16>, vector<512x27xbf16>, vector<4x512xf32> -> vector<4x512xf32>
    %c0_3 = arith.constant 0 : index
    %c0_4 = arith.constant 0 : index
    %4 = vector.load %arg2[%c0_3, %c0_4] : memref<4x1xf32, #tpu.memory_space<vmem>>, vector<4x1xf32>
    %5 = vector.broadcast %4 : vector<4x1xf32> to vector<4x512xf32>
    %6 = arith.addf %3, %5 : vector<4x512xf32>
    %cst_5 = arith.constant 0.000000e+00 : f32
    %7 = vector.broadcast %cst_5 : f32 to vector<4x512xf32>
    %8 = arith.maximumf %6, %7 : vector<4x512xf32>
    %c0_6 = arith.constant 0 : index
    %c0_7 = arith.constant 0 : index
    %9 = vector.load %arg3[%c0_6, %c0_7] : memref<4x512xf32, #tpu.memory_space<vmem>>, vector<4x512xf32>
    tpu.vector_store %arg3[%c0_6, %c0_7], %8 {strides = array<i32>} : memref<4x512xf32, #tpu.memory_space<vmem>>, vector<4x512xf32>,
    return
  }
}

module attributes {stable_mosaic.version = 11 : i64} {
  func.func @_conv_gemm_kernel(%arg0: memref<8x36xbf16, #tpu.memory_space<vmem>>, %arg1: memref<128x36xf32, #tpu.memory_space<vmem>>, %arg2: memref<8x1xf32, #tpu.memory_space<vmem>>, %arg3: memref<8x128xf32, #tpu.memory_space<vmem>>) attributes {dimension_semantics = [], scalar_prefetch = 0 : i64, scratch_operands = 0 : i64, tpu.core_type = #tpu.core_type<tc>} {
    %c0 = arith.constant 0 : index
    %c0_0 = arith.constant 0 : index
    %0 = vector.load %arg0[%c0, %c0_0] : memref<8x36xbf16, #tpu.memory_space<vmem>>, vector<8x36xbf16>
    %c0_1 = arith.constant 0 : index
    %c0_2 = arith.constant 0 : index
    %1 = vector.load %arg1[%c0_1, %c0_2] : memref<128x36xf32, #tpu.memory_space<vmem>>, vector<128x36xf32>
    %2 = arith.truncf %1 : vector<128x36xf32> to vector<128x36xbf16>
    %cst = arith.constant dense<0.000000e+00> : vector<8x128xf32>
    %3 = tpu.matmul %0, %2, %cst {dimension_numbers = #tpu.dot_dimension_numbers<[1], [1], [0], [0], [0, 0, 1, 0], [], []>} : vector<8x36xbf16>, vector<128x36xbf16>, vector<8x128xf32> -> vector<8x128xf32>
    %c0_3 = arith.constant 0 : index
    %c0_4 = arith.constant 0 : index
    %4 = vector.load %arg2[%c0_3, %c0_4] : memref<8x1xf32, #tpu.memory_space<vmem>>, vector<8x1xf32>
    %5 = vector.broadcast %4 : vector<8x1xf32> to vector<8x128xf32>
    %6 = arith.addf %3, %5 : vector<8x128xf32>
    %cst_5 = arith.constant 0.000000e+00 : f32
    %7 = vector.broadcast %cst_5 : f32 to vector<8x128xf32>
    %8 = arith.maximumf %6, %7 : vector<8x128xf32>
    %c0_6 = arith.constant 0 : index
    %c0_7 = arith.constant 0 : index
    %9 = vector.load %arg3[%c0_6, %c0_7] : memref<8x128xf32, #tpu.memory_space<vmem>>, vector<8x128xf32>
    tpu.vector_store %arg3[%c0_6, %c0_7], %8 {strides = array<i32>} : memref<8x128xf32, #tpu.memory_space<vmem>>, vector<8x128xf32>,
    return
  }
}

module attributes {stable_mosaic.version = 11 : i64} {
  func.func @_conv_ctx_kernel(%arg0: memref<32x72xf32, #tpu.memory_space<vmem>>, %arg1: memref<16x72xbf16, #tpu.memory_space<vmem>>, %arg2: memref<1x16xf32, #tpu.memory_space<vmem>>, %arg3: memref<32x112xf32, #tpu.memory_space<vmem>>, %arg4: memref<32x128xf32, #tpu.memory_space<vmem>>) attributes {dimension_semantics = [], scalar_prefetch = 0 : i64, scratch_operands = 0 : i64, tpu.core_type = #tpu.core_type<tc>} {
    %c0 = arith.constant 0 : index
    %c0_0 = arith.constant 0 : index
    %0 = vector.load %arg0[%c0, %c0_0] : memref<32x72xf32, #tpu.memory_space<vmem>>, vector<32x72xf32>
    %1 = arith.truncf %0 : vector<32x72xf32> to vector<32x72xbf16>
    %c0_1 = arith.constant 0 : index
    %c0_2 = arith.constant 0 : index
    %2 = vector.load %arg1[%c0_1, %c0_2] : memref<16x72xbf16, #tpu.memory_space<vmem>>, vector<16x72xbf16>
    %cst = arith.constant dense<0.000000e+00> : vector<32x16xf32>
    %3 = tpu.matmul %1, %2, %cst {dimension_numbers = #tpu.dot_dimension_numbers<[1], [1], [0], [0], [0, 0, 1, 0], [], []>} : vector<32x72xbf16>, vector<16x72xbf16>, vector<32x16xf32> -> vector<32x16xf32>
    %c0_3 = arith.constant 0 : index
    %c0_4 = arith.constant 0 : index
    %4 = vector.load %arg2[%c0_3, %c0_4] : memref<1x16xf32, #tpu.memory_space<vmem>>, vector<1x16xf32>
    %5 = vector.broadcast %4 : vector<1x16xf32> to vector<32x16xf32>
    %6 = arith.addf %3, %5 : vector<32x16xf32>
    %c0_5 = arith.constant 0 : index
    %c0_6 = arith.constant 0 : index
    %7 = vector.load %arg3[%c0_5, %c0_6] : memref<32x112xf32, #tpu.memory_space<vmem>>, vector<32x112xf32>
    %8 = tpu.concatenate %6, %7 in 1 : vector<32x16xf32>, vector<32x112xf32> -> vector<32x128xf32>
    %c0_7 = arith.constant 0 : index
    %c0_8 = arith.constant 0 : index
    %9 = vector.load %arg4[%c0_7, %c0_8] : memref<32x128xf32, #tpu.memory_space<vmem>>, vector<32x128xf32>
    tpu.vector_store %arg4[%c0_7, %c0_8], %8 {strides = array<i32>} : memref<32x128xf32, #tpu.memory_space<vmem>>, vector<32x128xf32>,
    return
  }
}

module attributes {stable_mosaic.version = 11 : i64} {
  func.func @kernel(%arg0: memref<16x32xf32, #tpu.memory_space<vmem>>, %arg1: memref<16x128xf32, #tpu.memory_space<vmem>>, %arg2: memref<1x32xf32, #tpu.memory_space<vmem>>, %arg3: memref<1x32xf32, #tpu.memory_space<vmem>>, %arg4: memref<1x128xf32, #tpu.memory_space<vmem>>, %arg5: memref<1x128xf32, #tpu.memory_space<vmem>>, %arg6: memref<32x16xbf16, #tpu.memory_space<vmem>>, %arg7: memref<128x32xbf16, #tpu.memory_space<vmem>>, %arg8: memref<16x32xbf16, #tpu.memory_space<vmem>>, %arg9: memref<1x32xf32, #tpu.memory_space<vmem>>, %arg10: memref<1x32xf32, #tpu.memory_space<vmem>>, %arg11: memref<1x32xf32, #tpu.memory_space<vmem>>, %arg12: memref<32x256xbf16, #tpu.memory_space<vmem>>, %arg13: memref<1x256xf32, #tpu.memory_space<vmem>>, %arg14: memref<128x32xbf16, #tpu.memory_space<vmem>>, %arg15: memref<1x32xf32, #tpu.memory_space<vmem>>, %arg16: memref<1x32xf32, #tpu.memory_space<vmem>>, %arg17: memref<1x32xf32, #tpu.memory_space<vmem>>, %arg18: memref<32x32xbf16, #tpu.memory_space<vmem>>, %arg19: memref<32x64xbf16, #tpu.memory_space<vmem>>, %arg20: memref<32x32xbf16, #tpu.memory_space<vmem>>, %arg21: memref<1x32xf32, #tpu.memory_space<vmem>>, %arg22: memref<1x32xf32, #tpu.memory_space<vmem>>, %arg23: memref<1x32xf32, #tpu.memory_space<vmem>>, %arg24: memref<32x256xbf16, #tpu.memory_space<vmem>>, %arg25: memref<1x256xf32, #tpu.memory_space<vmem>>, %arg26: memref<128x32xbf16, #tpu.memory_space<vmem>>, %arg27: memref<1x32xf32, #tpu.memory_space<vmem>>, %arg28: memref<16x32xf32, #tpu.memory_space<vmem>>) attributes {dimension_semantics = [], scalar_prefetch = 0 : i64, scratch_operands = 0 : i64, tpu.core_type = #tpu.core_type<tc>} {
    %c0 = arith.constant 0 : index
    %c0_0 = arith.constant 0 : index
    %0 = vector.load %arg0[%c0, %c0_0] : memref<16x32xf32, #tpu.memory_space<vmem>>, vector<16x32xf32>
    %c0_1 = arith.constant 0 : index
    %c0_2 = arith.constant 0 : index
    %1 = vector.load %arg1[%c0_1, %c0_2] : memref<16x128xf32, #tpu.memory_space<vmem>>, vector<16x128xf32>
    %c0_3 = arith.constant 0 : index
    %c0_4 = arith.constant 0 : index
    %2 = vector.load %arg2[%c0_3, %c0_4] : memref<1x32xf32, #tpu.memory_space<vmem>>, vector<1x32xf32>
    %c0_5 = arith.constant 0 : index
    %c0_6 = arith.constant 0 : index
    %3 = vector.load %arg3[%c0_5, %c0_6] : memref<1x32xf32, #tpu.memory_space<vmem>>, vector<1x32xf32>
    %c0_7 = arith.constant 0 : index
    %c0_8 = arith.constant 0 : index
    %4 = vector.load %arg4[%c0_7, %c0_8] : memref<1x128xf32, #tpu.memory_space<vmem>>, vector<1x128xf32>
    %c0_9 = arith.constant 0 : index
    %c0_10 = arith.constant 0 : index
    %5 = vector.load %arg5[%c0_9, %c0_10] : memref<1x128xf32, #tpu.memory_space<vmem>>, vector<1x128xf32>
    %c0_11 = arith.constant 0 : index
    %c0_12 = arith.constant 0 : index
    %6 = vector.load %arg6[%c0_11, %c0_12] : memref<32x16xbf16, #tpu.memory_space<vmem>>, vector<32x16xbf16>
    %c0_13 = arith.constant 0 : index
    %c0_14 = arith.constant 0 : index
    %7 = vector.load %arg7[%c0_13, %c0_14] : memref<128x32xbf16, #tpu.memory_space<vmem>>, vector<128x32xbf16>
    %c0_15 = arith.constant 0 : index
    %c0_16 = arith.constant 0 : index
    %8 = vector.load %arg8[%c0_15, %c0_16] : memref<16x32xbf16, #tpu.memory_space<vmem>>, vector<16x32xbf16>
    %c0_17 = arith.constant 0 : index
    %c0_18 = arith.constant 0 : index
    %9 = vector.load %arg9[%c0_17, %c0_18] : memref<1x32xf32, #tpu.memory_space<vmem>>, vector<1x32xf32>
    %cst = arith.constant dense<0.000000e+00> : vector<16xf32>
    %10 = vector.multi_reduction <add>, %0, %cst [1] : vector<16x32xf32> to vector<16xf32>
    %11 = vector.shape_cast %10 : vector<16xf32> to vector<16x1xf32>
    %cst_19 = arith.constant 3.200000e+01 : f32
    %12 = vector.broadcast %cst_19 : f32 to vector<16x1xf32>
    %13 = arith.divf %11, %12 : vector<16x1xf32>
    %14 = vector.broadcast %13 : vector<16x1xf32> to vector<16x32xf32>
    %15 = arith.subf %0, %14 : vector<16x32xf32>
    %16 = arith.mulf %15, %15 : vector<16x32xf32>
    %cst_20 = arith.constant dense<0.000000e+00> : vector<16xf32>
    %17 = vector.multi_reduction <add>, %16, %cst_20 [1] : vector<16x32xf32> to vector<16xf32>
    %18 = vector.shape_cast %17 : vector<16xf32> to vector<16x1xf32>
    %cst_21 = arith.constant 3.200000e+01 : f32
    %19 = vector.broadcast %cst_21 : f32 to vector<16x1xf32>
    %20 = arith.divf %18, %19 : vector<16x1xf32>
    %21 = vector.broadcast %13 : vector<16x1xf32> to vector<16x32xf32>
    %22 = arith.subf %0, %21 : vector<16x32xf32>
    %cst_22 = arith.constant 9.99999974E-6 : f32
    %23 = vector.broadcast %cst_22 : f32 to vector<16x1xf32>
    %24 = arith.addf %20, %23 : vector<16x1xf32>
    %25 = math.rsqrt %24 : vector<16x1xf32>
    %26 = vector.broadcast %25 : vector<16x1xf32> to vector<16x32xf32>
    %27 = arith.mulf %22, %26 : vector<16x32xf32>
    %28 = vector.broadcast %2 : vector<1x32xf32> to vector<16x32xf32>
    %29 = arith.mulf %27, %28 : vector<16x32xf32>
    %30 = vector.broadcast %3 : vector<1x32xf32> to vector<16x32xf32>
    %31 = arith.addf %29, %30 : vector<16x32xf32>
    %cst_23 = arith.constant dense<0.000000e+00> : vector<16xf32>
    %32 = vector.multi_reduction <add>, %1, %cst_23 [1] : vector<16x128xf32> to vector<16xf32>
    %33 = vector.shape_cast %32 : vector<16xf32> to vector<16x1xf32>
    %cst_24 = arith.constant 0.0270270277 : f32
    %34 = vector.broadcast %cst_24 : f32 to vector<16x1xf32>
    %35 = arith.mulf %33, %34 : vector<16x1xf32>
    %36 = tpu.iota {dimensions = array<i32: 1>} : vector<16x128xi32>
    %c37_i32 = arith.constant 37 : i32
    %37 = vector.broadcast %c37_i32 : i32 to vector<16x128xi32>
    %38 = arith.cmpi slt, %36, %37 : vector<16x128xi32>
    %39 = vector.broadcast %35 : vector<16x1xf32> to vector<16x128xf32>
    %40 = arith.subf %1, %39 : vector<16x128xf32>
    %cst_25 = arith.constant 0.000000e+00 : f32
    %41 = vector.broadcast %cst_25 : f32 to vector<16x128xf32>
    %42 = arith.select %38, %40, %41 : vector<16x128xi1>, vector<16x128xf32>
    %43 = arith.mulf %42, %42 : vector<16x128xf32>
    %cst_26 = arith.constant dense<0.000000e+00> : vector<16xf32>
    %44 = vector.multi_reduction <add>, %43, %cst_26 [1] : vector<16x128xf32> to vector<16xf32>
    %45 = vector.shape_cast %44 : vector<16xf32> to vector<16x1xf32>
    %cst_27 = arith.constant 0.0270270277 : f32
    %46 = vector.broadcast %cst_27 : f32 to vector<16x1xf32>
    %47 = arith.mulf %45, %46 : vector<16x1xf32>
    %48 = vector.broadcast %35 : vector<16x1xf32> to vector<16x128xf32>
    %49 = arith.subf %1, %48 : vector<16x128xf32>
    %cst_28 = arith.constant 9.99999974E-6 : f32
    %50 = vector.broadcast %cst_28 : f32 to vector<16x1xf32>
    %51 = arith.addf %47, %50 : vector<16x1xf32>
    %52 = math.rsqrt %51 : vector<16x1xf32>
    %53 = vector.broadcast %52 : vector<16x1xf32> to vector<16x128xf32>
    %54 = arith.mulf %49, %53 : vector<16x128xf32>
    %55 = vector.broadcast %4 : vector<1x128xf32> to vector<16x128xf32>
    %56 = arith.mulf %54, %55 : vector<16x128xf32>
    %57 = vector.broadcast %5 : vector<1x128xf32> to vector<16x128xf32>
    %58 = arith.addf %56, %57 : vector<16x128xf32>
    %59 = arith.truncf %31 : vector<16x32xf32> to vector<16x32xbf16>
    %cst_29 = arith.constant dense<0.000000e+00> : vector<16x16xf32>
    %60 = tpu.matmul %59, %6, %cst_29 {dimension_numbers = #tpu.dot_dimension_numbers<[1], [0], [0], [1], [0, 0, 1, 1], [], []>} : vector<16x32xbf16>, vector<32x16xbf16>, vector<16x16xf32> -> vector<16x16xf32>
    %61 = arith.truncf %58 : vector<16x128xf32> to vector<16x128xbf16>
    %cst_30 = arith.constant dense<0.000000e+00> : vector<16x32xf32>
    %62 = tpu.matmul %61, %7, %cst_30 {dimension_numbers = #tpu.dot_dimension_numbers<[1], [0], [0], [1], [0, 0, 1, 1], [], []>} : vector<16x128xbf16>, vector<128x32xbf16>, vector<16x32xf32> -> vector<16x32xf32>
    %63 = vector.extract_strided_slice %62 {offsets = [0, 0], sizes = [16, 16], strides = [1, 1]} : vector<16x32xf32> to vector<16x16xf32>
    %64 = vector.extract_strided_slice %62 {offsets = [0, 16], sizes = [16, 16], strides = [1, 1]} : vector<16x32xf32> to vector<16x16xf32>
    %65 = vector.shape_cast %60 : vector<16x16xf32> to vector<2x8x16xf32>
    %66 = vector.shape_cast %63 : vector<16x16xf32> to vector<2x8x16xf32>
    %67 = vector.shape_cast %64 : vector<16x16xf32> to vector<2x8x16xf32>
    %68 = arith.truncf %65 : vector<2x8x16xf32> to vector<2x8x16xbf16>
    %69 = arith.truncf %66 : vector<2x8x16xf32> to vector<2x8x16xbf16>
    %cst_31 = arith.constant dense<0.000000e+00> : vector<2x8x8xf32>
    %70 = tpu.matmul %68, %69, %cst_31 {dimension_numbers = #tpu.dot_dimension_numbers<[2], [2], [1], [1], [0, 0, 0, 1, 1, 1], [0], [0]>} : vector<2x8x16xbf16>, vector<2x8x16xbf16>, vector<2x8x8xf32> -> vector<2x8x8xf32>
    %cst_32 = arith.constant 2.500000e-01 : f32
    %71 = vector.broadcast %cst_32 : f32 to vector<2x8x8xf32>
    %72 = arith.mulf %70, %71 : vector<2x8x8xf32>
    %cst_33 = arith.constant dense<0xFF800000> : vector<2x8xf32>
    %73 = vector.multi_reduction <maximumf>, %72, %cst_33 [2] : vector<2x8x8xf32> to vector<2x8xf32>
    %74 = vector.shape_cast %73 : vector<2x8xf32> to vector<2x8x1xf32>
    %75 = vector.broadcast %74 : vector<2x8x1xf32> to vector<2x8x8xf32>
    %76 = arith.subf %72, %75 : vector<2x8x8xf32>
    %77 = math.exp %76 : vector<2x8x8xf32>
    %cst_34 = arith.constant dense<0.000000e+00> : vector<2x8xf32>
    %78 = vector.multi_reduction <add>, %77, %cst_34 [2] : vector<2x8x8xf32> to vector<2x8xf32>
    %79 = vector.shape_cast %78 : vector<2x8xf32> to vector<2x8x1xf32>
    %80 = tpu.reciprocal %79 {approx = true} : vector<2x8x1xf32> -> vector<2x8x1xf32>
    %81 = vector.broadcast %80 : vector<2x8x1xf32> to vector<2x8x8xf32>
    %82 = arith.mulf %77, %81 : vector<2x8x8xf32>
    %83 = arith.truncf %82 : vector<2x8x8xf32> to vector<2x8x8xbf16>
    %84 = arith.truncf %67 : vector<2x8x16xf32> to vector<2x8x16xbf16>
    %cst_35 = arith.constant dense<0.000000e+00> : vector<2x8x16xf32>
    %85 = tpu.matmul %83, %84, %cst_35 {dimension_numbers = #tpu.dot_dimension_numbers<[2], [1], [1], [2], [0, 0, 0, 1, 1, 2], [0], [0]>} : vector<2x8x8xbf16>, vector<2x8x16xbf16>, vector<2x8x16xf32> -> vector<2x8x16xf32>
    %86 = vector.shape_cast %85 : vector<2x8x16xf32> to vector<16x16xf32>
    %87 = arith.truncf %86 : vector<16x16xf32> to vector<16x16xbf16>
    %cst_36 = arith.constant dense<0.000000e+00> : vector<16x32xf32>
    %88 = tpu.matmul %87, %8, %cst_36 {dimension_numbers = #tpu.dot_dimension_numbers<[1], [0], [0], [1], [0, 0, 1, 1], [], []>} : vector<16x16xbf16>, vector<16x32xbf16>, vector<16x32xf32> -> vector<16x32xf32>
    %89 = vector.broadcast %9 : vector<1x32xf32> to vector<16x32xf32>
    %90 = arith.addf %88, %89 : vector<16x32xf32>
    %91 = arith.addf %0, %90 : vector<16x32xf32>
    %c0_37 = arith.constant 0 : index
    %c0_38 = arith.constant 0 : index
    %92 = vector.load %arg10[%c0_37, %c0_38] : memref<1x32xf32, #tpu.memory_space<vmem>>, vector<1x32xf32>
    %c0_39 = arith.constant 0 : index
    %c0_40 = arith.constant 0 : index
    %93 = vector.load %arg11[%c0_39, %c0_40] : memref<1x32xf32, #tpu.memory_space<vmem>>, vector<1x32xf32>
    %c0_41 = arith.constant 0 : index
    %c0_42 = arith.constant 0 : index
    %94 = vector.load %arg12[%c0_41, %c0_42] : memref<32x256xbf16, #tpu.memory_space<vmem>>, vector<32x256xbf16>
    %c0_43 = arith.constant 0 : index
    %c0_44 = arith.constant 0 : index
    %95 = vector.load %arg13[%c0_43, %c0_44] : memref<1x256xf32, #tpu.memory_space<vmem>>, vector<1x256xf32>
    %c0_45 = arith.constant 0 : index
    %c0_46 = arith.constant 0 : index
    %96 = vector.load %arg14[%c0_45, %c0_46] : memref<128x32xbf16, #tpu.memory_space<vmem>>, vector<128x32xbf16>
    %c0_47 = arith.constant 0 : index
    %c0_48 = arith.constant 0 : index
    %97 = vector.load %arg15[%c0_47, %c0_48] : memref<1x32xf32, #tpu.memory_space<vmem>>, vector<1x32xf32>
    %cst_49 = arith.constant dense<0.000000e+00> : vector<16xf32>
    %98 = vector.multi_reduction <add>, %91, %cst_49 [1] : vector<16x32xf32> to vector<16xf32>
    %99 = vector.shape_cast %98 : vector<16xf32> to vector<16x1xf32>
    %cst_50 = arith.constant 3.200000e+01 : f32
    %100 = vector.broadcast %cst_50 : f32 to vector<16x1xf32>
    %101 = arith.divf %99, %100 : vector<16x1xf32>
    %102 = vector.broadcast %101 : vector<16x1xf32> to vector<16x32xf32>
    %103 = arith.subf %91, %102 : vector<16x32xf32>
    %104 = arith.mulf %103, %103 : vector<16x32xf32>
    %cst_51 = arith.constant dense<0.000000e+00> : vector<16xf32>
    %105 = vector.multi_reduction <add>, %104, %cst_51 [1] : vector<16x32xf32> to vector<16xf32>
    %106 = vector.shape_cast %105 : vector<16xf32> to vector<16x1xf32>
    %cst_52 = arith.constant 3.200000e+01 : f32
    %107 = vector.broadcast %cst_52 : f32 to vector<16x1xf32>
    %108 = arith.divf %106, %107 : vector<16x1xf32>
    %109 = vector.broadcast %101 : vector<16x1xf32> to vector<16x32xf32>
    %110 = arith.subf %91, %109 : vector<16x32xf32>
    %cst_53 = arith.constant 9.99999974E-6 : f32
    %111 = vector.broadcast %cst_53 : f32 to vector<16x1xf32>
    %112 = arith.addf %108, %111 : vector<16x1xf32>
    %113 = math.rsqrt %112 : vector<16x1xf32>
    %114 = vector.broadcast %113 : vector<16x1xf32> to vector<16x32xf32>
    %115 = arith.mulf %110, %114 : vector<16x32xf32>
    %116 = vector.broadcast %92 : vector<1x32xf32> to vector<16x32xf32>
    %117 = arith.mulf %115, %116 : vector<16x32xf32>
    %118 = vector.broadcast %93 : vector<1x32xf32> to vector<16x32xf32>
    %119 = arith.addf %117, %118 : vector<16x32xf32>
    %120 = arith.truncf %119 : vector<16x32xf32> to vector<16x32xbf16>
    %cst_54 = arith.constant dense<0.000000e+00> : vector<16x256xf32>
    %121 = tpu.matmul %120, %94, %cst_54 {dimension_numbers = #tpu.dot_dimension_numbers<[1], [0], [0], [1], [0, 0, 1, 1], [], []>} : vector<16x32xbf16>, vector<32x256xbf16>, vector<16x256xf32> -> vector<16x256xf32>
    %122 = vector.broadcast %95 : vector<1x256xf32> to vector<16x256xf32>
    %123 = arith.addf %121, %122 : vector<16x256xf32>
    %124 = vector.extract_strided_slice %123 {offsets = [0, 0], sizes = [16, 128], strides = [1, 1]} : vector<16x256xf32> to vector<16x128xf32>
    %125 = vector.extract_strided_slice %123 {offsets = [0, 128], sizes = [16, 128], strides = [1, 1]} : vector<16x256xf32> to vector<16x128xf32>
    %cst_55 = arith.constant 5.000000e-01 : f32
    %126 = vector.broadcast %cst_55 : f32 to vector<16x128xf32>
    %127 = arith.mulf %126, %125 : vector<16x128xf32>
    %cst_56 = arith.constant 0.707106769 : f32
    %128 = vector.broadcast %cst_56 : f32 to vector<16x128xf32>
    %129 = arith.mulf %125, %128 : vector<16x128xf32>
    %130 = math.erf %129 : vector<16x128xf32>
    %cst_57 = arith.constant 1.000000e+00 : f32
    %131 = vector.broadcast %cst_57 : f32 to vector<16x128xf32>
    %132 = arith.addf %131, %130 : vector<16x128xf32>
    %133 = arith.mulf %127, %132 : vector<16x128xf32>
    %134 = arith.mulf %124, %133 : vector<16x128xf32>
    %135 = arith.truncf %134 : vector<16x128xf32> to vector<16x128xbf16>
    %cst_58 = arith.constant dense<0.000000e+00> : vector<16x32xf32>
    %136 = tpu.matmul %135, %96, %cst_58 {dimension_numbers = #tpu.dot_dimension_numbers<[1], [0], [0], [1], [0, 0, 1, 1], [], []>} : vector<16x128xbf16>, vector<128x32xbf16>, vector<16x32xf32> -> vector<16x32xf32>
    %137 = vector.broadcast %97 : vector<1x32xf32> to vector<16x32xf32>
    %138 = arith.addf %136, %137 : vector<16x32xf32>
    %139 = arith.addf %91, %138 : vector<16x32xf32>
    %c0_59 = arith.constant 0 : index
    %c0_60 = arith.constant 0 : index
    %140 = vector.load %arg16[%c0_59, %c0_60] : memref<1x32xf32, #tpu.memory_space<vmem>>, vector<1x32xf32>
    %c0_61 = arith.constant 0 : index
    %c0_62 = arith.constant 0 : index
    %141 = vector.load %arg17[%c0_61, %c0_62] : memref<1x32xf32, #tpu.memory_space<vmem>>, vector<1x32xf32>
    %c0_63 = arith.constant 0 : index
    %c0_64 = arith.constant 0 : index
    %142 = vector.load %arg18[%c0_63, %c0_64] : memref<32x32xbf16, #tpu.memory_space<vmem>>, vector<32x32xbf16>
    %c0_65 = arith.constant 0 : index
    %c0_66 = arith.constant 0 : index
    %143 = vector.load %arg19[%c0_65, %c0_66] : memref<32x64xbf16, #tpu.memory_space<vmem>>, vector<32x64xbf16>
    %c0_67 = arith.constant 0 : index
    %c0_68 = arith.constant 0 : index
    %144 = vector.load %arg20[%c0_67, %c0_68] : memref<32x32xbf16, #tpu.memory_space<vmem>>, vector<32x32xbf16>
    %c0_69 = arith.constant 0 : index
    %c0_70 = arith.constant 0 : index
    %145 = vector.load %arg21[%c0_69, %c0_70] : memref<1x32xf32, #tpu.memory_space<vmem>>, vector<1x32xf32>
    %cst_71 = arith.constant dense<0.000000e+00> : vector<16xf32>
    %146 = vector.multi_reduction <add>, %139, %cst_71 [1] : vector<16x32xf32> to vector<16xf32>
    %147 = vector.shape_cast %146 : vector<16xf32> to vector<16x1xf32>
    %cst_72 = arith.constant 3.200000e+01 : f32
    %148 = vector.broadcast %cst_72 : f32 to vector<16x1xf32>
    %149 = arith.divf %147, %148 : vector<16x1xf32>
    %150 = vector.broadcast %149 : vector<16x1xf32> to vector<16x32xf32>
    %151 = arith.subf %139, %150 : vector<16x32xf32>
    %152 = arith.mulf %151, %151 : vector<16x32xf32>
    %cst_73 = arith.constant dense<0.000000e+00> : vector<16xf32>
    %153 = vector.multi_reduction <add>, %152, %cst_73 [1] : vector<16x32xf32> to vector<16xf32>
    %154 = vector.shape_cast %153 : vector<16xf32> to vector<16x1xf32>
    %cst_74 = arith.constant 3.200000e+01 : f32
    %155 = vector.broadcast %cst_74 : f32 to vector<16x1xf32>
    %156 = arith.divf %154, %155 : vector<16x1xf32>
    %157 = vector.broadcast %149 : vector<16x1xf32> to vector<16x32xf32>
    %158 = arith.subf %139, %157 : vector<16x32xf32>
    %cst_75 = arith.constant 9.99999974E-6 : f32
    %159 = vector.broadcast %cst_75 : f32 to vector<16x1xf32>
    %160 = arith.addf %156, %159 : vector<16x1xf32>
    %161 = math.rsqrt %160 : vector<16x1xf32>
    %162 = vector.broadcast %161 : vector<16x1xf32> to vector<16x32xf32>
    %163 = arith.mulf %158, %162 : vector<16x32xf32>
    %164 = vector.broadcast %140 : vector<1x32xf32> to vector<16x32xf32>
    %165 = arith.mulf %163, %164 : vector<16x32xf32>
    %166 = vector.broadcast %141 : vector<1x32xf32> to vector<16x32xf32>
    %167 = arith.addf %165, %166 : vector<16x32xf32>
    %168 = arith.truncf %167 : vector<16x32xf32> to vector<16x32xbf16>
    %cst_76 = arith.constant dense<0.000000e+00> : vector<16x32xf32>
    %169 = tpu.matmul %168, %142, %cst_76 {dimension_numbers = #tpu.dot_dimension_numbers<[1], [0], [0], [1], [0, 0, 1, 1], [], []>} : vector<16x32xbf16>, vector<32x32xbf16>, vector<16x32xf32> -> vector<16x32xf32>
    %170 = arith.truncf %167 : vector<16x32xf32> to vector<16x32xbf16>
    %cst_77 = arith.constant dense<0.000000e+00> : vector<16x64xf32>
    %171 = tpu.matmul %170, %143, %cst_77 {dimension_numbers = #tpu.dot_dimension_numbers<[1], [0], [0], [1], [0, 0, 1, 1], [], []>} : vector<16x32xbf16>, vector<32x64xbf16>, vector<16x64xf32> -> vector<16x64xf32>
    %172 = vector.extract_strided_slice %171 {offsets = [0, 0], sizes = [16, 32], strides = [1, 1]} : vector<16x64xf32> to vector<16x32xf32>
    %173 = vector.extract_strided_slice %171 {offsets = [0, 32], sizes = [16, 32], strides = [1, 1]} : vector<16x64xf32> to vector<16x32xf32>
    %174 = vector.shape_cast %169 : vector<16x32xf32> to vector<2x8x32xf32>
    %175 = vector.extract_strided_slice %174 {offsets = [0, 0, 0], sizes = [2, 8, 8], strides = [1, 1, 1]} : vector<2x8x32xf32> to vector<2x8x8xf32>
    %176 = vector.extract_strided_slice %174 {offsets = [0, 0, 8], sizes = [2, 8, 8], strides = [1, 1, 1]} : vector<2x8x32xf32> to vector<2x8x8xf32>
    %177 = vector.extract_strided_slice %174 {offsets = [0, 0, 16], sizes = [2, 8, 8], strides = [1, 1, 1]} : vector<2x8x32xf32> to vector<2x8x8xf32>
    %178 = vector.extract_strided_slice %174 {offsets = [0, 0, 24], sizes = [2, 8, 8], strides = [1, 1, 1]} : vector<2x8x32xf32> to vector<2x8x8xf32>
    %179 = tpu.concatenate %175, %176, %177, %178 in 0 : vector<2x8x8xf32>, vector<2x8x8xf32>, vector<2x8x8xf32>, vector<2x8x8xf32> -> vector<8x8x8xf32>
    %180 = vector.shape_cast %172 : vector<16x32xf32> to vector<2x8x32xf32>
    %181 = vector.extract_strided_slice %180 {offsets = [0, 0, 0], sizes = [2, 8, 8], strides = [1, 1, 1]} : vector<2x8x32xf32> to vector<2x8x8xf32>
    %182 = vector.extract_strided_slice %180 {offsets = [0, 0, 8], sizes = [2, 8, 8], strides = [1, 1, 1]} : vector<2x8x32xf32> to vector<2x8x8xf32>
    %183 = vector.extract_strided_slice %180 {offsets = [0, 0, 16], sizes = [2, 8, 8], strides = [1, 1, 1]} : vector<2x8x32xf32> to vector<2x8x8xf32>
    %184 = vector.extract_strided_slice %180 {offsets = [0, 0, 24], sizes = [2, 8, 8], strides = [1, 1, 1]} : vector<2x8x32xf32> to vector<2x8x8xf32>
    %185 = tpu.concatenate %181, %182, %183, %184 in 0 : vector<2x8x8xf32>, vector<2x8x8xf32>, vector<2x8x8xf32>, vector<2x8x8xf32> -> vector<8x8x8xf32>
    %186 = vector.shape_cast %173 : vector<16x32xf32> to vector<2x8x32xf32>
    %187 = vector.extract_strided_slice %186 {offsets = [0, 0, 0], sizes = [2, 8, 8], strides = [1, 1, 1]} : vector<2x8x32xf32> to vector<2x8x8xf32>
    %188 = vector.extract_strided_slice %186 {offsets = [0, 0, 8], sizes = [2, 8, 8], strides = [1, 1, 1]} : vector<2x8x32xf32> to vector<2x8x8xf32>
    %189 = vector.extract_strided_slice %186 {offsets = [0, 0, 16], sizes = [2, 8, 8], strides = [1, 1, 1]} : vector<2x8x32xf32> to vector<2x8x8xf32>
    %190 = vector.extract_strided_slice %186 {offsets = [0, 0, 24], sizes = [2, 8, 8], strides = [1, 1, 1]} : vector<2x8x32xf32> to vector<2x8x8xf32>
    %191 = tpu.concatenate %187, %188, %189, %190 in 0 : vector<2x8x8xf32>, vector<2x8x8xf32>, vector<2x8x8xf32>, vector<2x8x8xf32> -> vector<8x8x8xf32>
    %192 = arith.truncf %179 : vector<8x8x8xf32> to vector<8x8x8xbf16>
    %193 = arith.truncf %185 : vector<8x8x8xf32> to vector<8x8x8xbf16>
    %cst_78 = arith.constant dense<0.000000e+00> : vector<8x8x8xf32>
    %194 = tpu.matmul %192, %193, %cst_78 {dimension_numbers = #tpu.dot_dimension_numbers<[2], [2], [1], [1], [0, 0, 0, 1, 1, 1], [0], [0]>} : vector<8x8x8xbf16>, vector<8x8x8xbf16>, vector<8x8x8xf32> -> vector<8x8x8xf32>
    %cst_79 = arith.constant 0.353553385 : f32
    %195 = vector.broadcast %cst_79 : f32 to vector<8x8x8xf32>
    %196 = arith.mulf %194, %195 : vector<8x8x8xf32>
    %cst_80 = arith.constant dense<0xFF800000> : vector<8x8xf32>
    %197 = vector.multi_reduction <maximumf>, %196, %cst_80 [2] : vector<8x8x8xf32> to vector<8x8xf32>
    %198 = vector.shape_cast %197 : vector<8x8xf32> to vector<8x8x1xf32>
    %199 = vector.broadcast %198 : vector<8x8x1xf32> to vector<8x8x8xf32>
    %200 = arith.subf %196, %199 : vector<8x8x8xf32>
    %201 = math.exp %200 : vector<8x8x8xf32>
    %cst_81 = arith.constant dense<0.000000e+00> : vector<8x8xf32>
    %202 = vector.multi_reduction <add>, %201, %cst_81 [2] : vector<8x8x8xf32> to vector<8x8xf32>
    %203 = vector.shape_cast %202 : vector<8x8xf32> to vector<8x8x1xf32>
    %204 = tpu.reciprocal %203 {approx = true} : vector<8x8x1xf32> -> vector<8x8x1xf32>
    %205 = vector.broadcast %204 : vector<8x8x1xf32> to vector<8x8x8xf32>
    %206 = arith.mulf %201, %205 : vector<8x8x8xf32>
    %207 = arith.truncf %206 : vector<8x8x8xf32> to vector<8x8x8xbf16>
    %208 = arith.truncf %191 : vector<8x8x8xf32> to vector<8x8x8xbf16>
    %cst_82 = arith.constant dense<0.000000e+00> : vector<8x8x8xf32>
    %209 = tpu.matmul %207, %208, %cst_82 {dimension_numbers = #tpu.dot_dimension_numbers<[2], [1], [1], [2], [0, 0, 0, 1, 1, 2], [0], [0]>} : vector<8x8x8xbf16>, vector<8x8x8xbf16>, vector<8x8x8xf32> -> vector<8x8x8xf32>
    %210 = vector.extract_strided_slice %209 {offsets = [0, 0, 0], sizes = [2, 8, 8], strides = [1, 1, 1]} : vector<8x8x8xf32> to vector<2x8x8xf32>
    %211 = vector.shape_cast %210 : vector<2x8x8xf32> to vector<16x8xf32>
    %212 = vector.extract_strided_slice %209 {offsets = [2, 0, 0], sizes = [2, 8, 8], strides = [1, 1, 1]} : vector<8x8x8xf32> to vector<2x8x8xf32>
    %213 = vector.shape_cast %212 : vector<2x8x8xf32> to vector<16x8xf32>
    %214 = vector.extract_strided_slice %209 {offsets = [4, 0, 0], sizes = [2, 8, 8], strides = [1, 1, 1]} : vector<8x8x8xf32> to vector<2x8x8xf32>
    %215 = vector.shape_cast %214 : vector<2x8x8xf32> to vector<16x8xf32>
    %216 = vector.extract_strided_slice %209 {offsets = [6, 0, 0], sizes = [2, 8, 8], strides = [1, 1, 1]} : vector<8x8x8xf32> to vector<2x8x8xf32>
    %217 = vector.shape_cast %216 : vector<2x8x8xf32> to vector<16x8xf32>
    %218 = tpu.concatenate %211, %213, %215, %217 in 1 : vector<16x8xf32>, vector<16x8xf32>, vector<16x8xf32>, vector<16x8xf32> -> vector<16x32xf32>
    %219 = arith.truncf %218 : vector<16x32xf32> to vector<16x32xbf16>
    %cst_83 = arith.constant dense<0.000000e+00> : vector<16x32xf32>
    %220 = tpu.matmul %219, %144, %cst_83 {dimension_numbers = #tpu.dot_dimension_numbers<[1], [0], [0], [1], [0, 0, 1, 1], [], []>} : vector<16x32xbf16>, vector<32x32xbf16>, vector<16x32xf32> -> vector<16x32xf32>
    %221 = vector.broadcast %145 : vector<1x32xf32> to vector<16x32xf32>
    %222 = arith.addf %220, %221 : vector<16x32xf32>
    %223 = arith.addf %139, %222 : vector<16x32xf32>
    %c0_84 = arith.constant 0 : index
    %c0_85 = arith.constant 0 : index
    %224 = vector.load %arg22[%c0_84, %c0_85] : memref<1x32xf32, #tpu.memory_space<vmem>>, vector<1x32xf32>
    %c0_86 = arith.constant 0 : index
    %c0_87 = arith.constant 0 : index
    %225 = vector.load %arg23[%c0_86, %c0_87] : memref<1x32xf32, #tpu.memory_space<vmem>>, vector<1x32xf32>
    %c0_88 = arith.constant 0 : index
    %c0_89 = arith.constant 0 : index
    %226 = vector.load %arg24[%c0_88, %c0_89] : memref<32x256xbf16, #tpu.memory_space<vmem>>, vector<32x256xbf16>
    %c0_90 = arith.constant 0 : index
    %c0_91 = arith.constant 0 : index
    %227 = vector.load %arg25[%c0_90, %c0_91] : memref<1x256xf32, #tpu.memory_space<vmem>>, vector<1x256xf32>
    %c0_92 = arith.constant 0 : index
    %c0_93 = arith.constant 0 : index
    %228 = vector.load %arg26[%c0_92, %c0_93] : memref<128x32xbf16, #tpu.memory_space<vmem>>, vector<128x32xbf16>
    %c0_94 = arith.constant 0 : index
    %c0_95 = arith.constant 0 : index
    %229 = vector.load %arg27[%c0_94, %c0_95] : memref<1x32xf32, #tpu.memory_space<vmem>>, vector<1x32xf32>
    %cst_96 = arith.constant dense<0.000000e+00> : vector<16xf32>
    %230 = vector.multi_reduction <add>, %223, %cst_96 [1] : vector<16x32xf32> to vector<16xf32>
    %231 = vector.shape_cast %230 : vector<16xf32> to vector<16x1xf32>
    %cst_97 = arith.constant 3.200000e+01 : f32
    %232 = vector.broadcast %cst_97 : f32 to vector<16x1xf32>
    %233 = arith.divf %231, %232 : vector<16x1xf32>
    %234 = vector.broadcast %233 : vector<16x1xf32> to vector<16x32xf32>
    %235 = arith.subf %223, %234 : vector<16x32xf32>
    %236 = arith.mulf %235, %235 : vector<16x32xf32>
    %cst_98 = arith.constant dense<0.000000e+00> : vector<16xf32>
    %237 = vector.multi_reduction <add>, %236, %cst_98 [1] : vector<16x32xf32> to vector<16xf32>
    %238 = vector.shape_cast %237 : vector<16xf32> to vector<16x1xf32>
    %cst_99 = arith.constant 3.200000e+01 : f32
    %239 = vector.broadcast %cst_99 : f32 to vector<16x1xf32>
    %240 = arith.divf %238, %239 : vector<16x1xf32>
    %241 = vector.broadcast %233 : vector<16x1xf32> to vector<16x32xf32>
    %242 = arith.subf %223, %241 : vector<16x32xf32>
    %cst_100 = arith.constant 9.99999974E-6 : f32
    %243 = vector.broadcast %cst_100 : f32 to vector<16x1xf32>
    %244 = arith.addf %240, %243 : vector<16x1xf32>
    %245 = math.rsqrt %244 : vector<16x1xf32>
    %246 = vector.broadcast %245 : vector<16x1xf32> to vector<16x32xf32>
    %247 = arith.mulf %242, %246 : vector<16x32xf32>
    %248 = vector.broadcast %224 : vector<1x32xf32> to vector<16x32xf32>
    %249 = arith.mulf %247, %248 : vector<16x32xf32>
    %250 = vector.broadcast %225 : vector<1x32xf32> to vector<16x32xf32>
    %251 = arith.addf %249, %250 : vector<16x32xf32>
    %252 = arith.truncf %251 : vector<16x32xf32> to vector<16x32xbf16>
    %cst_101 = arith.constant dense<0.000000e+00> : vector<16x256xf32>
    %253 = tpu.matmul %252, %226, %cst_101 {dimension_numbers = #tpu.dot_dimension_numbers<[1], [0], [0], [1], [0, 0, 1, 1], [], []>} : vector<16x32xbf16>, vector<32x256xbf16>, vector<16x256xf32> -> vector<16x256xf32>
    %254 = vector.broadcast %227 : vector<1x256xf32> to vector<16x256xf32>
    %255 = arith.addf %253, %254 : vector<16x256xf32>
    %256 = vector.extract_strided_slice %255 {offsets = [0, 0], sizes = [16, 128], strides = [1, 1]} : vector<16x256xf32> to vector<16x128xf32>
    %257 = vector.extract_strided_slice %255 {offsets = [0, 128], sizes = [16, 128], strides = [1, 1]} : vector<16x256xf32> to vector<16x128xf32>
    %cst_102 = arith.constant 5.000000e-01 : f32
    %258 = vector.broadcast %cst_102 : f32 to vector<16x128xf32>
    %259 = arith.mulf %258, %257 : vector<16x128xf32>
    %cst_103 = arith.constant 0.707106769 : f32
    %260 = vector.broadcast %cst_103 : f32 to vector<16x128xf32>
    %261 = arith.mulf %257, %260 : vector<16x128xf32>
    %262 = math.erf %261 : vector<16x128xf32>
    %cst_104 = arith.constant 1.000000e+00 : f32
    %263 = vector.broadcast %cst_104 : f32 to vector<16x128xf32>
    %264 = arith.addf %263, %262 : vector<16x128xf32>
    %265 = arith.mulf %259, %264 : vector<16x128xf32>
    %266 = arith.mulf %256, %265 : vector<16x128xf32>
    %267 = arith.truncf %266 : vector<16x128xf32> to vector<16x128xbf16>
    %cst_105 = arith.constant dense<0.000000e+00> : vector<16x32xf32>
    %268 = tpu.matmul %267, %228, %cst_105 {dimension_numbers = #tpu.dot_dimension_numbers<[1], [0], [0], [1], [0, 0, 1, 1], [], []>} : vector<16x128xbf16>, vector<128x32xbf16>, vector<16x32xf32> -> vector<16x32xf32>
    %269 = vector.broadcast %229 : vector<1x32xf32> to vector<16x32xf32>
    %270 = arith.addf %268, %269 : vector<16x32xf32>
    %271 = arith.addf %223, %270 : vector<16x32xf32>
    %c0_106 = arith.constant 0 : index
    %c0_107 = arith.constant 0 : index
    %272 = vector.load %arg28[%c0_106, %c0_107] : memref<16x32xf32, #tpu.memory_space<vmem>>, vector<16x32xf32>
    tpu.vector_store %arg28[%c0_106, %c0_107], %271 {strides = array<i32>} : memref<16x32xf32, #tpu.memory_space<vmem>>, vector<16x32xf32>,
    return
  }
}

module attributes {stable_mosaic.version = 11 : i64} {
  func.func @kernel(%arg0: memref<16x32xf32, #tpu.memory_space<vmem>>, %arg1: memref<32x128xf32, #tpu.memory_space<vmem>>, %arg2: memref<1x32xf32, #tpu.memory_space<vmem>>, %arg3: memref<1x32xf32, #tpu.memory_space<vmem>>, %arg4: memref<1x128xf32, #tpu.memory_space<vmem>>, %arg5: memref<1x128xf32, #tpu.memory_space<vmem>>, %arg6: memref<32x16xbf16, #tpu.memory_space<vmem>>, %arg7: memref<128x32xbf16, #tpu.memory_space<vmem>>, %arg8: memref<16x32xbf16, #tpu.memory_space<vmem>>, %arg9: memref<1x32xf32, #tpu.memory_space<vmem>>, %arg10: memref<1x32xf32, #tpu.memory_space<vmem>>, %arg11: memref<1x32xf32, #tpu.memory_space<vmem>>, %arg12: memref<32x256xbf16, #tpu.memory_space<vmem>>, %arg13: memref<1x256xf32, #tpu.memory_space<vmem>>, %arg14: memref<128x32xbf16, #tpu.memory_space<vmem>>, %arg15: memref<1x32xf32, #tpu.memory_space<vmem>>, %arg16: memref<1x32xf32, #tpu.memory_space<vmem>>, %arg17: memref<1x32xf32, #tpu.memory_space<vmem>>, %arg18: memref<32x32xbf16, #tpu.memory_space<vmem>>, %arg19: memref<32x64xbf16, #tpu.memory_space<vmem>>, %arg20: memref<32x32xbf16, #tpu.memory_space<vmem>>, %arg21: memref<1x32xf32, #tpu.memory_space<vmem>>, %arg22: memref<1x32xf32, #tpu.memory_space<vmem>>, %arg23: memref<1x32xf32, #tpu.memory_space<vmem>>, %arg24: memref<32x256xbf16, #tpu.memory_space<vmem>>, %arg25: memref<1x256xf32, #tpu.memory_space<vmem>>, %arg26: memref<128x32xbf16, #tpu.memory_space<vmem>>, %arg27: memref<1x32xf32, #tpu.memory_space<vmem>>, %arg28: memref<16x32xf32, #tpu.memory_space<vmem>>) attributes {dimension_semantics = [], scalar_prefetch = 0 : i64, scratch_operands = 0 : i64, tpu.core_type = #tpu.core_type<tc>} {
    %c0 = arith.constant 0 : index
    %c0_0 = arith.constant 0 : index
    %0 = vector.load %arg0[%c0, %c0_0] : memref<16x32xf32, #tpu.memory_space<vmem>>, vector<16x32xf32>
    %c0_1 = arith.constant 0 : index
    %c0_2 = arith.constant 0 : index
    %1 = vector.load %arg1[%c0_1, %c0_2] : memref<32x128xf32, #tpu.memory_space<vmem>>, vector<32x128xf32>
    %c0_3 = arith.constant 0 : index
    %c0_4 = arith.constant 0 : index
    %2 = vector.load %arg2[%c0_3, %c0_4] : memref<1x32xf32, #tpu.memory_space<vmem>>, vector<1x32xf32>
    %c0_5 = arith.constant 0 : index
    %c0_6 = arith.constant 0 : index
    %3 = vector.load %arg3[%c0_5, %c0_6] : memref<1x32xf32, #tpu.memory_space<vmem>>, vector<1x32xf32>
    %c0_7 = arith.constant 0 : index
    %c0_8 = arith.constant 0 : index
    %4 = vector.load %arg4[%c0_7, %c0_8] : memref<1x128xf32, #tpu.memory_space<vmem>>, vector<1x128xf32>
    %c0_9 = arith.constant 0 : index
    %c0_10 = arith.constant 0 : index
    %5 = vector.load %arg5[%c0_9, %c0_10] : memref<1x128xf32, #tpu.memory_space<vmem>>, vector<1x128xf32>
    %c0_11 = arith.constant 0 : index
    %c0_12 = arith.constant 0 : index
    %6 = vector.load %arg6[%c0_11, %c0_12] : memref<32x16xbf16, #tpu.memory_space<vmem>>, vector<32x16xbf16>
    %c0_13 = arith.constant 0 : index
    %c0_14 = arith.constant 0 : index
    %7 = vector.load %arg7[%c0_13, %c0_14] : memref<128x32xbf16, #tpu.memory_space<vmem>>, vector<128x32xbf16>
    %c0_15 = arith.constant 0 : index
    %c0_16 = arith.constant 0 : index
    %8 = vector.load %arg8[%c0_15, %c0_16] : memref<16x32xbf16, #tpu.memory_space<vmem>>, vector<16x32xbf16>
    %c0_17 = arith.constant 0 : index
    %c0_18 = arith.constant 0 : index
    %9 = vector.load %arg9[%c0_17, %c0_18] : memref<1x32xf32, #tpu.memory_space<vmem>>, vector<1x32xf32>
    %cst = arith.constant dense<0.000000e+00> : vector<16xf32>
    %10 = vector.multi_reduction <add>, %0, %cst [1] : vector<16x32xf32> to vector<16xf32>
    %11 = vector.shape_cast %10 : vector<16xf32> to vector<16x1xf32>
    %cst_19 = arith.constant 3.200000e+01 : f32
    %12 = vector.broadcast %cst_19 : f32 to vector<16x1xf32>
    %13 = arith.divf %11, %12 : vector<16x1xf32>
    %14 = vector.broadcast %13 : vector<16x1xf32> to vector<16x32xf32>
    %15 = arith.subf %0, %14 : vector<16x32xf32>
    %16 = arith.mulf %15, %15 : vector<16x32xf32>
    %cst_20 = arith.constant dense<0.000000e+00> : vector<16xf32>
    %17 = vector.multi_reduction <add>, %16, %cst_20 [1] : vector<16x32xf32> to vector<16xf32>
    %18 = vector.shape_cast %17 : vector<16xf32> to vector<16x1xf32>
    %cst_21 = arith.constant 3.200000e+01 : f32
    %19 = vector.broadcast %cst_21 : f32 to vector<16x1xf32>
    %20 = arith.divf %18, %19 : vector<16x1xf32>
    %21 = vector.broadcast %13 : vector<16x1xf32> to vector<16x32xf32>
    %22 = arith.subf %0, %21 : vector<16x32xf32>
    %cst_22 = arith.constant 9.99999974E-6 : f32
    %23 = vector.broadcast %cst_22 : f32 to vector<16x1xf32>
    %24 = arith.addf %20, %23 : vector<16x1xf32>
    %25 = math.rsqrt %24 : vector<16x1xf32>
    %26 = vector.broadcast %25 : vector<16x1xf32> to vector<16x32xf32>
    %27 = arith.mulf %22, %26 : vector<16x32xf32>
    %28 = vector.broadcast %2 : vector<1x32xf32> to vector<16x32xf32>
    %29 = arith.mulf %27, %28 : vector<16x32xf32>
    %30 = vector.broadcast %3 : vector<1x32xf32> to vector<16x32xf32>
    %31 = arith.addf %29, %30 : vector<16x32xf32>
    %cst_23 = arith.constant dense<0.000000e+00> : vector<32xf32>
    %32 = vector.multi_reduction <add>, %1, %cst_23 [1] : vector<32x128xf32> to vector<32xf32>
    %33 = vector.shape_cast %32 : vector<32xf32> to vector<32x1xf32>
    %cst_24 = arith.constant 0.0384615399 : f32
    %34 = vector.broadcast %cst_24 : f32 to vector<32x1xf32>
    %35 = arith.mulf %33, %34 : vector<32x1xf32>
    %36 = tpu.iota {dimensions = array<i32: 1>} : vector<32x128xi32>
    %c26_i32 = arith.constant 26 : i32
    %37 = vector.broadcast %c26_i32 : i32 to vector<32x128xi32>
    %38 = arith.cmpi slt, %36, %37 : vector<32x128xi32>
    %39 = vector.broadcast %35 : vector<32x1xf32> to vector<32x128xf32>
    %40 = arith.subf %1, %39 : vector<32x128xf32>
    %cst_25 = arith.constant 0.000000e+00 : f32
    %41 = vector.broadcast %cst_25 : f32 to vector<32x128xf32>
    %42 = arith.select %38, %40, %41 : vector<32x128xi1>, vector<32x128xf32>
    %43 = arith.mulf %42, %42 : vector<32x128xf32>
    %cst_26 = arith.constant dense<0.000000e+00> : vector<32xf32>
    %44 = vector.multi_reduction <add>, %43, %cst_26 [1] : vector<32x128xf32> to vector<32xf32>
    %45 = vector.shape_cast %44 : vector<32xf32> to vector<32x1xf32>
    %cst_27 = arith.constant 0.0384615399 : f32
    %46 = vector.broadcast %cst_27 : f32 to vector<32x1xf32>
    %47 = arith.mulf %45, %46 : vector<32x1xf32>
    %48 = vector.broadcast %35 : vector<32x1xf32> to vector<32x128xf32>
    %49 = arith.subf %1, %48 : vector<32x128xf32>
    %cst_28 = arith.constant 9.99999974E-6 : f32
    %50 = vector.broadcast %cst_28 : f32 to vector<32x1xf32>
    %51 = arith.addf %47, %50 : vector<32x1xf32>
    %52 = math.rsqrt %51 : vector<32x1xf32>
    %53 = vector.broadcast %52 : vector<32x1xf32> to vector<32x128xf32>
    %54 = arith.mulf %49, %53 : vector<32x128xf32>
    %55 = vector.broadcast %4 : vector<1x128xf32> to vector<32x128xf32>
    %56 = arith.mulf %54, %55 : vector<32x128xf32>
    %57 = vector.broadcast %5 : vector<1x128xf32> to vector<32x128xf32>
    %58 = arith.addf %56, %57 : vector<32x128xf32>
    %59 = arith.truncf %31 : vector<16x32xf32> to vector<16x32xbf16>
    %cst_29 = arith.constant dense<0.000000e+00> : vector<16x16xf32>
    %60 = tpu.matmul %59, %6, %cst_29 {dimension_numbers = #tpu.dot_dimension_numbers<[1], [0], [0], [1], [0, 0, 1, 1], [], []>} : vector<16x32xbf16>, vector<32x16xbf16>, vector<16x16xf32> -> vector<16x16xf32>
    %61 = arith.truncf %58 : vector<32x128xf32> to vector<32x128xbf16>
    %cst_30 = arith.constant dense<0.000000e+00> : vector<32x32xf32>
    %62 = tpu.matmul %61, %7, %cst_30 {dimension_numbers = #tpu.dot_dimension_numbers<[1], [0], [0], [1], [0, 0, 1, 1], [], []>} : vector<32x128xbf16>, vector<128x32xbf16>, vector<32x32xf32> -> vector<32x32xf32>
    %63 = vector.extract_strided_slice %62 {offsets = [0, 0], sizes = [32, 16], strides = [1, 1]} : vector<32x32xf32> to vector<32x16xf32>
    %64 = vector.extract_strided_slice %62 {offsets = [0, 16], sizes = [32, 16], strides = [1, 1]} : vector<32x32xf32> to vector<32x16xf32>
    %65 = vector.shape_cast %60 : vector<16x16xf32> to vector<2x8x16xf32>
    %66 = vector.shape_cast %63 : vector<32x16xf32> to vector<2x16x16xf32>
    %67 = vector.shape_cast %64 : vector<32x16xf32> to vector<2x16x16xf32>
    %68 = arith.truncf %65 : vector<2x8x16xf32> to vector<2x8x16xbf16>
    %69 = arith.truncf %66 : vector<2x16x16xf32> to vector<2x16x16xbf16>
    %cst_31 = arith.constant dense<0.000000e+00> : vector<2x8x16xf32>
    %70 = tpu.matmul %68, %69, %cst_31 {dimension_numbers = #tpu.dot_dimension_numbers<[2], [2], [1], [1], [0, 0, 0, 1, 1, 1], [0], [0]>} : vector<2x8x16xbf16>, vector<2x16x16xbf16>, vector<2x8x16xf32> -> vector<2x8x16xf32>
    %cst_32 = arith.constant 2.500000e-01 : f32
    %71 = vector.broadcast %cst_32 : f32 to vector<2x8x16xf32>
    %72 = arith.mulf %70, %71 : vector<2x8x16xf32>
    %cst_33 = arith.constant dense<0xFF800000> : vector<2x8xf32>
    %73 = vector.multi_reduction <maximumf>, %72, %cst_33 [2] : vector<2x8x16xf32> to vector<2x8xf32>
    %74 = vector.shape_cast %73 : vector<2x8xf32> to vector<2x8x1xf32>
    %75 = vector.broadcast %74 : vector<2x8x1xf32> to vector<2x8x16xf32>
    %76 = arith.subf %72, %75 : vector<2x8x16xf32>
    %77 = math.exp %76 : vector<2x8x16xf32>
    %cst_34 = arith.constant dense<0.000000e+00> : vector<2x8xf32>
    %78 = vector.multi_reduction <add>, %77, %cst_34 [2] : vector<2x8x16xf32> to vector<2x8xf32>
    %79 = vector.shape_cast %78 : vector<2x8xf32> to vector<2x8x1xf32>
    %80 = tpu.reciprocal %79 {approx = true} : vector<2x8x1xf32> -> vector<2x8x1xf32>
    %81 = vector.broadcast %80 : vector<2x8x1xf32> to vector<2x8x16xf32>
    %82 = arith.mulf %77, %81 : vector<2x8x16xf32>
    %83 = arith.truncf %82 : vector<2x8x16xf32> to vector<2x8x16xbf16>
    %84 = arith.truncf %67 : vector<2x16x16xf32> to vector<2x16x16xbf16>
    %cst_35 = arith.constant dense<0.000000e+00> : vector<2x8x16xf32>
    %85 = tpu.matmul %83, %84, %cst_35 {dimension_numbers = #tpu.dot_dimension_numbers<[2], [1], [1], [2], [0, 0, 0, 1, 1, 2], [0], [0]>} : vector<2x8x16xbf16>, vector<2x16x16xbf16>, vector<2x8x16xf32> -> vector<2x8x16xf32>
    %86 = vector.shape_cast %85 : vector<2x8x16xf32> to vector<16x16xf32>
    %87 = arith.truncf %86 : vector<16x16xf32> to vector<16x16xbf16>
    %cst_36 = arith.constant dense<0.000000e+00> : vector<16x32xf32>
    %88 = tpu.matmul %87, %8, %cst_36 {dimension_numbers = #tpu.dot_dimension_numbers<[1], [0], [0], [1], [0, 0, 1, 1], [], []>} : vector<16x16xbf16>, vector<16x32xbf16>, vector<16x32xf32> -> vector<16x32xf32>
    %89 = vector.broadcast %9 : vector<1x32xf32> to vector<16x32xf32>
    %90 = arith.addf %88, %89 : vector<16x32xf32>
    %91 = arith.addf %0, %90 : vector<16x32xf32>
    %c0_37 = arith.constant 0 : index
    %c0_38 = arith.constant 0 : index
    %92 = vector.load %arg10[%c0_37, %c0_38] : memref<1x32xf32, #tpu.memory_space<vmem>>, vector<1x32xf32>
    %c0_39 = arith.constant 0 : index
    %c0_40 = arith.constant 0 : index
    %93 = vector.load %arg11[%c0_39, %c0_40] : memref<1x32xf32, #tpu.memory_space<vmem>>, vector<1x32xf32>
    %c0_41 = arith.constant 0 : index
    %c0_42 = arith.constant 0 : index
    %94 = vector.load %arg12[%c0_41, %c0_42] : memref<32x256xbf16, #tpu.memory_space<vmem>>, vector<32x256xbf16>
    %c0_43 = arith.constant 0 : index
    %c0_44 = arith.constant 0 : index
    %95 = vector.load %arg13[%c0_43, %c0_44] : memref<1x256xf32, #tpu.memory_space<vmem>>, vector<1x256xf32>
    %c0_45 = arith.constant 0 : index
    %c0_46 = arith.constant 0 : index
    %96 = vector.load %arg14[%c0_45, %c0_46] : memref<128x32xbf16, #tpu.memory_space<vmem>>, vector<128x32xbf16>
    %c0_47 = arith.constant 0 : index
    %c0_48 = arith.constant 0 : index
    %97 = vector.load %arg15[%c0_47, %c0_48] : memref<1x32xf32, #tpu.memory_space<vmem>>, vector<1x32xf32>
    %cst_49 = arith.constant dense<0.000000e+00> : vector<16xf32>
    %98 = vector.multi_reduction <add>, %91, %cst_49 [1] : vector<16x32xf32> to vector<16xf32>
    %99 = vector.shape_cast %98 : vector<16xf32> to vector<16x1xf32>
    %cst_50 = arith.constant 3.200000e+01 : f32
    %100 = vector.broadcast %cst_50 : f32 to vector<16x1xf32>
    %101 = arith.divf %99, %100 : vector<16x1xf32>
    %102 = vector.broadcast %101 : vector<16x1xf32> to vector<16x32xf32>
    %103 = arith.subf %91, %102 : vector<16x32xf32>
    %104 = arith.mulf %103, %103 : vector<16x32xf32>
    %cst_51 = arith.constant dense<0.000000e+00> : vector<16xf32>
    %105 = vector.multi_reduction <add>, %104, %cst_51 [1] : vector<16x32xf32> to vector<16xf32>
    %106 = vector.shape_cast %105 : vector<16xf32> to vector<16x1xf32>
    %cst_52 = arith.constant 3.200000e+01 : f32
    %107 = vector.broadcast %cst_52 : f32 to vector<16x1xf32>
    %108 = arith.divf %106, %107 : vector<16x1xf32>
    %109 = vector.broadcast %101 : vector<16x1xf32> to vector<16x32xf32>
    %110 = arith.subf %91, %109 : vector<16x32xf32>
    %cst_53 = arith.constant 9.99999974E-6 : f32
    %111 = vector.broadcast %cst_53 : f32 to vector<16x1xf32>
    %112 = arith.addf %108, %111 : vector<16x1xf32>
    %113 = math.rsqrt %112 : vector<16x1xf32>
    %114 = vector.broadcast %113 : vector<16x1xf32> to vector<16x32xf32>
    %115 = arith.mulf %110, %114 : vector<16x32xf32>
    %116 = vector.broadcast %92 : vector<1x32xf32> to vector<16x32xf32>
    %117 = arith.mulf %115, %116 : vector<16x32xf32>
    %118 = vector.broadcast %93 : vector<1x32xf32> to vector<16x32xf32>
    %119 = arith.addf %117, %118 : vector<16x32xf32>
    %120 = arith.truncf %119 : vector<16x32xf32> to vector<16x32xbf16>
    %cst_54 = arith.constant dense<0.000000e+00> : vector<16x256xf32>
    %121 = tpu.matmul %120, %94, %cst_54 {dimension_numbers = #tpu.dot_dimension_numbers<[1], [0], [0], [1], [0, 0, 1, 1], [], []>} : vector<16x32xbf16>, vector<32x256xbf16>, vector<16x256xf32> -> vector<16x256xf32>
    %122 = vector.broadcast %95 : vector<1x256xf32> to vector<16x256xf32>
    %123 = arith.addf %121, %122 : vector<16x256xf32>
    %124 = vector.extract_strided_slice %123 {offsets = [0, 0], sizes = [16, 128], strides = [1, 1]} : vector<16x256xf32> to vector<16x128xf32>
    %125 = vector.extract_strided_slice %123 {offsets = [0, 128], sizes = [16, 128], strides = [1, 1]} : vector<16x256xf32> to vector<16x128xf32>
    %cst_55 = arith.constant 5.000000e-01 : f32
    %126 = vector.broadcast %cst_55 : f32 to vector<16x128xf32>
    %127 = arith.mulf %126, %125 : vector<16x128xf32>
    %cst_56 = arith.constant 0.707106769 : f32
    %128 = vector.broadcast %cst_56 : f32 to vector<16x128xf32>
    %129 = arith.mulf %125, %128 : vector<16x128xf32>
    %130 = math.erf %129 : vector<16x128xf32>
    %cst_57 = arith.constant 1.000000e+00 : f32
    %131 = vector.broadcast %cst_57 : f32 to vector<16x128xf32>
    %132 = arith.addf %131, %130 : vector<16x128xf32>
    %133 = arith.mulf %127, %132 : vector<16x128xf32>
    %134 = arith.mulf %124, %133 : vector<16x128xf32>
    %135 = arith.truncf %134 : vector<16x128xf32> to vector<16x128xbf16>
    %cst_58 = arith.constant dense<0.000000e+00> : vector<16x32xf32>
    %136 = tpu.matmul %135, %96, %cst_58 {dimension_numbers = #tpu.dot_dimension_numbers<[1], [0], [0], [1], [0, 0, 1, 1], [], []>} : vector<16x128xbf16>, vector<128x32xbf16>, vector<16x32xf32> -> vector<16x32xf32>
    %137 = vector.broadcast %97 : vector<1x32xf32> to vector<16x32xf32>
    %138 = arith.addf %136, %137 : vector<16x32xf32>
    %139 = arith.addf %91, %138 : vector<16x32xf32>
    %c0_59 = arith.constant 0 : index
    %c0_60 = arith.constant 0 : index
    %140 = vector.load %arg16[%c0_59, %c0_60] : memref<1x32xf32, #tpu.memory_space<vmem>>, vector<1x32xf32>
    %c0_61 = arith.constant 0 : index
    %c0_62 = arith.constant 0 : index
    %141 = vector.load %arg17[%c0_61, %c0_62] : memref<1x32xf32, #tpu.memory_space<vmem>>, vector<1x32xf32>
    %c0_63 = arith.constant 0 : index
    %c0_64 = arith.constant 0 : index
    %142 = vector.load %arg18[%c0_63, %c0_64] : memref<32x32xbf16, #tpu.memory_space<vmem>>, vector<32x32xbf16>
    %c0_65 = arith.constant 0 : index
    %c0_66 = arith.constant 0 : index
    %143 = vector.load %arg19[%c0_65, %c0_66] : memref<32x64xbf16, #tpu.memory_space<vmem>>, vector<32x64xbf16>
    %c0_67 = arith.constant 0 : index
    %c0_68 = arith.constant 0 : index
    %144 = vector.load %arg20[%c0_67, %c0_68] : memref<32x32xbf16, #tpu.memory_space<vmem>>, vector<32x32xbf16>
    %c0_69 = arith.constant 0 : index
    %c0_70 = arith.constant 0 : index
    %145 = vector.load %arg21[%c0_69, %c0_70] : memref<1x32xf32, #tpu.memory_space<vmem>>, vector<1x32xf32>
    %cst_71 = arith.constant dense<0.000000e+00> : vector<16xf32>
    %146 = vector.multi_reduction <add>, %139, %cst_71 [1] : vector<16x32xf32> to vector<16xf32>
    %147 = vector.shape_cast %146 : vector<16xf32> to vector<16x1xf32>
    %cst_72 = arith.constant 3.200000e+01 : f32
    %148 = vector.broadcast %cst_72 : f32 to vector<16x1xf32>
    %149 = arith.divf %147, %148 : vector<16x1xf32>
    %150 = vector.broadcast %149 : vector<16x1xf32> to vector<16x32xf32>
    %151 = arith.subf %139, %150 : vector<16x32xf32>
    %152 = arith.mulf %151, %151 : vector<16x32xf32>
    %cst_73 = arith.constant dense<0.000000e+00> : vector<16xf32>
    %153 = vector.multi_reduction <add>, %152, %cst_73 [1] : vector<16x32xf32> to vector<16xf32>
    %154 = vector.shape_cast %153 : vector<16xf32> to vector<16x1xf32>
    %cst_74 = arith.constant 3.200000e+01 : f32
    %155 = vector.broadcast %cst_74 : f32 to vector<16x1xf32>
    %156 = arith.divf %154, %155 : vector<16x1xf32>
    %157 = vector.broadcast %149 : vector<16x1xf32> to vector<16x32xf32>
    %158 = arith.subf %139, %157 : vector<16x32xf32>
    %cst_75 = arith.constant 9.99999974E-6 : f32
    %159 = vector.broadcast %cst_75 : f32 to vector<16x1xf32>
    %160 = arith.addf %156, %159 : vector<16x1xf32>
    %161 = math.rsqrt %160 : vector<16x1xf32>
    %162 = vector.broadcast %161 : vector<16x1xf32> to vector<16x32xf32>
    %163 = arith.mulf %158, %162 : vector<16x32xf32>
    %164 = vector.broadcast %140 : vector<1x32xf32> to vector<16x32xf32>
    %165 = arith.mulf %163, %164 : vector<16x32xf32>
    %166 = vector.broadcast %141 : vector<1x32xf32> to vector<16x32xf32>
    %167 = arith.addf %165, %166 : vector<16x32xf32>
    %168 = arith.truncf %167 : vector<16x32xf32> to vector<16x32xbf16>
    %cst_76 = arith.constant dense<0.000000e+00> : vector<16x32xf32>
    %169 = tpu.matmul %168, %142, %cst_76 {dimension_numbers = #tpu.dot_dimension_numbers<[1], [0], [0], [1], [0, 0, 1, 1], [], []>} : vector<16x32xbf16>, vector<32x32xbf16>, vector<16x32xf32> -> vector<16x32xf32>
    %170 = arith.truncf %167 : vector<16x32xf32> to vector<16x32xbf16>
    %cst_77 = arith.constant dense<0.000000e+00> : vector<16x64xf32>
    %171 = tpu.matmul %170, %143, %cst_77 {dimension_numbers = #tpu.dot_dimension_numbers<[1], [0], [0], [1], [0, 0, 1, 1], [], []>} : vector<16x32xbf16>, vector<32x64xbf16>, vector<16x64xf32> -> vector<16x64xf32>
    %172 = vector.extract_strided_slice %171 {offsets = [0, 0], sizes = [16, 32], strides = [1, 1]} : vector<16x64xf32> to vector<16x32xf32>
    %173 = vector.extract_strided_slice %171 {offsets = [0, 32], sizes = [16, 32], strides = [1, 1]} : vector<16x64xf32> to vector<16x32xf32>
    %174 = vector.shape_cast %169 : vector<16x32xf32> to vector<2x8x32xf32>
    %175 = vector.extract_strided_slice %174 {offsets = [0, 0, 0], sizes = [2, 8, 8], strides = [1, 1, 1]} : vector<2x8x32xf32> to vector<2x8x8xf32>
    %176 = vector.extract_strided_slice %174 {offsets = [0, 0, 8], sizes = [2, 8, 8], strides = [1, 1, 1]} : vector<2x8x32xf32> to vector<2x8x8xf32>
    %177 = vector.extract_strided_slice %174 {offsets = [0, 0, 16], sizes = [2, 8, 8], strides = [1, 1, 1]} : vector<2x8x32xf32> to vector<2x8x8xf32>
    %178 = vector.extract_strided_slice %174 {offsets = [0, 0, 24], sizes = [2, 8, 8], strides = [1, 1, 1]} : vector<2x8x32xf32> to vector<2x8x8xf32>
    %179 = tpu.concatenate %175, %176, %177, %178 in 0 : vector<2x8x8xf32>, vector<2x8x8xf32>, vector<2x8x8xf32>, vector<2x8x8xf32> -> vector<8x8x8xf32>
    %180 = vector.shape_cast %172 : vector<16x32xf32> to vector<2x8x32xf32>
    %181 = vector.extract_strided_slice %180 {offsets = [0, 0, 0], sizes = [2, 8, 8], strides = [1, 1, 1]} : vector<2x8x32xf32> to vector<2x8x8xf32>
    %182 = vector.extract_strided_slice %180 {offsets = [0, 0, 8], sizes = [2, 8, 8], strides = [1, 1, 1]} : vector<2x8x32xf32> to vector<2x8x8xf32>
    %183 = vector.extract_strided_slice %180 {offsets = [0, 0, 16], sizes = [2, 8, 8], strides = [1, 1, 1]} : vector<2x8x32xf32> to vector<2x8x8xf32>
    %184 = vector.extract_strided_slice %180 {offsets = [0, 0, 24], sizes = [2, 8, 8], strides = [1, 1, 1]} : vector<2x8x32xf32> to vector<2x8x8xf32>
    %185 = tpu.concatenate %181, %182, %183, %184 in 0 : vector<2x8x8xf32>, vector<2x8x8xf32>, vector<2x8x8xf32>, vector<2x8x8xf32> -> vector<8x8x8xf32>
    %186 = vector.shape_cast %173 : vector<16x32xf32> to vector<2x8x32xf32>
    %187 = vector.extract_strided_slice %186 {offsets = [0, 0, 0], sizes = [2, 8, 8], strides = [1, 1, 1]} : vector<2x8x32xf32> to vector<2x8x8xf32>
    %188 = vector.extract_strided_slice %186 {offsets = [0, 0, 8], sizes = [2, 8, 8], strides = [1, 1, 1]} : vector<2x8x32xf32> to vector<2x8x8xf32>
    %189 = vector.extract_strided_slice %186 {offsets = [0, 0, 16], sizes = [2, 8, 8], strides = [1, 1, 1]} : vector<2x8x32xf32> to vector<2x8x8xf32>
    %190 = vector.extract_strided_slice %186 {offsets = [0, 0, 24], sizes = [2, 8, 8], strides = [1, 1, 1]} : vector<2x8x32xf32> to vector<2x8x8xf32>
    %191 = tpu.concatenate %187, %188, %189, %190 in 0 : vector<2x8x8xf32>, vector<2x8x8xf32>, vector<2x8x8xf32>, vector<2x8x8xf32> -> vector<8x8x8xf32>
    %192 = arith.truncf %179 : vector<8x8x8xf32> to vector<8x8x8xbf16>
    %193 = arith.truncf %185 : vector<8x8x8xf32> to vector<8x8x8xbf16>
    %cst_78 = arith.constant dense<0.000000e+00> : vector<8x8x8xf32>
    %194 = tpu.matmul %192, %193, %cst_78 {dimension_numbers = #tpu.dot_dimension_numbers<[2], [2], [1], [1], [0, 0, 0, 1, 1, 1], [0], [0]>} : vector<8x8x8xbf16>, vector<8x8x8xbf16>, vector<8x8x8xf32> -> vector<8x8x8xf32>
    %cst_79 = arith.constant 0.353553385 : f32
    %195 = vector.broadcast %cst_79 : f32 to vector<8x8x8xf32>
    %196 = arith.mulf %194, %195 : vector<8x8x8xf32>
    %cst_80 = arith.constant dense<0xFF800000> : vector<8x8xf32>
    %197 = vector.multi_reduction <maximumf>, %196, %cst_80 [2] : vector<8x8x8xf32> to vector<8x8xf32>
    %198 = vector.shape_cast %197 : vector<8x8xf32> to vector<8x8x1xf32>
    %199 = vector.broadcast %198 : vector<8x8x1xf32> to vector<8x8x8xf32>
    %200 = arith.subf %196, %199 : vector<8x8x8xf32>
    %201 = math.exp %200 : vector<8x8x8xf32>
    %cst_81 = arith.constant dense<0.000000e+00> : vector<8x8xf32>
    %202 = vector.multi_reduction <add>, %201, %cst_81 [2] : vector<8x8x8xf32> to vector<8x8xf32>
    %203 = vector.shape_cast %202 : vector<8x8xf32> to vector<8x8x1xf32>
    %204 = tpu.reciprocal %203 {approx = true} : vector<8x8x1xf32> -> vector<8x8x1xf32>
    %205 = vector.broadcast %204 : vector<8x8x1xf32> to vector<8x8x8xf32>
    %206 = arith.mulf %201, %205 : vector<8x8x8xf32>
    %207 = arith.truncf %206 : vector<8x8x8xf32> to vector<8x8x8xbf16>
    %208 = arith.truncf %191 : vector<8x8x8xf32> to vector<8x8x8xbf16>
    %cst_82 = arith.constant dense<0.000000e+00> : vector<8x8x8xf32>
    %209 = tpu.matmul %207, %208, %cst_82 {dimension_numbers = #tpu.dot_dimension_numbers<[2], [1], [1], [2], [0, 0, 0, 1, 1, 2], [0], [0]>} : vector<8x8x8xbf16>, vector<8x8x8xbf16>, vector<8x8x8xf32> -> vector<8x8x8xf32>
    %210 = vector.extract_strided_slice %209 {offsets = [0, 0, 0], sizes = [2, 8, 8], strides = [1, 1, 1]} : vector<8x8x8xf32> to vector<2x8x8xf32>
    %211 = vector.shape_cast %210 : vector<2x8x8xf32> to vector<16x8xf32>
    %212 = vector.extract_strided_slice %209 {offsets = [2, 0, 0], sizes = [2, 8, 8], strides = [1, 1, 1]} : vector<8x8x8xf32> to vector<2x8x8xf32>
    %213 = vector.shape_cast %212 : vector<2x8x8xf32> to vector<16x8xf32>
    %214 = vector.extract_strided_slice %209 {offsets = [4, 0, 0], sizes = [2, 8, 8], strides = [1, 1, 1]} : vector<8x8x8xf32> to vector<2x8x8xf32>
    %215 = vector.shape_cast %214 : vector<2x8x8xf32> to vector<16x8xf32>
    %216 = vector.extract_strided_slice %209 {offsets = [6, 0, 0], sizes = [2, 8, 8], strides = [1, 1, 1]} : vector<8x8x8xf32> to vector<2x8x8xf32>
    %217 = vector.shape_cast %216 : vector<2x8x8xf32> to vector<16x8xf32>
    %218 = tpu.concatenate %211, %213, %215, %217 in 1 : vector<16x8xf32>, vector<16x8xf32>, vector<16x8xf32>, vector<16x8xf32> -> vector<16x32xf32>
    %219 = arith.truncf %218 : vector<16x32xf32> to vector<16x32xbf16>
    %cst_83 = arith.constant dense<0.000000e+00> : vector<16x32xf32>
    %220 = tpu.matmul %219, %144, %cst_83 {dimension_numbers = #tpu.dot_dimension_numbers<[1], [0], [0], [1], [0, 0, 1, 1], [], []>} : vector<16x32xbf16>, vector<32x32xbf16>, vector<16x32xf32> -> vector<16x32xf32>
    %221 = vector.broadcast %145 : vector<1x32xf32> to vector<16x32xf32>
    %222 = arith.addf %220, %221 : vector<16x32xf32>
    %223 = arith.addf %139, %222 : vector<16x32xf32>
    %c0_84 = arith.constant 0 : index
    %c0_85 = arith.constant 0 : index
    %224 = vector.load %arg22[%c0_84, %c0_85] : memref<1x32xf32, #tpu.memory_space<vmem>>, vector<1x32xf32>
    %c0_86 = arith.constant 0 : index
    %c0_87 = arith.constant 0 : index
    %225 = vector.load %arg23[%c0_86, %c0_87] : memref<1x32xf32, #tpu.memory_space<vmem>>, vector<1x32xf32>
    %c0_88 = arith.constant 0 : index
    %c0_89 = arith.constant 0 : index
    %226 = vector.load %arg24[%c0_88, %c0_89] : memref<32x256xbf16, #tpu.memory_space<vmem>>, vector<32x256xbf16>
    %c0_90 = arith.constant 0 : index
    %c0_91 = arith.constant 0 : index
    %227 = vector.load %arg25[%c0_90, %c0_91] : memref<1x256xf32, #tpu.memory_space<vmem>>, vector<1x256xf32>
    %c0_92 = arith.constant 0 : index
    %c0_93 = arith.constant 0 : index
    %228 = vector.load %arg26[%c0_92, %c0_93] : memref<128x32xbf16, #tpu.memory_space<vmem>>, vector<128x32xbf16>
    %c0_94 = arith.constant 0 : index
    %c0_95 = arith.constant 0 : index
    %229 = vector.load %arg27[%c0_94, %c0_95] : memref<1x32xf32, #tpu.memory_space<vmem>>, vector<1x32xf32>
    %cst_96 = arith.constant dense<0.000000e+00> : vector<16xf32>
    %230 = vector.multi_reduction <add>, %223, %cst_96 [1] : vector<16x32xf32> to vector<16xf32>
    %231 = vector.shape_cast %230 : vector<16xf32> to vector<16x1xf32>
    %cst_97 = arith.constant 3.200000e+01 : f32
    %232 = vector.broadcast %cst_97 : f32 to vector<16x1xf32>
    %233 = arith.divf %231, %232 : vector<16x1xf32>
    %234 = vector.broadcast %233 : vector<16x1xf32> to vector<16x32xf32>
    %235 = arith.subf %223, %234 : vector<16x32xf32>
    %236 = arith.mulf %235, %235 : vector<16x32xf32>
    %cst_98 = arith.constant dense<0.000000e+00> : vector<16xf32>
    %237 = vector.multi_reduction <add>, %236, %cst_98 [1] : vector<16x32xf32> to vector<16xf32>
    %238 = vector.shape_cast %237 : vector<16xf32> to vector<16x1xf32>
    %cst_99 = arith.constant 3.200000e+01 : f32
    %239 = vector.broadcast %cst_99 : f32 to vector<16x1xf32>
    %240 = arith.divf %238, %239 : vector<16x1xf32>
    %241 = vector.broadcast %233 : vector<16x1xf32> to vector<16x32xf32>
    %242 = arith.subf %223, %241 : vector<16x32xf32>
    %cst_100 = arith.constant 9.99999974E-6 : f32
    %243 = vector.broadcast %cst_100 : f32 to vector<16x1xf32>
    %244 = arith.addf %240, %243 : vector<16x1xf32>
    %245 = math.rsqrt %244 : vector<16x1xf32>
    %246 = vector.broadcast %245 : vector<16x1xf32> to vector<16x32xf32>
    %247 = arith.mulf %242, %246 : vector<16x32xf32>
    %248 = vector.broadcast %224 : vector<1x32xf32> to vector<16x32xf32>
    %249 = arith.mulf %247, %248 : vector<16x32xf32>
    %250 = vector.broadcast %225 : vector<1x32xf32> to vector<16x32xf32>
    %251 = arith.addf %249, %250 : vector<16x32xf32>
    %252 = arith.truncf %251 : vector<16x32xf32> to vector<16x32xbf16>
    %cst_101 = arith.constant dense<0.000000e+00> : vector<16x256xf32>
    %253 = tpu.matmul %252, %226, %cst_101 {dimension_numbers = #tpu.dot_dimension_numbers<[1], [0], [0], [1], [0, 0, 1, 1], [], []>} : vector<16x32xbf16>, vector<32x256xbf16>, vector<16x256xf32> -> vector<16x256xf32>
    %254 = vector.broadcast %227 : vector<1x256xf32> to vector<16x256xf32>
    %255 = arith.addf %253, %254 : vector<16x256xf32>
    %256 = vector.extract_strided_slice %255 {offsets = [0, 0], sizes = [16, 128], strides = [1, 1]} : vector<16x256xf32> to vector<16x128xf32>
    %257 = vector.extract_strided_slice %255 {offsets = [0, 128], sizes = [16, 128], strides = [1, 1]} : vector<16x256xf32> to vector<16x128xf32>
    %cst_102 = arith.constant 5.000000e-01 : f32
    %258 = vector.broadcast %cst_102 : f32 to vector<16x128xf32>
    %259 = arith.mulf %258, %257 : vector<16x128xf32>
    %cst_103 = arith.constant 0.707106769 : f32
    %260 = vector.broadcast %cst_103 : f32 to vector<16x128xf32>
    %261 = arith.mulf %257, %260 : vector<16x128xf32>
    %262 = math.erf %261 : vector<16x128xf32>
    %cst_104 = arith.constant 1.000000e+00 : f32
    %263 = vector.broadcast %cst_104 : f32 to vector<16x128xf32>
    %264 = arith.addf %263, %262 : vector<16x128xf32>
    %265 = arith.mulf %259, %264 : vector<16x128xf32>
    %266 = arith.mulf %256, %265 : vector<16x128xf32>
    %267 = arith.truncf %266 : vector<16x128xf32> to vector<16x128xbf16>
    %cst_105 = arith.constant dense<0.000000e+00> : vector<16x32xf32>
    %268 = tpu.matmul %267, %228, %cst_105 {dimension_numbers = #tpu.dot_dimension_numbers<[1], [0], [0], [1], [0, 0, 1, 1], [], []>} : vector<16x128xbf16>, vector<128x32xbf16>, vector<16x32xf32> -> vector<16x32xf32>
    %269 = vector.broadcast %229 : vector<1x32xf32> to vector<16x32xf32>
    %270 = arith.addf %268, %269 : vector<16x32xf32>
    %271 = arith.addf %223, %270 : vector<16x32xf32>
    %c0_106 = arith.constant 0 : index
    %c0_107 = arith.constant 0 : index
    %272 = vector.load %arg28[%c0_106, %c0_107] : memref<16x32xf32, #tpu.memory_space<vmem>>, vector<16x32xf32>
    tpu.vector_store %arg28[%c0_106, %c0_107], %271 {strides = array<i32>} : memref<16x32xf32, #tpu.memory_space<vmem>>, vector<16x32xf32>,
    return
  }
}

</mosaic_0001>

<bundles_post_ra>
// kernel: forward.6
= control target key start
LH: loop header
LB: loop body
LE: loop exit
PB: predicated region body
PF: predicated region fallthrough
CT: control target
= control target key end

     0   :  { %vm118_vm0 = vcmask 220160   ;;  %v374_v3 = vmov 0   ;;  %s641_s1 = inlined_call_operand.vmem [shape: f32[512,27], index: 1, kind: input, shape index: {}]   ;;  %s642_s0 = inlined_call_operand.vmem [shape: bf16[4,27], index: 0, kind: input, shape index: {}]   ;;  %s643_s2 = inlined_call_operand.vmem [shape: f32[4,1], index: 2, kind: input, shape index: {}]   ;;  %s644_s3 = inlined_call_operand.vmem [shape: f32[4,512], index: 3, kind: output, shape index: {}]  }
   0x1   :  { %v32_v0 = vld [vmem:[%s641_s1 + $0x80] sm:$0xff]  ;;  %v33_v1 = vld [vmem:[%s641_s1 + $0x88] sm:$0xff]  ;;  %373 = vset.pattern.permute.xlu0 %v374_v3  ;;  %v34_v12 = vld [vmem:[%s641_s1 + $0x90] sm:$0xff] }
   0x2   :  { %v64_v2 = vld [vmem:[%s641_s1 + $0x180] sm:$0xff]  ;;  %v88_v4 = vpack.c.bf16 %v33_v1, %v32_v0  ;;  %v65_v5 = vld [vmem:[%s641_s1 + $0x188] sm:$0xff]  ;;  %v35_v14 = vld [vmem:[%s641_s1 + $0x98] sm:$0xff] }
   0x3   :  { %v16_v6 = vld [vmem:[%s641_s1] sm:$0xff]  ;;  %v17_v7 = vld [vmem:[%s641_s1 + $0x8] sm:$0xff]  ;;  %v104_v8 = vpack.c.bf16 %v65_v5, %v64_v2  ;;  %v66_v15 = vld [vmem:[%s641_s1 + $0x190] sm:$0xff]  ;;  %v89_v18 = vpack.c.bf16 %v35_v14, %v34_v12 }
   0x4   :  { %v80_v9 = vpack.c.bf16 %v17_v7, %v16_v6  ;;  %v48_v10 = vld [vmem:[%s641_s1 + $0x100] sm:$0xff]  ;;  %v49_v11 = vld [vmem:[%s641_s1 + $0x108] sm:$0xff]  ;;  %356 = vmatprep.subr.msk.bf16.mxu0 %vm118_vm0, %v88_v4  ;;  %v67_v16 = vld [vmem:[%s641_s1 + $0x198] sm:$0xff] }
   0x5   :  { %v96_v13 = vpack.c.bf16 %v49_v11, %v48_v10  ;;  %364 = vmatprep.subr.msk.bf16.mxu1 %vm118_vm0, %v104_v8  ;;  %v105_v19 = vpack.c.bf16 %v67_v16, %v66_v15  ;;  %v18_v20 = vld [vmem:[%s641_s1 + $0x10] sm:$0xff]  ;;  %v19_v21 = vld [vmem:[%s641_s1 + $0x18] sm:$0xff]  ;;  %v36_v27 = vld [vmem:[%s641_s1 + $0xa0] sm:$0xff] }
   0x6   :  { %v123_v17 = vsel %vm118_vm0, %v80_v9, 0  ;;  %v50_v22 = vld [vmem:[%s641_s1 + $0x110] sm:$0xff]  ;;  %v51_v24 = vld [vmem:[%s641_s1 + $0x118] sm:$0xff]  ;;  %v81_v25 = vpack.c.bf16 %v19_v21, %v18_v20  ;;  %v37_v28 = vld [vmem:[%s641_s1 + $0xa8] sm:$0xff] }
   0x7   :  { %321 = vmatpush3.bf16.xpose.msra.mxu0 %v123_v17  ;;  %v171_v23 = vsel %vm118_vm0, %v96_v13, 0  ;;  %v97_v26 = vpack.c.bf16 %v51_v24, %v50_v22  ;;  %v68_v29 = vld [vmem:[%s641_s1 + $0x1a0] sm:$0xff]  ;;  %v69_v30 = vld [vmem:[%s641_s1 + $0x1a8] sm:$0xff]  ;;  %v90_v32 = vpack.c.bf16 %v37_v28, %v36_v27  ;;  %v38_v41 = vld [vmem:[%s641_s1 + $0xb0] sm:$0xff] }
   0x8   :  { %339 = vmatpush3.bf16.xpose.msra.mxu1 %v171_v23  ;;  %357 = vmatprep.subr.msk.bf16.mxu0 %vm118_vm0, %v89_v18  ;;  %v126_v31 = vsel %vm118_vm0, %v81_v25, 0  ;;  %v106_v34 = vpack.c.bf16 %v69_v30, %v68_v29  ;;  %v20_v35 = vld [vmem:[%s641_s1 + $0x20] sm:$0xff]  ;;  %v21_v36 = vld [vmem:[%s641_s1 + $0x28] sm:$0xff]  ;;  %v39_v42 = vld [vmem:[%s641_s1 + $0xb8] sm:$0xff] }
   0x9   :  { %365 = vmatprep.subr.msk.bf16.mxu1 %vm118_vm0, %v105_v19  ;;  %v174_v33 = vsel %vm118_vm0, %v97_v26, 0  ;;  %v52_v37 = vld [vmem:[%s641_s1 + $0x120] sm:$0xff]  ;;  %v53_v38 = vld [vmem:[%s641_s1 + $0x128] sm:$0xff]  ;;  %v82_v39 = vpack.c.bf16 %v21_v36, %v20_v35  ;;  %v70_v43 = vld [vmem:[%s641_s1 + $0x1b0] sm:$0xff]  ;;  %v91_v46 = vpack.c.bf16 %v39_v42, %v38_v41 }
   0xa   :  { %v98_v40 = vpack.c.bf16 %v53_v38, %v52_v37  ;;  %v71_v44 = vld [vmem:[%s641_s1 + $0x1b8] sm:$0xff]  ;;  %v22_v49 = vld [vmem:[%s641_s1 + $0x30] sm:$0xff]  ;;  %v506_v53 = vld [vmem:[%s642_s0] sm:$0x3] }
   0xb   :  { %v129_v45 = vsel %vm118_vm0, %v82_v39, 0  ;;  %v107_v48 = vpack.c.bf16 %v71_v44, %v70_v43  ;;  %v23_v50 = vld [vmem:[%s641_s1 + $0x38] sm:$0xff]  ;;  %v54_v51 = vld [vmem:[%s641_s1 + $0x130] sm:$0xff]  ;;  %v112_v54 = vld [vmem:[%s643_s2] sm:$0xf]  ;;  %336 = vmatprep.mubr.msk.bf16.mxu0 %vm118_vm0, %v506_v53  ;;  %354 = vmatprep.mubr.msk.bf16.mxu1 %vm118_vm0, %v506_v53 }
   0xc   :  { %v177_v47 = vsel %vm118_vm0, %v98_v40, 0  ;;  %v55_v52 = vld [vmem:[%s641_s1 + $0x138] sm:$0xff]  ;;  %v83_v55 = vpack.c.bf16 %v23_v50, %v22_v49  ;;  %v40_v57 = vld [vmem:[%s641_s1 + $0xc0] sm:$0xff]  ;;  %v41_v58 = vld [vmem:[%s641_s1 + $0xc8] sm:$0xff]  ;;  %115 = vperm.xlu0 %373, %v112_v54  }
   0xd   :  { %v99_v56 = vpack.c.bf16 %v55_v52, %v54_v51  ;;  %v72_v59 = vld [vmem:[%s641_s1 + $0x1c0] sm:$0xff]  ;;  %v73_v60 = vld [vmem:[%s641_s1 + $0x1c8] sm:$0xff]  ;;  %v92_v62 = vpack.c.bf16 %v41_v58, %v40_v57  ;;  %v42_v7 = vld [vmem:[%s641_s1 + $0xd0] sm:$0xff] }
   0xe   :  { %v132_v61 = vsel %vm118_vm0, %v83_v55, 0  ;;  %v108_v0 = vpack.c.bf16 %v73_v60, %v72_v59  ;;  %v24_v1 = vld [vmem:[%s641_s1 + $0x40] sm:$0xff]  ;;  %v25_v2 = vld [vmem:[%s641_s1 + $0x48] sm:$0xff]  ;;  %v43_v8 = vld [vmem:[%s641_s1 + $0xd8] sm:$0xff] }
   0xf   :  { %323 = vmatpush3.bf16.xpose.msra.mxu0 %v126_v31  ;;  %v180_v63 = vsel %vm118_vm0, %v99_v56, 0  ;;  %v56_v3 = vld [vmem:[%s641_s1 + $0x140] sm:$0xff]  ;;  %v57_v4 = vld [vmem:[%s641_s1 + $0x148] sm:$0xff]  ;;  %v84_v5 = vpack.c.bf16 %v25_v2, %v24_v1  ;;  %v74_v9 = vld [vmem:[%s641_s1 + $0x1d0] sm:$0xff]  ;;  %v93_v12 = vpack.c.bf16 %v43_v8, %v42_v7 }
  0x10   :  { %341 = vmatpush3.bf16.xpose.msra.mxu1 %v174_v33  ;;  %358 = vmatprep.subr.msk.bf16.mxu0 %vm118_vm0, %v90_v32  ;;  %v100_v6 = vpack.c.bf16 %v57_v4, %v56_v3  ;;  %v75_v10 = vld [vmem:[%s641_s1 + $0x1d8] sm:$0xff]  ;;  %v26_v15 = vld [vmem:[%s641_s1 + $0x50] sm:$0xff]  ;;  %v44_v21 = vld [vmem:[%s641_s1 + $0xe0] sm:$0xff] }
  0x11   :  { %366 = vmatprep.subr.msk.bf16.mxu1 %vm118_vm0, %v106_v34  ;;  %v135_v11 = vsel %vm118_vm0, %v84_v5, 0  ;;  %v109_v14 = vpack.c.bf16 %v75_v10, %v74_v9  ;;  %v27_v16 = vld [vmem:[%s641_s1 + $0x58] sm:$0xff]  ;;  %v58_v17 = vld [vmem:[%s641_s1 + $0x150] sm:$0xff]  ;;  %v45_v22 = vld [vmem:[%s641_s1 + $0xe8] sm:$0xff] }
  0x12   :  { %v183_v13 = vsel %vm118_vm0, %v100_v6, 0  ;;  %v59_v18 = vld [vmem:[%s641_s1 + $0x158] sm:$0xff]  ;;  %v85_v19 = vpack.c.bf16 %v27_v16, %v26_v15  ;;  %v76_v23 = vld [vmem:[%s641_s1 + $0x1e0] sm:$0xff]  ;;  %v77_v24 = vld [vmem:[%s641_s1 + $0x1e8] sm:$0xff]  ;;  %v94_v26 = vpack.c.bf16 %v45_v22, %v44_v21 }
  0x13   :  { %v101_v20 = vpack.c.bf16 %v59_v18, %v58_v17  ;;  %v110_v28 = vpack.c.bf16 %v77_v24, %v76_v23  ;;  %v28_v29 = vld [vmem:[%s641_s1 + $0x60] sm:$0xff]  ;;  %v29_v30 = vld [vmem:[%s641_s1 + $0x68] sm:$0xff]  ;;  %v46_v35 = vld [vmem:[%s641_s1 + $0xf0] sm:$0xff] }
  0x14   :  { %v138_v25 = vsel %vm118_vm0, %v85_v19, 0  ;;  %v60_v31 = vld [vmem:[%s641_s1 + $0x160] sm:$0xff]  ;;  %v61_v32 = vld [vmem:[%s641_s1 + $0x168] sm:$0xff]  ;;  %v86_v33 = vpack.c.bf16 %v29_v30, %v28_v29  ;;  %v47_v36 = vld [vmem:[%s641_s1 + $0xf8] sm:$0xff] }
  0x15   :  { %v186_v27 = vsel %vm118_vm0, %v101_v20, 0  ;;  %v102_v34 = vpack.c.bf16 %v61_v32, %v60_v31  ;;  %v78_v37 = vld [vmem:[%s641_s1 + $0x1f0] sm:$0xff]  ;;  %v79_v38 = vld [vmem:[%s641_s1 + $0x1f8] sm:$0xff]  ;;  %v95_v40 = vpack.c.bf16 %v47_v36, %v46_v35 }
  0x16   :  { %v141_v39 = vsel %vm118_vm0, %v86_v33, 0  ;;  %v111_v42 = vpack.c.bf16 %v79_v38, %v78_v37  ;;  %v30_v43 = vld [vmem:[%s641_s1 + $0x70] sm:$0xff]  ;;  %v31_v44 = vld [vmem:[%s641_s1 + $0x78] sm:$0xff] }
  0x17   :  { %325 = vmatpush3.bf16.xpose.msra.mxu0 %v129_v45  ;;  %v189_v41 = vsel %vm118_vm0, %v102_v34, 0  ;;  %v62_v45 = vld [vmem:[%s641_s1 + $0x170] sm:$0xff] }
  0x18   :  { %343 = vmatpush3.bf16.xpose.msra.mxu1 %v177_v47  ;;  %359 = vmatprep.subr.msk.bf16.mxu0 %vm118_vm0, %v91_v46  ;;  %v63_v46 = vld [vmem:[%s641_s1 + $0x178] sm:$0xff]  ;;  %v87_v47 = vpack.c.bf16 %v31_v44, %v30_v43 }
  0x19   :  { %367 = vmatprep.subr.msk.bf16.mxu1 %vm118_vm0, %v107_v48  ;;  %v103_v48 = vpack.c.bf16 %v63_v46, %v62_v45 }
  0x1a   :  { %v144_v49 = vsel %vm118_vm0, %v87_v47, 0 }
  0x1b   :  { %v192_v50 = vsel %vm118_vm0, %v103_v48, 0 }
  0x1f   :  { %327 = vmatpush3.bf16.xpose.msra.mxu0 %v132_v61 }
  0x20   :  { %345 = vmatpush3.bf16.xpose.msra.mxu1 %v180_v63  ;;  %360 = vmatprep.subr.msk.bf16.mxu0 %vm118_vm0, %v92_v62 }
  0x21   :  { %368 = vmatprep.subr.msk.bf16.mxu1 %vm118_vm0, %v108_v0 }
  0x27   :  { %329 = vmatpush3.bf16.xpose.msra.mxu0 %v135_v11 }
  0x28   :  { %347 = vmatpush3.bf16.xpose.msra.mxu1 %v183_v13  ;;  %361 = vmatprep.subr.msk.bf16.mxu0 %vm118_vm0, %v93_v12 }
  0x29   :  { %369 = vmatprep.subr.msk.bf16.mxu1 %vm118_vm0, %v109_v14 }
  0x2f   :  { %331 = vmatpush3.bf16.xpose.msra.mxu0 %v138_v25 }
  0x30   :  { %349 = vmatpush3.bf16.xpose.msra.mxu1 %v186_v27  ;;  %362 = vmatprep.subr.msk.bf16.mxu0 %vm118_vm0, %v94_v26 }
  0x31   :  { %370 = vmatprep.subr.msk.bf16.mxu1 %vm118_vm0, %v110_v28 }
  0x37   :  { %333 = vmatpush3.bf16.xpose.msra.mxu0 %v141_v39 }
  0x38   :  { %351 = vmatpush3.bf16.xpose.msra.mxu1 %v189_v41  ;;  %363 = vmatprep.subr.msk.bf16.mxu0 %vm118_vm0, %v95_v40 }
  0x39   :  { %371 = vmatprep.subr.msk.bf16.mxu1 %vm118_vm0, %v111_v42 }
  0x3f   :  { %335 = vmatpush3.bf16.xpose.msra.mxu0 %v144_v49 }
  0x40   :  { %353 = vmatpush3.bf16.xpose.msra.mxu1 %v192_v50 }
  0x46   :  { %337 = vmatmul.mubr.msk.bf16.vlgmr.msra.gmra.mrb[0].mxu0 %vm118_vm0, %v506_v53 }
  0x47   :  { %355 = vmatmul.mubr.msk.bf16.vlgmr.msra.gmra.mrb[0].mxu1 %vm118_vm0, %v506_v53 }
  0x8b   :  { %v116_v51 = vpop.permute.xlu0 %115 }
 0x119   :  { %v252_v52 = vpop.f32.mrb[0].mxu0 }
 0x11a   :  { %v253_v54 = vadd.f32 %v252_v52, %v116_v51  ;;  %v293_v55 = vpop.f32.mrb[0].mxu1  ;;  %v254_v56 = vpop.f32.mrb[1].mxu0 }
 0x11b   :  { %v294_v57 = vadd.f32 %v293_v55, %v116_v51  ;;  %v255_v58 = vadd.f32 %v254_v56, %v116_v51  ;;  %v295_v59 = vpop.f32.mrb[1].mxu1  ;;  %v256_v60 = vpop.f32.mrb[2].mxu0 }
 0x11c   :  { %v300_v61 = vmax.f32 %v253_v54, 0.0  ;;  %v296_v62 = vadd.f32 %v295_v59, %v116_v51  ;;  %v297_v63 = vpop.f32.mrb[2].mxu1  ;;  %v257_v0 = vpop.f32.mrb[3].mxu0 }
 0x11d   :  { %v302_v1 = vmax.f32 %v294_v57, 0.0  ;;  %v301_v2 = vmax.f32 %v255_v58, 0.0  ;;  %v298_v3 = vpop.f32.mrb[3].mxu1 }
 0x11e   :  { %v303_v4 = vmax.f32 %v296_v62, 0.0 }
 0x11f   :  { %v308_v5 = vcombine.low %v300_v61, %v301_v2 }
 0x120   :  { %v309_v6 = vcombine.low %v302_v1, %v303_v4 }
 0x121   :  { %312 = vst [vmem:[%s644_s3] sm:$0xff] %v308_v5 }
 0x122   :  { %313 = vst [vmem:[%s644_s3 + $0x8] sm:$0xff] %v309_v6 }

// kernel: forward.7
= control target key start
LH: loop header
LB: loop body
LE: loop exit
PB: predicated region body
PF: predicated region fallthrough
CT: control target
= control target key end

     0   :  { %v154_v0 = vmov 0.0   ;;  %vm46_vm0 = vcmask 293888   ;;  %vm155_vm1 = vmmov 0   ;;  %v156_v4 = vmov 0   ;;  %s243_s1 = inlined_call_operand.vmem [shape: f32[128,36], index: 1, kind: input, shape index: {}]   ;;  %s244_s2 = inlined_call_operand.vmem [shape: f32[8,1], index: 2, kind: input, shape index: {}]   ;;  %s245_s0 = inlined_call_operand.vmem [shape: bf16[8,36], index: 0, kind: input, shape index: {}]   ;;  %s246_s3 = inlined_call_operand.vmem [shape: f32[8,128], index: 3, kind: output, shape index: {}]  }
   0x1   :  { %130 = vmatprep.subr.bf16.mxu0 %v154_v0  ;;  %v16_v1 = vld [vmem:[%s243_s1] sm:$0xff]  ;;  %v17_v2 = vld [vmem:[%s243_s1 + $0x8] sm:$0xff]  ;;  %146 = vmatprep.mubr.msk.bf16.mxu0 %vm155_vm1, %v154_v0  ;;  %v18_v5 = vld [vmem:[%s243_s1 + $0x10] sm:$0xff] }
   0x2   :  { %v32_v3 = vpack.c.bf16 %v17_v2, %v16_v1  ;;  %153 = vset.pattern.permute.xlu0 %v156_v4  ;;  %v19_v6 = vld [vmem:[%s243_s1 + $0x18] sm:$0xff]  ;;  %v40_v9 = vld [vmem:[%s244_s2] sm:$0xff]  ;;  %v21_v12 = vld [vmem:[%s243_s1 + $0x28] sm:$0xff] }
   0x3   :  { %v33_v8 = vpack.c.bf16 %v19_v6, %v18_v5  ;;  %43 = vperm.xlu0 %153, %v40_v9   ;;  %v20_v11 = vld [vmem:[%s243_s1 + $0x20] sm:$0xff]  ;;  %v22_v15 = vld [vmem:[%s243_s1 + $0x30] sm:$0xff]  ;;  %v23_v16 = vld [vmem:[%s243_s1 + $0x38] sm:$0xff] }
   0x4   :  { %v51_v7 = vsel %vm46_vm0, %v32_v3, 0  ;;  %v34_v13 = vpack.c.bf16 %v21_v12, %v20_v11  ;;  %v35_v17 = vpack.c.bf16 %v23_v16, %v22_v15  ;;  %v24_v19 = vld [vmem:[%s243_s1 + $0x40] sm:$0xff]  ;;  %v25_v20 = vld [vmem:[%s243_s1 + $0x48] sm:$0xff]  ;;  %v26_v23 = vld [vmem:[%s243_s1 + $0x50] sm:$0xff] }
   0x5   :  { %131 = vmatpush3.bf16.xpose.msra.mxu0 %v51_v7  ;;  %v54_v10 = vsel %vm46_vm0, %v33_v8, 0  ;;  %v36_v21 = vpack.c.bf16 %v25_v20, %v24_v19  ;;  %v27_v24 = vld [vmem:[%s243_s1 + $0x58] sm:$0xff]  ;;  %v28_v27 = vld [vmem:[%s243_s1 + $0x60] sm:$0xff]  ;;  %v29_v28 = vld [vmem:[%s243_s1 + $0x68] sm:$0xff] }
   0x6   :  { %132 = vmatprep.subr.bf16.mxu0 %v154_v0  ;;  %v57_v14 = vsel %vm46_vm0, %v34_v13, 0  ;;  %v60_v18 = vsel %vm46_vm0, %v35_v17, 0  ;;  %v37_v25 = vpack.c.bf16 %v27_v24, %v26_v23  ;;  %v38_v29 = vpack.c.bf16 %v29_v28, %v28_v27  ;;  %v30_v31 = vld [vmem:[%s243_s1 + $0x70] sm:$0xff]  ;;  %v31_v32 = vld [vmem:[%s243_s1 + $0x78] sm:$0xff]  ;;  %v15_v35 = vld [vmem:[%s245_s0] sm:$0xf] }
   0x7   :  { %v63_v22 = vsel %vm46_vm0, %v36_v21, 0  ;;  %v39_v33 = vpack.c.bf16 %v31_v32, %v30_v31 }
   0x8   :  { %v66_v26 = vsel %vm46_vm0, %v37_v25, 0  ;;  %v69_v30 = vsel %vm46_vm0, %v38_v29, 0 }
   0x9   :  { %v72_v34 = vsel %vm46_vm0, %v39_v33, 0 }
   0xd   :  { %133 = vmatpush3.bf16.xpose.msra.mxu0 %v54_v10 }
   0xe   :  { %134 = vmatprep.subr.bf16.mxu0 %v154_v0 }
  0x15   :  { %135 = vmatpush3.bf16.xpose.msra.mxu0 %v57_v14 }
  0x16   :  { %136 = vmatprep.subr.bf16.mxu0 %v154_v0 }
  0x1d   :  { %137 = vmatpush3.bf16.xpose.msra.mxu0 %v60_v18 }
  0x1e   :  { %138 = vmatprep.subr.bf16.mxu0 %v154_v0 }
  0x25   :  { %139 = vmatpush3.bf16.xpose.msra.mxu0 %v63_v22 }
  0x26   :  { %140 = vmatprep.subr.bf16.mxu0 %v154_v0 }
  0x2d   :  { %141 = vmatpush3.bf16.xpose.msra.mxu0 %v66_v26 }
  0x2e   :  { %142 = vmatprep.subr.bf16.mxu0 %v154_v0 }
  0x35   :  { %143 = vmatpush3.bf16.xpose.msra.mxu0 %v69_v30 }
  0x36   :  { %144 = vmatprep.subr.bf16.mxu0 %v154_v0 }
  0x3d   :  { %145 = vmatpush3.bf16.xpose.msra.mxu0 %v72_v34 }
  0x44   :  { %147 = vmatmul.mubr.msk.bf16.vlgmr.msra.gmra.mrb[0].mxu0 %vm46_vm0, %v15_v35 }
  0x82   :  { %v44_v36 = vpop.permute.xlu0 %43 }
 0x117   :  { %v108_v37 = vpop.f32.mrb[0].mxu0 }
 0x118   :  { %v109_v38 = vadd.f32 %v108_v37, %v44_v36  ;;  %v148_v39 = vpop.f32.mrb[1].mxu0 }
 0x119   :  { %v111_v40 = vpop.f32.mrb[2].mxu0 }
 0x11a   :  { %v114_v41 = vmax.f32 %v109_v38, 0.0  ;;  %v149_v42 = vpop.f32.mrb[3].mxu0 }
 0x11c   :  { %115 = vst [vmem:[%s246_s3] sm:$0xff] %v114_v41 }

// kernel: forward.8
= control target key start
LH: loop header
LB: loop body
LE: loop exit
PB: predicated region body
PF: predicated region fallthrough
CT: control target
= control target key end

     0   :  { %vm38_vm0 = vcmask 588800   ;;  %s146_s28 = smov 16   ;;  %vm117_vm1 = vcmask 130048   ;;  %s222_s1 = inlined_call_operand.vmem [shape: bf16[16,72], index: 1, kind: input, shape index: {}]   ;;  %s223_s0 = inlined_call_operand.vmem [shape: f32[32,72], index: 0, kind: input, shape index: {}]   ;;  %s224_s3 = inlined_call_operand.vmem [shape: f32[32,112], index: 3, kind: input, shape index: {}]   ;;  %s225_s2 = inlined_call_operand.vmem [shape: f32[1,16], index: 2, kind: input, shape index: {}]   ;;  %s226_s4 = inlined_call_operand.vmem [shape: f32[32,128], index: 4, kind: output, shape index: {}]  }
   0x1   :  { %v145_v0 = vld [vmem:[%s222_s1] sm:$0xff]   ;;  %v19_v2 = vld [vmem:[%s223_s0 + $0x8] sm:$0xff]  ;;  %v99_v5 = vld [vmem:[%s224_s3 + $0x10] sm:$0xff] }
   0x2   :  { %v18_v1 = vld [vmem:[%s223_s0] sm:$0xff]  ;;  %143 = vmatprep.subr.msk.bf16.mxu0 %vm38_vm0, %v145_v0  ;;  %v46_v3 = vsel %vm38_vm0, %v145_v0, 0  ;;  %v20_v7 = vld [vmem:[%s223_s0 + $0x10] sm:$0xff]  ;;  %v21_v8 = vld [vmem:[%s223_s0 + $0x18] sm:$0xff]  ;;  %109 = vrot.lane.b32.xlu1 %v99_v5, %s146_s28 }
   0x3   :  { %v22_v4 = vpack.c.bf16 %v19_v2, %v18_v1  ;;  %v97_v6 = vld [vmem:[%s224_s3] sm:$0xff]  ;;  %138 = vmatpush3.bf16.xpose.msra.mxu0 %v46_v3  ;;  %v100_v9 = vld [vmem:[%s224_s3 + $0x18] sm:$0xff]  ;;  %v98_v10 = vld [vmem:[%s224_s3 + $0x8] sm:$0xff]  ;;  %v23_v11 = vpack.c.bf16 %v21_v8, %v20_v7 }
   0x4   :  { %105 = vrot.lane.b32.xlu0 %v97_v6, %s146_s28  ;;  %v130_v14 = vld [vmem:[%s225_s2] ss:$0 sm:$0xff] }
   0x5   :  { %139 = vmatprep.mubr.msk.bf16.mxu0 %vm38_vm0, %v22_v4 }
   0x6   :  { %111 = vrot.lane.b32.xlu1 %v100_v9, %s146_s28 }
   0x8   :  { %107 = vrot.lane.b32.xlu0 %v98_v10, %s146_s28 }
   0xa   :  { %140 = vmatmul.mubr.msk.bf16.vlgmr.msra.gmra.mrb[0].mxu0 %vm38_vm0, %v23_v11 }
  0x74   :  { %v110_v12 = vpop.permute.xlu1 %109 }
  0x76   :  { %v106_v13 = vpop.permute.xlu0 %105 }
  0x78   :  { %v112_v20 = vpop.permute.xlu1 %111 }
  0x7a   :  { %v108_v24 = vpop.permute.xlu0 %107 }
  0xdd   :  { %v141_v15 = vpop.f32.mrb[0].mxu0 }
  0xde   :  { %v91_v16 = vadd.f32 %v141_v15, %v130_v14  ;;  %v82_v17 = vpop.f32.mrb[1].mxu0 }
  0xdf   :  { %v83_v18 = vadd.f32 %v130_v14, %v82_v17  ;;  %v142_v19 = vpop.f32.mrb[2].mxu0 }
  0xe0   :  { %v120_v21 = vsel %vm117_vm1, %v91_v16, %v110_v12  ;;  %v94_v22 = vadd.f32 %v142_v19, %v130_v14  ;;  %v85_v23 = vpop.f32.mrb[3].mxu0 }
  0xe1   :  { %124 = vst [vmem:[%s226_s4 + $0x10] sm:$0xff] %v120_v21  ;;  %v118_v25 = vsel %vm117_vm1, %v83_v18, %v106_v13  ;;  %v86_v26 = vadd.f32 %v130_v14, %v85_v23 }
  0xe2   :  { %122 = vst [vmem:[%s226_s4] sm:$0xff] %v118_v25  ;;  %v121_v27 = vsel %vm117_vm1, %v94_v22, %v112_v20 }
  0xe3   :  { %125 = vst [vmem:[%s226_s4 + $0x18] sm:$0xff] %v121_v27  ;;  %v119_v28 = vsel %vm117_vm1, %v86_v26, %v108_v24 }
  0xe4   :  { %123 = vst [vmem:[%s226_s4 + $0x8] sm:$0xff] %v119_v28 }

// kernel: forward.5
= control target key start
LH: loop header
LB: loop body
LE: loop exit
PB: predicated region body
PF: predicated region fallthrough
CT: control target
= control target key end

     0   :  { %vm121_vm0 = vcmask 261120   ;;  %v2883_v6 = vmov 0.0   ;;  %v171_v8 = vlaneseq  ;;  %vm2884_vm2 = vmmov 0   ;;  %s2891_s29 = smov 16   ;;  %s3591_s1 = inlined_call_operand.vmem [shape: f32[16,128], index: 1, kind: input, shape index: {}]   ;;  %s3592_s0 = inlined_call_operand.vmem [shape: f32[16,32], index: 0, kind: input, shape index: {}]   ;;  %s3593_s7 = inlined_call_operand.vmem [shape: bf16[128,32], index: 7, kind: input, shape index: {}]   ;;  %s3594_s6 = inlined_call_operand.vmem [shape: bf16[32,16], index: 6, kind: input, shape index: {}]   ;;  %s3595_s4 = inlined_call_operand.vmem [shape: f32[1,128], index: 4, kind: input, shape index: {}]   ;;  %s3596_s2 = inlined_call_operand.vmem [shape: f32[1,32], index: 2, kind: input, shape index: {}]   ;;  %s3597_s5 = inlined_call_operand.vmem [shape: f32[1,128], index: 5, kind: input, shape index: {}]   ;;  %s3598_s3 = inlined_call_operand.vmem [shape: f32[1,32], index: 3, kind: input, shape index: {}]   ;;  %s3599_s8 = inlined_call_operand.vmem [shape: bf16[16,32], index: 8, kind: input, shape index: {}]   ;;  %s3600_s9 = inlined_call_operand.vmem [shape: f32[1,32], index: 9, kind: input, shape index: {}]   ;;  %s3601_s12 = inlined_call_operand.vmem [shape: bf16[32,256], index: 12, kind: input, shape index: {}]   ;;  %s3602_s14 = inlined_call_operand.vmem [shape: bf16[128,32], index: 14, kind: input, shape index: {}]   ;;  %s3603_s10 = inlined_call_operand.vmem [shape: f32[1,32], index: 10, kind: input, shape index: {}]   ;;  %s3604_s11 = inlined_call_operand.vmem [shape: f32[1,32], index: 11, kind: input, shape index: {}]   ;;  %s3605_s13 = inlined_call_operand.vmem [shape: f32[1,256], index: 13, kind: input, shape index: {}]   ;;  %s3606_s15 = inlined_call_operand.vmem [shape: f32[1,32], index: 15, kind: input, shape index: {}]   ;;  %s3607_s18 = inlined_call_operand.vmem [shape: bf16[32,32], index: 18, kind: input, shape index: {}]   ;;  %s3608_s19 = inlined_call_operand.vmem [shape: bf16[32,64], index: 19, kind: input, shape index: {}]   ;;  %s3609_s16 = inlined_call_operand.vmem [shape: f32[1,32], index: 16, kind: input, shape index: {}]   ;;  %s3610_s17 = inlined_call_operand.vmem [shape: f32[1,32], index: 17, kind: input, shape index: {}]   ;;  %s3611_s20 = inlined_call_operand.vmem [shape: bf16[32,32], index: 20, kind: input, shape index: {}]   ;;  %s3612_s21 = inlined_call_operand.vmem [shape: f32[1,32], index: 21, kind: input, shape index: {}]   ;;  %s3613_s24 = inlined_call_operand.vmem [shape: bf16[32,256], index: 24, kind: input, shape index: {}]   ;;  %s3614_s26 = inlined_call_operand.vmem [shape: bf16[128,32], index: 26, kind: input, shape index: {}]   ;;  %s3615_s22 = inlined_call_operand.vmem [shape: f32[1,32], index: 22, kind: input, shape index: {}]   ;;  %s3616_s23 = inlined_call_operand.vmem [shape: f32[1,32], index: 23, kind: input, shape index: {}]   ;;  %s3617_s25 = inlined_call_operand.vmem [shape: f32[1,256], index: 25, kind: input, shape index: {}]   ;;  %s3618_s27 = inlined_call_operand.vmem [shape: f32[1,32], index: 27, kind: input, shape index: {}]   ;;  %s3619_s28 = inlined_call_operand.vmem [shape: f32[16,32], index: 28, kind: output, shape index: {}]  }
   0x1   :  { %3626 = sst [smem:[#allocation2_spill]] %s3591_s1  ;;  %2505 = vmatprep.subr.bf16.mxu1 %v2883_v6  ;;  %2497 = vmatprep.subr.bf16.mxu0 %v2883_v6  ;;  %vm359_vm3 = vcmask 130048   ;;  %vm454_vm4 = vcmask 64512   ;;  %vm485_vm5 = vcmask 1043456   ;;  %vm2006_vm6 = vcmask 195584  }
   0x2   :  { %3627 = sst [smem:[#allocation3_spill]] %s3592_s0  ;;  %v172_v9 = vand.u32 127, %v171_v8  ;;  %2521 = vmatprep.mubr.msk.bf16.mxu1 %vm2884_vm2, %v2883_v6  ;;  %2501 = vmatprep.mubr.msk.bf16.mxu0 %vm2884_vm2, %v2883_v6 }
   0x3   :  { %3628 = sst [smem:[#allocation4_spill]] %s3593_s7 }
   0x4   :  { %3629 = sst [smem:[#allocation5_spill]] %s3594_s6  ;;  %s3640_s6 = sld [smem:[#allocation3_spill]]  ;;  %vm173_vm1 = vcmp.lt.s32.totalorder %v172_v9, 37 }
   0x5   :  { %3630 = sst [smem:[#allocation6_spill]] %s3595_s4  ;;  %s3642_s1 = sld [smem:[#allocation5_spill]] }
   0x6   :  { %3631 = sst [smem:[#allocation7_spill]] %s3596_s2 }
   0x7   :  { %3632 = sst [smem:[#allocation8_spill]] %s3597_s5  ;;  %s3643_s5 = sld [smem:[#allocation6_spill]] }
   0x8   :  { %3633 = sst [smem:[#allocation9_spill]] %s3598_s3  ;;  %s3644_s0 = sld [smem:[#allocation7_spill]] }
   0x9   :  { %3634 = sst [smem:[#allocation10_spill]] %s3599_s8  ;;  %s3645_s3 = sld [smem:[#allocation8_spill]] }
   0xa   :  { %3635 = sst [smem:[#allocation11_spill]] %s3600_s9  ;;  %s3639_s9 = sld [smem:[#allocation2_spill]]  ;;  %v3044_v1 = vld [vmem:[%s3640_s6] sm:$0xff]  ;;  %v3051_v3 = vld [vmem:[%s3640_s6 + $0x8] sm:$0xff] }
   0xb   :  { %3636 = sst [smem:[#allocation12_spill]] %s3601_s12  ;;  %v122_v2 = vsel %vm121_vm0, %v3044_v1, 0.0  ;;  %v125_v5 = vsel %vm121_vm0, %v3051_v3, 0.0  ;;  %v2777_v36 = vld [vmem:[%s3642_s1] sm:$0xff]   ;;  %v2779_v38 = vld [vmem:[%s3642_s1 + $0x8] sm:$0xff]   ;;  %s3646_s7 = sld [smem:[#allocation9_spill]] }
   0xc   :  { %3637 = sst [smem:[#allocation13_spill]] %s3602_s14  ;;  %123 = vadd.xlane.f32.xlu1 %v122_v2  ;;  %2498 = vmatpush3.bf16.msra.mxu0 %v2777_v36  ;;  %s2885_s8 = smov 112  }
   0xd   :  { %3638 = sst [smem:[#allocation14_spill]] %s3603_s10  ;;  %s3641_s10 = sld [smem:[#allocation4_spill]]  ;;  %2499 = vmatprep.subr.bf16.mxu0 %v2883_v6  ;;  %v2336_v53 = vld [vmem:[%s3643_s5] ss:$0 sm:$0xff] }
   0xe   :  { %v2334_v59 = vld [vmem:[%s3644_s0] ss:$0 sm:$0xff]  ;;  %s3648_s6 = sld [smem:[#allocation11_spill]]  ;;  %s3649_s14 = sld [smem:[#allocation12_spill]] }
   0xf   :  { %v2337_v60 = vld [vmem:[%s3645_s3] ss:$0 sm:$0xff]  ;;  %s3650_s30 = sld [smem:[#allocation13_spill]]  ;;  %s3651_s12 = sld [smem:[#allocation14_spill]] }
  0x10   :  { %v92_v0 = vld [vmem:[%s3639_s9] sm:$0xff]  ;;  %v93_v4 = vld [vmem:[%s3639_s9 + $0x8] sm:$0xff]  ;;  %126 = vadd.xlane.f32.xlu1 %v125_v5  ;;  %2500 = vmatpush3.bf16.msra.mxu0 %v2779_v38 }
  0x11   :  { %165 = vadd.xlane.f32.xlu0 %v92_v0  ;;  %2525 = vmatprep.subr.bf16.mxu0 %v2883_v6  ;;  %v2335_v5 = vld [vmem:[%s3646_s7] ss:$0 sm:$0xff] }
  0x13   :  { %v2770_v7 = vld [vmem:[%s3641_s10] sm:$0xff]   ;;  %v2771_v30 = vld [vmem:[%s3641_s10 + $0x8] sm:$0xff]   ;;  %v2772_v31 = vld [vmem:[%s3641_s10 + $0x10] sm:$0xff]  }
  0x14   :  { %2506 = vmatpush3.bf16.msra.mxu1 %v2770_v7  ;;  %v2773_v32 = vld [vmem:[%s3641_s10 + $0x18] sm:$0xff]   ;;  %v2774_v33 = vld [vmem:[%s3641_s10 + $0x20] sm:$0xff]   ;;  %v2775_v34 = vld [vmem:[%s3641_s10 + $0x28] sm:$0xff]  }
  0x15   :  { %167 = vadd.xlane.f32.xlu0 %v93_v4  ;;  %2507 = vmatprep.subr.bf16.mxu1 %v2883_v6  ;;  %v2776_v35 = vld [vmem:[%s3641_s10 + $0x30] sm:$0xff]   ;;  %v2778_v37 = vld [vmem:[%s3641_s10 + $0x38] sm:$0xff]   ;;  %s3647_s10 = sld [smem:[#allocation10_spill]] }
  0x18   :  { %2508 = vmatpush3.bf16.msra.mxu1 %v2771_v30 }
  0x19   :  { %2509 = vmatprep.subr.bf16.mxu1 %v2883_v6 }
  0x1c   :  { %2510 = vmatpush3.bf16.msra.mxu1 %v2772_v31 }
  0x1d   :  { %2511 = vmatprep.subr.bf16.mxu1 %v2883_v6 }
  0x20   :  { %2512 = vmatpush3.bf16.msra.mxu1 %v2773_v32 }
  0x21   :  { %2513 = vmatprep.subr.bf16.mxu1 %v2883_v6 }
  0x24   :  { %2514 = vmatpush3.bf16.msra.mxu1 %v2774_v33 }
  0x25   :  { %2515 = vmatprep.subr.bf16.mxu1 %v2883_v6 }
  0x28   :  { %2516 = vmatpush3.bf16.msra.mxu1 %v2775_v34 }
  0x29   :  { %2517 = vmatprep.subr.bf16.mxu1 %v2883_v6 }
  0x2c   :  { %2518 = vmatpush3.bf16.msra.mxu1 %v2776_v35 }
  0x2d   :  { %2519 = vmatprep.subr.bf16.mxu1 %v2883_v6 }
  0x30   :  { %2520 = vmatpush3.bf16.msra.mxu1 %v2778_v37 }
  0x31   :  { %2555 = vmatprep.subr.bf16.mxu1 %v2883_v6 }
  0x99   :  { %v124_v12 = vpop.xlane.xlu1 %123 }
  0x9a   :  { %v129_v13 = vmul.f32 0.03125, %v124_v12 }
  0x9c   :  { %v3068_v16 = vsub.f32 %v3044_v1, %v129_v13 }
  0x9d   :  { %v127_v19 = vpop.xlane.xlu1 %126 }
  0x9e   :  { %v166_v10 = vpop.xlane.xlu0 %165  ;;  %v130_v21 = vmul.f32 0.03125, %v127_v19  ;;  %v133_v22 = vmul.f32 %v3068_v16, %v3068_v16 }
  0x9f   :  { %v169_v11 = vmul.f32 0.027027028, %v166_v10 }
  0xa0   :  { %v3076_v24 = vsub.f32 %v3051_v3, %v130_v21  ;;  %v135_v26 = vsel %vm121_vm0, %v133_v22, 0.0 }
  0xa1   :  { %v3065_v14 = vsub.f32 %v92_v0, %v169_v11 }
  0xa2   :  { %v168_v15 = vpop.xlane.xlu0 %167  ;;  %v134_v28 = vmul.f32 %v3076_v24, %v3076_v24 }
  0xa3   :  { %v170_v17 = vmul.f32 0.027027028, %v168_v15  ;;  %v176_v18 = vsel %vm173_vm1, %v3065_v14, 0.0 }
  0xa4   :  { %v178_v20 = vmul.f32 %v176_v18, %v176_v18  ;;  %v138_v29 = vsel %vm121_vm0, %v134_v28, 0.0 }
  0xa5   :  { %v3073_v23 = vsub.f32 %v93_v4, %v170_v17 }
  0xa6   :  { %180 = vadd.xlane.f32.xlu0 %v178_v20 }
  0xa7   :  { %v177_v25 = vsel %vm173_vm1, %v3073_v23, 0.0 }
  0xa8   :  { %v179_v27 = vmul.f32 %v177_v25, %v177_v25 }
  0xaa   :  { %182 = vadd.xlane.f32.xlu1 %v179_v27  ;;  %136 = vadd.xlane.f32.xlu0 %v135_v26 }
  0xae   :  { %139 = vadd.xlane.f32.xlu1 %v138_v29 }
 0x133   :  { %v181_v39 = vpop.xlane.xlu0 %180 }
 0x134   :  { %v184_v40 = vmul.f32 0.027027028, %v181_v39 }
 0x136   :  { %v186_v41 = vadd.f32 1e-05, %v184_v40 }
 0x137   :  { %v137_v42 = vpop.xlane.xlu0 %136  ;;  %v183_v43 = vpop.xlane.xlu1 %182 }
 0x138   :  { %2815 = vrsqrt.f32 %v186_v41  ;;  %v141_v44 = vmul.f32 0.03125, %v137_v42  ;;  %v185_v45 = vmul.f32 0.027027028, %v183_v43 }
 0x13a   :  { %v143_v46 = vadd.f32 1e-05, %v141_v44  ;;  %v187_v47 = vadd.f32 1e-05, %v185_v45 }
 0x13b   :  { %v140_v48 = vpop.xlane.xlu1 %139 }
 0x13c   :  { %2817 = vrsqrt.f32 %v143_v46  ;;  %v142_v49 = vmul.f32 0.03125, %v140_v48 }
 0x13d   :  { %2819 = vrsqrt.f32 %v187_v47 }
 0x13e   :  { %v144_v50 = vadd.f32 1e-05, %v142_v49 }
 0x140   :  { %2821 = vrsqrt.f32 %v144_v50 }
 0x142   :  { %v2816_v51 = vpop.eup %2815 }
 0x143   :  { %v190_v52 = vmul.f32 %v2816_v51, %v3065_v14 }
 0x145   :  { %v198_v58 = vmul.f32 %v2336_v53, %v190_v52 }
 0x146   :  { %v2818_v54 = vpop.eup %2817 }
 0x147   :  { %v2820_v55 = vpop.eup %2819  ;;  %v147_v56 = vmul.f32 %v2818_v54, %v3068_v16  ;;  %v206_v2 = vadd.f32 %v2337_v60, %v198_v58 }
 0x148   :  { %v191_v57 = vmul.f32 %v2820_v55, %v3073_v23 }
 0x149   :  { %v155_v0 = vmul.f32 %v2334_v59, %v147_v56 }
 0x14a   :  { %v2822_v61 = vpop.eup %2821  ;;  %v199_v62 = vmul.f32 %v2336_v53, %v191_v57 }
 0x14b   :  { %v148_v63 = vmul.f32 %v2822_v61, %v3076_v24  ;;  %v163_v10 = vadd.f32 %v2335_v5, %v155_v0  ;;  %v2780_v61 = vld [vmem:[%s3647_s10] sm:$0xff]  }
 0x14c   :  { %v207_v4 = vadd.f32 %v2337_v60, %v199_v62 }
 0x14d   :  { %v156_v7 = vmul.f32 %v2334_v59, %v148_v63 }
 0x14e   :  { %v265_v9 = vpack.c.bf16 %v207_v4, %v206_v2 }
 0x14f   :  { %v164_v11 = vadd.f32 %v2335_v5, %v156_v7 }
 0x150   :  { %2522 = vmatmul.mubr.bf16.vlgmr.msra.gmra.mrb[0].mxu1 %v265_v9 }
 0x151   :  { %v208_v12 = vpack.c.bf16 %v164_v11, %v163_v10  ;;  %2571 = vmatprep.mubr.msk.bf16.mxu1 %vm2884_vm2, %v2883_v6  ;;  %v2353_v11 = vld [vmem:[%s3648_s6] ss:$0 sm:$0xff] }
 0x153   :  { %2502 = vmatmul.mubr.msk.bf16.vlgmr.msra.gmra.mrb[0].mxu0 %vm121_vm0, %v208_v12 }
 0x154   :  { %2527 = vmatprep.mubr.msk.bf16.mxu0 %vm2884_vm2, %v2883_v6 }
 0x223   :  { %v348_v13 = vpop.f32.mrb[0].mxu1 }
 0x224   :  { %v357_v14 = vpack.c.bf16 %v348_v13, %v348_v13  ;;  %v2523_v15 = vpop.f32.mrb[1].mxu1 }
 0x225   :  { %v351_v16 = vpop.f32.mrb[2].mxu1 }
 0x226   :  { %v364_v17 = vsel %vm359_vm3, %v357_v14, 0  ;;  %v2524_v18 = vpop.f32.mrb[3].mxu1  ;;  %v258_v19 = vpop.f32.mrb[0].mxu0  ;;  %v358_v23 = vpack.c.bf16 %v351_v16, %v351_v16 }
 0x227   :  { %2526 = vmatpush3.bf16.xpose.msra.mxu0 %v364_v17  ;;  %v2503_v20 = vpop.f32.mrb[1].mxu0  ;;  %v355_v24 = vpack.c.bf16 %v258_v19, %v258_v19 }
 0x228   :  { %v261_v21 = vpop.f32.mrb[2].mxu0  ;;  %2531 = vmatprep.subr.bf16.mxu0 %v2883_v6  ;;  %v410_v25 = vsel %vm359_vm3, %v358_v23, 0 }
 0x229   :  { %v2504_v22 = vpop.f32.mrb[3].mxu0  ;;  %v356_v26 = vpack.c.bf16 %v261_v21, %v261_v21 }
 0x22e   :  { %2528 = vmatmul.mubr.msk.bf16.vlgmr.msra.gmra.mrb[4].mxu0 %vm359_vm3, %v355_v24 }
 0x22f   :  { %2532 = vmatpush3.bf16.xpose.msra.mxu0 %v410_v25  ;;  %2533 = vmatprep.mubr.msk.bf16.mxu0 %vm2884_vm2, %v2883_v6 }
 0x230   :  { %2537 = vmatprep.subr.bf16.mxu0 %v2883_v6 }
 0x236   :  { %2534 = vmatmul.mubr.msk.bf16.vlgmr.msra.gmra.mrb[8].mxu0 %vm359_vm3, %v356_v26 }
 0x237   :  { %2539 = vmatprep.mubr.msk.bf16.mxu0 %vm2884_vm2, %v2883_v6 }
 0x301   :  { %v400_v27 = vpop.f32.mrb[4].mxu0 }
 0x302   :  { %v452_v28 = vmul.f32 0.25, %v400_v27  ;;  %v2529_v29 = vpop.f32.mrb[5].mxu0 }
 0x303   :  { %v403_v30 = vpop.f32.mrb[6].mxu0 }
 0x304   :  { %v2530_v31 = vpop.f32.mrb[7].mxu0  ;;  %v455_v32 = vsel %vm454_vm4, %v452_v28, -inf  ;;  %v2783_v30 = vld [vmem:[%s3649_s14 + $0x4] ss:$8 sps:$4 sm:$0xff]  }
 0x305   :  { %456 = vmax.xlane.f32.xlu0 %v455_v32  ;;  %v2781_v31 = vld [vmem:[%s3649_s14] ss:$8 sps:$4 sm:$0xff]   ;;  %v2784_v32 = vld [vmem:[%s3649_s14 + $0x10] ss:$8 sps:$4 sm:$0xff]  }
 0x309   :  { %v446_v33 = vpop.f32.mrb[8].mxu0 }
 0x30a   :  { %v453_v34 = vmul.f32 0.25, %v446_v33  ;;  %v2535_v35 = vpop.f32.mrb[9].mxu0  ;;  %v2786_v33 = vld [vmem:[%s3649_s14 + $0x14] ss:$8 sps:$4 sm:$0xff]  }
 0x30b   :  { %v449_v36 = vpop.f32.mrb[10].mxu0  ;;  %v2787_v35 = vld [vmem:[%s3650_s30] sm:$0xff]  }
 0x30c   :  { %v2536_v37 = vpop.f32.mrb[11].mxu0  ;;  %v458_v38 = vsel %vm454_vm4, %v453_v34, -inf  ;;  %2556 = vmatpush3.bf16.msra.mxu1 %v2787_v35 }
 0x30d   :  { %459 = vmax.xlane.f32.xlu1 %v458_v38  ;;  %2557 = vmatprep.subr.bf16.mxu1 %v2883_v6 }
 0x392   :  { %v457_v39 = vpop.xlane.xlu0 %456 }
 0x393   :  { %v461_v40 = vsub.f32 %v452_v28, %v457_v39 }
 0x395   :  { %v463_v41 = vmul.f32 1.442695, %v461_v40 }
 0x397   :  { %2823 = vpow2.f32 %v463_v41 }
 0x39a   :  { %v460_v42 = vpop.xlane.xlu1 %459 }
 0x39b   :  { %v462_v43 = vsub.f32 %v453_v34, %v460_v42  ;;  %v2886_v34 = vmov 0  }
 0x39d   :  { %v465_v44 = vmul.f32 1.442695, %v462_v43  ;;  %v2356_v43 = vld [vmem:[%s3651_s12] ss:$0 sm:$0xff]  ;;  %s2890_s12 = smov 8  }
 0x39f   :  { %2825 = vpow2.f32 %v465_v44 }
 0x3a1   :  { %v2824_v45 = vpop.eup %2823 }
 0x3a2   :  { %v467_v46 = vsel %vm454_vm4, %v2824_v45, 0.0 }
 0x3a3   :  { %468 = vadd.xlane.f32.xlu0 %v467_v46 }
 0x3a9   :  { %v2826_v47 = vpop.eup %2825 }
 0x3aa   :  { %v470_v48 = vsel %vm454_vm4, %v2826_v47, 0.0 }
 0x3ab   :  { %471 = vadd.xlane.f32.xlu1 %v470_v48  ;;  %v2357_v48 = vld [vmem:[%s3604_s11] ss:$0 sm:$0xff] }
 0x3b9   :  { %480 = vrot.lane.b32.xlu0 %v357_v14, %s2885_s8 }
 0x3bc   :  { %530 = vrot.lane.b32.xlu1 %v358_v23, %s2885_s8 }
 0x430   :  { %v469_v49 = vpop.xlane.xlu0 %468 }
 0x431   :  { %2827 = vrcp.f32 %v469_v49 }
 0x434   :  { %v481_v50 = vpop.permute.xlu0 %480 }
 0x435   :  { %v487_v51 = vsel %vm485_vm5, %v481_v50, 0 }
 0x436   :  { %2538 = vmatpush3.bf16.msra.mxu0 %v487_v51 }
 0x437   :  { %2543 = vmatprep.subr.bf16.mxu0 %v2883_v6 }
 0x438   :  { %v472_v52 = vpop.xlane.xlu1 %471 }
 0x439   :  { %2829 = vrcp.f32 %v472_v52 }
 0x43b   :  { %v2828_v53 = vpop.eup %2827 }
 0x43c   :  { %v475_v54 = vmul.f32 %v2828_v53, %v2824_v45  ;;  %v531_v55 = vpop.permute.xlu1 %530  ;;  %v2788_v53 = vld [vmem:[%s3650_s30 + $0x8] sm:$0xff]  }
 0x43d   :  { %v536_v57 = vsel %vm485_vm5, %v531_v55, 0  ;;  %2558 = vmatpush3.bf16.msra.mxu1 %v2788_v53  ;;  %v2790_v55 = vld [vmem:[%s3650_s30 + $0x18] sm:$0xff]  }
 0x43e   :  { %v477_v56 = vpack.c.bf16 %v475_v54, %v475_v54  ;;  %2559 = vmatprep.subr.bf16.mxu1 %v2883_v6  ;;  %v2789_v54 = vld [vmem:[%s3650_s30 + $0x10] sm:$0xff]  }
 0x440   :  { %2540 = vmatmul.mubr.msk.bf16.vlgmr.msra.gmra.mrb[12].mxu0 %vm454_vm4, %v477_v56  ;;  %v2791_v56 = vld [vmem:[%s3650_s30 + $0x20] sm:$0xff]  }
 0x441   :  { %2544 = vmatpush3.bf16.msra.mxu0 %v536_v57  ;;  %2545 = vmatprep.mubr.msk.bf16.mxu0 %vm2884_vm2, %v2883_v6  ;;  %v2792_v57 = vld [vmem:[%s3650_s30 + $0x28] sm:$0xff]  }
 0x442   :  { %2549 = vmatprep.subr.bf16.mxu0 %v2883_v6  ;;  %2560 = vmatpush3.bf16.msra.mxu1 %v2789_v54 }
 0x443   :  { %v2830_v58 = vpop.eup %2829  ;;  %2561 = vmatprep.subr.bf16.mxu1 %v2883_v6 }
 0x444   :  { %v476_v59 = vmul.f32 %v2830_v58, %v2826_v47  ;;  %v2793_v58 = vld [vmem:[%s3650_s30 + $0x30] sm:$0xff]  }
 0x446   :  { %v478_v60 = vpack.c.bf16 %v476_v59, %v476_v59  ;;  %2562 = vmatpush3.bf16.msra.mxu1 %v2790_v55  ;;  %v2794_v59 = vld [vmem:[%s3650_s30 + $0x38] sm:$0xff]   ;;  %v2372_v55 = vld [vmem:[%s3609_s16] ss:$0 sm:$0xff]  ;;  %s2892_s30 = smov 24  }
 0x447   :  { %2563 = vmatprep.subr.bf16.mxu1 %v2883_v6 }
 0x448   :  { %2546 = vmatmul.mubr.msk.bf16.vlgmr.msra.gmra.mrb[16].mxu0 %vm454_vm4, %v478_v60  ;;  %v3247_v60 = vshrl.u32 %v171_v8, 7 }
 0x449   :  { %2551 = vmatprep.mubr.msk.bf16.mxu0 %vm2884_vm2, %v2883_v6  ;;  %2550 = vmatpush3.bf16.msra.mxu0 %v2780_v61 }
 0x44a   :  { %738 = vmatprep.subr.bf16.mxu0 %v2783_v30  ;;  %2564 = vmatpush3.bf16.msra.mxu1 %v2791_v56  ;;  %v711_v61 = vsub.s32 1, %v3247_v60  ;;  %v707_v8 = vsub.s32 0, %v3247_v60 }
 0x44b   :  { %2565 = vmatprep.subr.bf16.mxu1 %v2883_v6 }
 0x44e   :  { %2566 = vmatpush3.bf16.msra.mxu1 %v2792_v57 }
 0x44f   :  { %2567 = vmatprep.subr.bf16.mxu1 %v2883_v6 }
 0x452   :  { %2568 = vmatpush3.bf16.msra.mxu1 %v2793_v58 }
 0x453   :  { %2569 = vmatprep.subr.bf16.mxu1 %v2883_v6 }
 0x456   :  { %2570 = vmatpush3.bf16.msra.mxu1 %v2794_v59 }
 0x457   :  { %2603 = vmatprep.subr.bf16.mxu1 %v2883_v6 }
 0x513   :  { %v523_v62 = vpop.f32.mrb[12].mxu0 }
 0x514   :  { %v2541_v63 = vpop.f32.mrb[13].mxu0 }
 0x515   :  { %v526_v0 = vpop.f32.mrb[14].mxu0 }
 0x516   :  { %v2542_v2 = vpop.f32.mrb[15].mxu0 }
 0x51b   :  { %v572_v4 = vpop.f32.mrb[16].mxu0 }
 0x51c   :  { %v578_v5 = vpack.c.bf16 %v572_v4, %v523_v62  ;;  %v2547_v7 = vpop.f32.mrb[17].mxu0  ;;  %v643_v62 = vld [vmem:[%s3605_s13] sm:$0x3] }
 0x51d   :  { %v575_v9 = vpop.f32.mrb[18].mxu0  ;;  %v712_v63 = vrot.slane %v643_v62, %v711_v61 }
 0x51e   :  { %v2548_v10 = vpop.f32.mrb[19].mxu0  ;;  %2552 = vmatmul.mubr.msk.bf16.vlgmr.msra.gmra.mrb[20].mxu0 %vm359_vm3, %v578_v5 }
 0x51f   :  { %739 = vmatpush1.bf16.msra.mxu0 %v2781_v31  ;;  %770 = vmatprep.mubr.bf16.mxu0 %v2886_v34 }
 0x520   :  { %740 = vmatprep.subr.bf16.mxu0 %v2786_v33 }
 0x523   :  { %741 = vmatpush1.bf16.msra.mxu0 %v2784_v32 }
 0x524   :  { %2575 = vmatprep.subr.bf16.mxu0 %v2883_v6 }
 0x5f1   :  { %v628_v12 = vpop.f32.mrb[20].mxu0 }
 0x5f2   :  { %v629_v13 = vadd.f32 %v2353_v11, %v628_v12  ;;  %v2553_v14 = vpop.f32.mrb[21].mxu0  ;;  %v708_v12 = vrot.slane %v643_v62, %v707_v8  ;;  %v2373_v62 = vld [vmem:[%s3610_s17] ss:$0 sm:$0xff]  ;;  %s2887_s17 = smov 120  }
 0x5f3   :  { %v631_v15 = vpop.f32.mrb[22].mxu0 }
 0x5f4   :  { %v3178_v16 = vadd.f32 %v629_v13, %v3044_v1  ;;  %v632_v17 = vadd.f32 %v2353_v11, %v631_v15  ;;  %v2554_v18 = vpop.f32.mrb[23].mxu0 }
 0x5f6   :  { %v3181_v19 = vadd.f32 %v632_v17, %v3051_v3  ;;  %v661_v20 = vsel %vm121_vm0, %v3178_v16, 0.0 }
 0x5f7   :  { %662 = vadd.xlane.f32.xlu1 %v661_v20 }
 0x5f8   :  { %v664_v21 = vsel %vm121_vm0, %v3181_v19, 0.0 }
 0x5f9   :  { %665 = vadd.xlane.f32.xlu0 %v664_v21 }
 0x684   :  { %v663_v22 = vpop.xlane.xlu1 %662 }
 0x685   :  { %v667_v23 = vmul.f32 0.03125, %v663_v22 }
 0x686   :  { %v666_v24 = vpop.xlane.xlu0 %665 }
 0x687   :  { %v669_v25 = vsub.f32 %v3178_v16, %v667_v23  ;;  %v668_v1 = vmul.f32 0.03125, %v666_v24 }
 0x689   :  { %v670_v26 = vsub.f32 %v3181_v19, %v668_v1  ;;  %v671_v27 = vmul.f32 %v669_v25, %v669_v25 }
 0x68b   :  { %v673_v3 = vsel %vm121_vm0, %v671_v27, 0.0  ;;  %v672_v28 = vmul.f32 %v670_v26, %v670_v26  ;;  %v2363_v27 = vld [vmem:[%s3606_s15] ss:$0 sm:$0xff] }
 0x68c   :  { %674 = vadd.xlane.f32.xlu0 %v673_v3 }
 0x68d   :  { %v676_v29 = vsel %vm121_vm0, %v672_v28, 0.0 }
 0x68e   :  { %677 = vadd.xlane.f32.xlu1 %v676_v29 }
 0x719   :  { %v675_v36 = vpop.xlane.xlu0 %674 }
 0x71a   :  { %v679_v37 = vmul.f32 0.03125, %v675_v36 }
 0x71b   :  { %v678_v38 = vpop.xlane.xlu1 %677 }
 0x71c   :  { %v681_v39 = vadd.f32 1e-05, %v679_v37  ;;  %v680_v40 = vmul.f32 0.03125, %v678_v38 }
 0x71e   :  { %2831 = vrsqrt.f32 %v681_v39  ;;  %v682_v41 = vadd.f32 1e-05, %v680_v40 }
 0x720   :  { %2833 = vrsqrt.f32 %v682_v41 }
 0x728   :  { %v2832_v42 = vpop.eup %2831 }
 0x729   :  { %v685_v44 = vmul.f32 %v2832_v42, %v669_v25 }
 0x72a   :  { %v2834_v45 = vpop.eup %2833 }
 0x72b   :  { %v693_v46 = vmul.f32 %v2356_v43, %v685_v44  ;;  %v686_v47 = vmul.f32 %v2834_v45, %v670_v26 }
 0x72d   :  { %v694_v49 = vmul.f32 %v2356_v43, %v686_v47  ;;  %v701_v50 = vadd.f32 %v2357_v48, %v693_v46  ;;  %v2795_v46 = vld [vmem:[%s3607_s18] sm:$0xff]   ;;  %v2796_v47 = vld [vmem:[%s3607_s18 + $0x8] sm:$0xff]  }
 0x72f   :  { %v702_v51 = vadd.f32 %v2357_v48, %v694_v49 }
 0x731   :  { %v703_v52 = vpack.c.bf16 %v702_v51, %v701_v50 }
 0x733   :  { %2362 = vmatmul.mubr.msk.bf16.vlgmr.msra.gmra.mrb[24].mxu0 %vm121_vm0, %v703_v52 }
 0x734   :  { %2579 = vmatprep.mubr.msk.bf16.mxu0 %vm2884_vm2, %v2883_v6  ;;  %2576 = vmatpush3.bf16.msra.mxu0 %v2795_v46 }
 0x735   :  { %2577 = vmatprep.subr.bf16.mxu0 %v2883_v6 }
 0x738   :  { %2578 = vmatpush3.bf16.msra.mxu0 %v2796_v47 }
 0x739   :  { %2583 = vmatprep.subr.bf16.mxu0 %v2883_v6 }
 0x806   :  { %v772_v0 = vpop.f32.mrb[24].mxu0 }
 0x807   :  { %v774_v2 = vpop.f32.mrb[25].mxu0  ;;  %v773_v18 = vadd.f32 %v772_v0, %v708_v12 }
 0x808   :  { %v775_v4 = vadd.f32 %v774_v2, %v712_v63  ;;  %v776_v5 = vpop.f32.mrb[26].mxu0 }
 0x809   :  { %v778_v7 = vpop.f32.mrb[27].mxu0  ;;  %v777_v24 = vadd.f32 %v776_v5, %v708_v12 }
 0x80a   :  { %v783_v9 = vmul.f32 0.70710677, %v775_v4  ;;  %v779_v10 = vadd.f32 %v778_v7, %v712_v63  ;;  %v781_v14 = vmul.f32 0.5, %v775_v4  ;;  %v2797_v4 = vld [vmem:[%s3608_s19] sm:$0xff]   ;;  %v2798_v7 = vld [vmem:[%s3608_s19 + $0x8] sm:$0xff]   ;;  %s2888_s19 = smov 104  }
 0x80c   :  { %2835 = verf.f32 %v783_v9  ;;  %v784_v11 = vmul.f32 0.70710677, %v779_v10  ;;  %v782_v21 = vmul.f32 0.5, %v779_v10 }
 0x80e   :  { %2837 = verf.f32 %v784_v11 }
 0x816   :  { %v2836_v13 = vpop.eup %2835 }
 0x817   :  { %v787_v15 = vadd.f32 1.0, %v2836_v13 }
 0x818   :  { %v2838_v17 = vpop.eup %2837 }
 0x819   :  { %v789_v20 = vmul.f32 %v787_v15, %v781_v14  ;;  %v788_v22 = vadd.f32 1.0, %v2838_v17 }
 0x81b   :  { %v791_v23 = vmul.f32 %v789_v20, %v773_v18  ;;  %v790_v25 = vmul.f32 %v788_v22, %v782_v21 }
 0x81d   :  { %v792_v1 = vmul.f32 %v790_v25, %v777_v24 }
 0x81f   :  { %v793_v26 = vpack.c.bf16 %v792_v1, %v791_v23 }
 0x821   :  { %2572 = vmatmul.mubr.bf16.vlgmr.msra.gmra.mrb[4].mxu1 %v793_v26 }
 0x822   :  { %2605 = vmatprep.mubr.msk.bf16.mxu1 %vm2884_vm2, %v2883_v6 }
 0x8f4   :  { %v882_v3 = vpop.f32.mrb[4].mxu1 }
 0x8f5   :  { %v883_v28 = vadd.f32 %v2363_v27, %v882_v3  ;;  %v2573_v29 = vpop.f32.mrb[5].mxu1 }
 0x8f6   :  { %v885_v30 = vpop.f32.mrb[6].mxu1 }
 0x8f7   :  { %v3264_v31 = vadd.f32 %v883_v28, %v3178_v16  ;;  %v886_v32 = vadd.f32 %v2363_v27, %v885_v30  ;;  %v2574_v33 = vpop.f32.mrb[7].mxu1 }
 0x8f9   :  { %v3267_v35 = vadd.f32 %v886_v32, %v3181_v19  ;;  %v906_v36 = vsel %vm121_vm0, %v3264_v31, 0.0 }
 0x8fa   :  { %907 = vadd.xlane.f32.xlu0 %v906_v36 }
 0x8fb   :  { %v909_v37 = vsel %vm121_vm0, %v3267_v35, 0.0 }
 0x8fc   :  { %910 = vadd.xlane.f32.xlu1 %v909_v37 }
 0x987   :  { %v908_v38 = vpop.xlane.xlu0 %907 }
 0x988   :  { %v912_v39 = vmul.f32 0.03125, %v908_v38 }
 0x989   :  { %v911_v40 = vpop.xlane.xlu1 %910 }
 0x98a   :  { %v914_v41 = vsub.f32 %v3264_v31, %v912_v39  ;;  %v913_v16 = vmul.f32 0.03125, %v911_v40 }
 0x98c   :  { %v915_v42 = vsub.f32 %v3267_v35, %v913_v16  ;;  %v916_v43 = vmul.f32 %v914_v41, %v914_v41 }
 0x98e   :  { %v918_v19 = vsel %vm121_vm0, %v916_v43, 0.0  ;;  %v917_v44 = vmul.f32 %v915_v42, %v915_v42 }
 0x98f   :  { %919 = vadd.xlane.f32.xlu0 %v918_v19 }
 0x990   :  { %v921_v45 = vsel %vm121_vm0, %v917_v44, 0.0 }
 0x991   :  { %922 = vadd.xlane.f32.xlu1 %v921_v45 }
 0xa1c   :  { %v920_v48 = vpop.xlane.xlu0 %919 }
 0xa1d   :  { %v924_v49 = vmul.f32 0.03125, %v920_v48 }
 0xa1e   :  { %v923_v50 = vpop.xlane.xlu1 %922 }
 0xa1f   :  { %v926_v51 = vadd.f32 1e-05, %v924_v49  ;;  %v925_v52 = vmul.f32 0.03125, %v923_v50 }
 0xa21   :  { %2839 = vrsqrt.f32 %v926_v51  ;;  %v927_v53 = vadd.f32 1e-05, %v925_v52 }
 0xa23   :  { %2841 = vrsqrt.f32 %v927_v53 }
 0xa2b   :  { %v2840_v54 = vpop.eup %2839 }
 0xa2c   :  { %v930_v56 = vmul.f32 %v2840_v54, %v914_v41 }
 0xa2d   :  { %v2842_v57 = vpop.eup %2841 }
 0xa2e   :  { %v938_v58 = vmul.f32 %v2372_v55, %v930_v56  ;;  %v931_v59 = vmul.f32 %v2842_v57, %v915_v42 }
 0xa30   :  { %v939_v63 = vmul.f32 %v2372_v55, %v931_v59  ;;  %v946_v0 = vadd.f32 %v2373_v62, %v938_v58 }
 0xa32   :  { %v947_v2 = vadd.f32 %v2373_v62, %v939_v63 }
 0xa34   :  { %v948_v5 = vpack.c.bf16 %v947_v2, %v946_v0 }
 0xa36   :  { %2580 = vmatmul.mubr.msk.bf16.vlgmr.msra.gmra.mrb[28].mxu0 %vm121_vm0, %v948_v5 }
 0xa37   :  { %2584 = vmatpush3.bf16.msra.mxu0 %v2797_v4  ;;  %2587 = vmatprep.mubr.msk.bf16.mxu0 %vm2884_vm2, %v2883_v6 }
 0xa38   :  { %2585 = vmatprep.subr.bf16.mxu0 %v2883_v6 }
 0xa3b   :  { %2586 = vmatpush3.bf16.msra.mxu0 %v2798_v7 }
 0xa3c   :  { %2591 = vmatprep.subr.bf16.mxu0 %v2883_v6 }
 0xa3e   :  { %2588 = vmatmul.mubr.msk.bf16.vlgmr.msra.gmra.mrb[32].mxu0 %vm121_vm0, %v948_v5 }
 0xa3f   :  { %2593 = vmatprep.mubr.msk.bf16.mxu0 %vm2884_vm2, %v2883_v6 }
 0xb09   :  { %v998_v9 = vpop.f32.mrb[28].mxu0 }
 0xb0a   :  { %v2581_v10 = vpop.f32.mrb[29].mxu0  ;;  %v1098_v24 = vpack.c.bf16 %v998_v9, %v998_v9 }
 0xb0b   :  { %v1001_v11 = vpop.f32.mrb[30].mxu0 }
 0xb0c   :  { %v2582_v12 = vpop.f32.mrb[31].mxu0  ;;  %v2730_v13 = vpack.i.bf16 %v1001_v11, %v998_v9  ;;  %v1099_v1 = vpack.c.bf16 %v1001_v11, %v1001_v11 }
 0xb0e   :  { %2731 = vrot.lane.b32.xlu1 %v2730_v13, %s2887_s17 }
 0xb11   :  { %v1051_v14 = vpop.f32.mrb[32].mxu0 }
 0xb12   :  { %v2589_v15 = vpop.f32.mrb[33].mxu0  ;;  %v3305_v17 = vpack.c.bf16 %v1051_v14, %v1051_v14 }
 0xb13   :  { %v1054_v18 = vpop.f32.mrb[34].mxu0 }
 0xb14   :  { %v2590_v20 = vpop.f32.mrb[35].mxu0  ;;  %v1118_v21 = vsel %vm454_vm4, %v3305_v17, 0  ;;  %v2735_v22 = vpack.i.bf16 %v1054_v18, %v1051_v14  ;;  %v3311_v23 = vpack.c.bf16 %v1054_v18, %v1054_v18 }
 0xb15   :  { %2592 = vmatpush3.bf16.xpose.msra.mxu0 %v1118_v21 }
 0xb16   :  { %2736 = vrot.lane.b32.xlu1 %v2735_v22, %s2885_s8  ;;  %2726 = vrot.lane.b32.xlu0 %v2735_v22, %s2887_s17  ;;  %v1164_v25 = vsel %vm454_vm4, %v3311_v23, 0 }
 0xb17   :  { %2597 = vmatprep.subr.bf16.mxu0 %v2883_v6 }
 0xb1a   :  { %2741 = vrot.lane.b32.xlu1 %v2730_v13, %s2885_s8  ;;  %2746 = vrot.lane.b32.xlu0 %v2735_v22, %s2888_s19  ;;  %s2889_s8 = smov 96  }
 0xb1c   :  { %2594 = vmatmul.mubr.msk.bf16.vlgmr.msra.gmra.mrb[36].mxu0 %vm454_vm4, %v1098_v24 }
 0xb1d   :  { %2598 = vmatpush3.bf16.xpose.msra.mxu0 %v1164_v25  ;;  %2599 = vmatprep.mubr.msk.bf16.mxu0 %vm2884_vm2, %v2883_v6 }
 0xb1e   :  { %2751 = vrot.lane.b32.xlu1 %v2730_v13, %s2888_s19  ;;  %2609 = vmatprep.subr.bf16.mxu0 %v2883_v6 }
 0xb24   :  { %2600 = vmatmul.mubr.msk.bf16.vlgmr.msra.gmra.mrb[40].mxu0 %vm454_vm4, %v1099_v1 }
 0xb25   :  { %2611 = vmatprep.mubr.msk.bf16.mxu0 %vm2884_vm2, %v2883_v6 }
 0xb80   :  { %v2732_v26 = vpop.permute.xlu1 %2731 }
 0xb81   :  { %v2733_v39 = vunpack.i.l.bf16 %v2732_v26  ;;  %v2734_v40 = vunpack.i.h.bf16 %v2732_v26 }
 0xb83   :  { %v1100_v43 = vpack.c.bf16 %v2733_v39, %v2733_v39  ;;  %v1101_v19 = vpack.c.bf16 %v2734_v40, %v2734_v40 }
 0xb88   :  { %v2727_v27 = vpop.permute.xlu0 %2726  ;;  %v2737_v29 = vpop.permute.xlu1 %2736 }
 0xb89   :  { %v2729_v3 = vunpack.i.h.bf16 %v2727_v27  ;;  %v2728_v28 = vunpack.i.l.bf16 %v2727_v27  ;;  %v2738_v33 = vunpack.i.l.bf16 %v2737_v29  ;;  %v2739_v38 = vunpack.i.h.bf16 %v2737_v29 }
 0xb8b   :  { %v3323_v30 = vpack.c.bf16 %v2729_v3, %v2729_v3  ;;  %v3325_v32 = vpack.c.bf16 %v2728_v28, %v2728_v28  ;;  %v3333_v41 = vpack.c.bf16 %v2738_v33, %v2738_v33  ;;  %v3335_v16 = vpack.c.bf16 %v2739_v38, %v2739_v38 }
 0xb8c   :  { %v2747_v42 = vpop.permute.xlu0 %2746  ;;  %v2742_v44 = vpop.permute.xlu1 %2741 }
 0xb8d   :  { %v1210_v36 = vsel %vm454_vm4, %v3325_v32, 0  ;;  %v1256_v37 = vsel %vm454_vm4, %v3323_v30, 0  ;;  %v2748_v45 = vunpack.i.l.bf16 %v2747_v42  ;;  %v1302_v46 = vsel %vm454_vm4, %v3333_v41, 0 }
 0xb8e   :  { %2604 = vmatpush3.bf16.xpose.msra.mxu1 %v1210_v36  ;;  %2610 = vmatpush3.bf16.xpose.msra.mxu0 %v1256_v37  ;;  %v2749_v47 = vunpack.i.h.bf16 %v2747_v42  ;;  %v1348_v48 = vsel %vm454_vm4, %v3335_v16, 0  ;;  %v2743_v49 = vunpack.i.l.bf16 %v2742_v44  ;;  %v2744_v50 = vunpack.i.h.bf16 %v2742_v44 }
 0xb8f   :  { %2615 = vmatprep.subr.bf16.mxu1 %v2883_v6  ;;  %2621 = vmatprep.subr.bf16.mxu0 %v2883_v6  ;;  %v3348_v51 = vpack.c.bf16 %v2748_v45, %v2748_v45 }
 0xb90   :  { %v3351_v52 = vpack.c.bf16 %v2749_v47, %v2749_v47  ;;  %v1102_v53 = vpack.c.bf16 %v2743_v49, %v2743_v49  ;;  %v1103_v54 = vpack.c.bf16 %v2744_v50, %v2744_v50  ;;  %v2752_v55 = vpop.permute.xlu1 %2751 }
 0xb91   :  { %v1394_v56 = vsel %vm454_vm4, %v3348_v51, 0  ;;  %v2753_v58 = vunpack.i.l.bf16 %v2752_v55  ;;  %v2754_v59 = vunpack.i.h.bf16 %v2752_v55 }
 0xb92   :  { %v1440_v57 = vsel %vm454_vm4, %v3351_v52, 0 }
 0xb93   :  { %v1104_v62 = vpack.c.bf16 %v2753_v58, %v2753_v58  ;;  %v1105_v63 = vpack.c.bf16 %v2754_v59, %v2754_v59 }
 0xb95   :  { %2606 = vmatmul.mubr.msk.bf16.vlgmr.msra.gmra.mrb[8].mxu1 %vm454_vm4, %v1100_v43  ;;  %2612 = vmatmul.mubr.msk.bf16.vlgmr.msra.gmra.mrb[44].mxu0 %vm454_vm4, %v1101_v19 }
 0xb96   :  { %2616 = vmatpush3.bf16.xpose.msra.mxu1 %v1302_v46  ;;  %2622 = vmatpush3.bf16.xpose.msra.mxu0 %v1348_v48 }
 0xb97   :  { %2617 = vmatprep.mubr.msk.bf16.mxu1 %vm2884_vm2, %v2883_v6  ;;  %2623 = vmatprep.mubr.msk.bf16.mxu0 %vm2884_vm2, %v2883_v6 }
 0xb98   :  { %2627 = vmatprep.subr.bf16.mxu1 %v2883_v6  ;;  %2633 = vmatprep.subr.bf16.mxu0 %v2883_v6 }
 0xb9d   :  { %2618 = vmatmul.mubr.msk.bf16.vlgmr.msra.gmra.mrb[12].mxu1 %vm454_vm4, %v1102_v53  ;;  %2624 = vmatmul.mubr.msk.bf16.vlgmr.msra.gmra.mrb[48].mxu0 %vm454_vm4, %v1103_v54 }
 0xb9e   :  { %2628 = vmatpush3.bf16.xpose.msra.mxu1 %v1394_v56  ;;  %2634 = vmatpush3.bf16.xpose.msra.mxu0 %v1440_v57 }
 0xb9f   :  { %2629 = vmatprep.mubr.msk.bf16.mxu1 %vm2884_vm2, %v2883_v6  ;;  %2635 = vmatprep.mubr.msk.bf16.mxu0 %vm2884_vm2, %v2883_v6 }
 0xba0   :  { %2645 = vmatprep.subr.bf16.mxu0 %v2883_v6  ;;  %2639 = vmatprep.subr.bf16.mxu1 %v2883_v6 }
 0xba5   :  { %2630 = vmatmul.mubr.msk.bf16.vlgmr.msra.gmra.mrb[16].mxu1 %vm454_vm4, %v1104_v62  ;;  %2636 = vmatmul.mubr.msk.bf16.vlgmr.msra.gmra.mrb[52].mxu0 %vm454_vm4, %v1105_v63 }
 0xba6   :  { %2641 = vmatprep.mubr.msk.bf16.mxu1 %vm2884_vm2, %v2883_v6  ;;  %2647 = vmatprep.mubr.msk.bf16.mxu0 %vm2884_vm2, %v2883_v6 }
 0xbef   :  { %v1154_v0 = vpop.f32.mrb[36].mxu0 }
 0xbf0   :  { %v1482_v2 = vmul.f32 0.35355338, %v1154_v0  ;;  %v2595_v4 = vpop.f32.mrb[37].mxu0 }
 0xbf1   :  { %v1157_v5 = vpop.f32.mrb[38].mxu0 }
 0xbf2   :  { %v2596_v7 = vpop.f32.mrb[39].mxu0  ;;  %v1490_v9 = vsel %vm454_vm4, %v1482_v2, -inf }
 0xbf3   :  { %1491 = vmax.xlane.f32.xlu0 %v1490_v9 }
 0xbf7   :  { %v1200_v10 = vpop.f32.mrb[40].mxu0 }
 0xbf8   :  { %v1483_v11 = vmul.f32 0.35355338, %v1200_v10  ;;  %v2601_v12 = vpop.f32.mrb[41].mxu0 }
 0xbf9   :  { %v1203_v13 = vpop.f32.mrb[42].mxu0 }
 0xbfa   :  { %v2602_v14 = vpop.f32.mrb[43].mxu0  ;;  %v1493_v15 = vsel %vm454_vm4, %v1483_v11, -inf }
 0xbfb   :  { %1494 = vmax.xlane.f32.xlu1 %v1493_v15 }
 0xc68   :  { %v1246_v18 = vpop.f32.mrb[8].mxu1  ;;  %v1292_v21 = vpop.f32.mrb[44].mxu0 }
 0xc69   :  { %v3373_v20 = vmul.f32 0.35355338, %v1246_v18  ;;  %v2607_v22 = vpop.f32.mrb[9].mxu1  ;;  %v2613_v24 = vpop.f32.mrb[45].mxu0  ;;  %v3375_v1 = vmul.f32 0.35355338, %v1292_v21 }
 0xc6a   :  { %v1249_v25 = vpop.f32.mrb[10].mxu1  ;;  %v1295_v26 = vpop.f32.mrb[46].mxu0 }
 0xc6b   :  { %v2608_v27 = vpop.f32.mrb[11].mxu1  ;;  %v1496_v3 = vsel %vm454_vm4, %v3373_v20, -inf  ;;  %v2614_v28 = vpop.f32.mrb[47].mxu0  ;;  %v1499_v29 = vsel %vm454_vm4, %v3375_v1, -inf }
 0xc6c   :  { %1497 = vmax.xlane.f32.xlu0 %v1496_v3 }
 0xc70   :  { %1500 = vmax.xlane.f32.xlu0 %v1499_v29  ;;  %v1338_v33 = vpop.f32.mrb[12].mxu1  ;;  %v1384_v36 = vpop.f32.mrb[48].mxu0 }
 0xc71   :  { %v3381_v37 = vmul.f32 0.35355338, %v1338_v33  ;;  %v2619_v38 = vpop.f32.mrb[13].mxu1  ;;  %v1487_v39 = vmul.f32 0.35355338, %v1384_v36  ;;  %v2625_v40 = vpop.f32.mrb[49].mxu0 }
 0xc72   :  { %v1341_v42 = vpop.f32.mrb[14].mxu1  ;;  %v1387_v43 = vpop.f32.mrb[50].mxu0 }
 0xc73   :  { %v2620_v19 = vpop.f32.mrb[15].mxu1  ;;  %v1502_v44 = vsel %vm454_vm4, %v3381_v37, -inf  ;;  %v2626_v45 = vpop.f32.mrb[51].mxu0  ;;  %v1505_v46 = vsel %vm454_vm4, %v1487_v39, -inf }
 0xc74   :  { %1503 = vmax.xlane.f32.xlu0 %v1502_v44  ;;  %1506 = vmax.xlane.f32.xlu1 %v1505_v46 }
 0xc78   :  { %v1430_v47 = vpop.f32.mrb[16].mxu1  ;;  %v1476_v49 = vpop.f32.mrb[52].mxu0 }
 0xc79   :  { %v3386_v48 = vmul.f32 0.35355338, %v1430_v47  ;;  %v2631_v50 = vpop.f32.mrb[17].mxu1  ;;  %v2637_v53 = vpop.f32.mrb[53].mxu0  ;;  %v1489_v0 = vmul.f32 0.35355338, %v1476_v49 }
 0xc7a   :  { %v1433_v54 = vpop.f32.mrb[18].mxu1  ;;  %v1479_v55 = vpop.f32.mrb[54].mxu0 }
 0xc7b   :  { %v2632_v56 = vpop.f32.mrb[19].mxu1  ;;  %v1508_v57 = vsel %vm454_vm4, %v3386_v48, -inf  ;;  %v2638_v58 = vpop.f32.mrb[55].mxu0  ;;  %v1511_v5 = vsel %vm454_vm4, %v1489_v0, -inf }
 0xc7c   :  { %1509 = vmax.xlane.f32.xlu0 %v1508_v57 }
 0xc80   :  { %v1492_v59 = vpop.xlane.xlu0 %1491 }
 0xc81   :  { %v1514_v62 = vsub.f32 %v1482_v2, %v1492_v59 }
 0xc83   :  { %v1522_v63 = vmul.f32 1.442695, %v1514_v62 }
 0xc85   :  { %1636 = vrot.lane.b32.xlu1 %v3311_v23, %s2889_s8  ;;  %2843 = vpow2.f32 %v1522_v63 }
 0xc88   :  { %v1495_v23 = vpop.xlane.xlu1 %1494 }
 0xc89   :  { %1685 = vrot.lane.b32.xlu1 %v3325_v32, %s2889_s8  ;;  %v1515_v32 = vsub.f32 %v1483_v11, %v1495_v23 }
 0xc8f   :  { %v3396_v4 = vpop.eup %2843 }
 0xc90   :  { %v1538_v7 = vsel %vm454_vm4, %v3396_v4, 0.0 }
 0xc92   :  { %1587 = vrot.lane.b32.xlu0 %v3305_v17, %s2889_s8  ;;  %v1524_v17 = vmul.f32 1.442695, %v1515_v32 }
 0xc94   :  { %2845 = vpow2.f32 %v1524_v17 }
 0xc9e   :  { %v3403_v2 = vpop.eup %2845 }
 0xc9f   :  { %v1541_v9 = vsel %vm454_vm4, %v3403_v2, 0.0 }
 0xcad   :  { %1512 = vmax.xlane.f32.xlu1 %v1511_v5 }
 0xcb1   :  { %1539 = vadd.xlane.f32.xlu0 %v1538_v7 }
 0xcbe   :  { %1734 = vrot.lane.b32.xlu1 %v3323_v30, %s2889_s8 }
 0xce2   :  { %1542 = vadd.xlane.f32.xlu1 %v1541_v9 }
 0xcf3   :  { %1832 = vrot.lane.b32.xlu1 %v3335_v16, %s2889_s8 }
 0xcf9   :  { %v1498_v10 = vpop.xlane.xlu0 %1497 }
 0xcfa   :  { %v1516_v12 = vsub.f32 %v3373_v20, %v1498_v10 }
 0xcfc   :  { %v1526_v13 = vmul.f32 1.442695, %v1516_v12 }
 0xcfd   :  { %v1501_v14 = vpop.xlane.xlu0 %1500 }
 0xcfe   :  { %2847 = vpow2.f32 %v1526_v13  ;;  %v1517_v30 = vsub.f32 %v3375_v1, %v1501_v14 }
 0xd00   :  { %v1528_v18 = vmul.f32 1.442695, %v1517_v30 }
 0xd01   :  { %v1507_v11 = vpop.xlane.xlu1 %1506  ;;  %v1504_v15 = vpop.xlane.xlu0 %1503 }
 0xd02   :  { %v1519_v21 = vsub.f32 %v1487_v39, %v1507_v11  ;;  %2849 = vpow2.f32 %v1528_v18  ;;  %v1518_v36 = vsub.f32 %v3381_v37, %v1504_v15 }
 0xd04   :  { %v1532_v20 = vmul.f32 1.442695, %v1519_v21  ;;  %v1530_v38 = vmul.f32 1.442695, %v1518_v36 }
 0xd05   :  { %v1637_v22 = vpop.permute.xlu1 %1636 }
 0xd06   :  { %v1642_v24 = vsel %vm485_vm5, %v1637_v22, 0  ;;  %2851 = vpow2.f32 %v1532_v20 }
 0xd07   :  { %2646 = vmatpush3.bf16.msra.mxu0 %v1642_v24  ;;  %2853 = vpow2.f32 %v1530_v38 }
 0xd08   :  { %v3412_v25 = vpop.eup %2847  ;;  %2657 = vmatprep.subr.bf16.mxu0 %v2883_v6 }
 0xd09   :  { %v1510_v26 = vpop.xlane.xlu0 %1509  ;;  %v1544_v16 = vsel %vm454_vm4, %v3412_v25, 0.0  ;;  %v1686_v42 = vpop.permute.xlu1 %1685 }
 0xd0a   :  { %1545 = vadd.xlane.f32.xlu0 %v1544_v16  ;;  %v1520_v39 = vsub.f32 %v3386_v48, %v1510_v26  ;;  %v1691_v55 = vsel %vm485_vm5, %v1686_v42, 0 }
 0xd0c   :  { %v3419_v3 = vpop.eup %2849  ;;  %v1534_v40 = vmul.f32 1.442695, %v1520_v39 }
 0xd0d   :  { %v1588_v1 = vpop.permute.xlu0 %1587  ;;  %v1547_v28 = vsel %vm454_vm4, %v3419_v3, 0.0 }
 0xd0e   :  { %v1593_v27 = vsel %vm485_vm5, %v1588_v1, 0  ;;  %2855 = vpow2.f32 %v1534_v40 }
 0xd0f   :  { %2640 = vmatpush3.bf16.msra.mxu1 %v1593_v27 }
 0xd10   :  { %2651 = vmatprep.subr.bf16.mxu1 %v2883_v6  ;;  %v3423_v29 = vpop.eup %2851 }
 0xd11   :  { %v1553_v33 = vsel %vm454_vm4, %v3423_v29, 0.0  ;;  %v3431_v43 = vpop.eup %2853 }
 0xd12   :  { %v1550_v47 = vsel %vm454_vm4, %v3431_v43, 0.0 }
 0xd17   :  { %1548 = vadd.xlane.f32.xlu1 %v1547_v28 }
 0xd18   :  { %v3435_v49 = vpop.eup %2855 }
 0xd1b   :  { %1554 = vadd.xlane.f32.xlu1 %v1553_v33 }
 0xd20   :  { %1783 = vrot.lane.b32.xlu0 %v3333_v41, %s2889_s8  ;;  %v1556_v41 = vsel %vm454_vm4, %v3435_v49, 0.0 }
 0xd3a   :  { %v1513_v19 = vpop.xlane.xlu1 %1512 }
 0xd3b   :  { %v1521_v44 = vsub.f32 %v1489_v0, %v1513_v19 }
 0xd3d   :  { %v1536_v45 = vmul.f32 1.442695, %v1521_v44 }
 0xd3e   :  { %v1540_v46 = vpop.xlane.xlu0 %1539  ;;  %v1735_v56 = vpop.permute.xlu1 %1734 }
 0xd3f   :  { %2857 = vrcp.f32 %v1540_v46  ;;  %1551 = vadd.xlane.f32.xlu0 %v1550_v47  ;;  %v1740_v63 = vsel %vm485_vm5, %v1735_v56, 0 }
 0xd40   :  { %2859 = vpow2.f32 %v1536_v45 }
 0xd43   :  { %1557 = vadd.xlane.f32.xlu0 %v1556_v41 }
 0xd49   :  { %v2858_v37 = vpop.eup %2857 }
 0xd4a   :  { %v3439_v48 = vpop.eup %2859  ;;  %v1570_v50 = vmul.f32 %v2858_v37, %v3396_v4 }
 0xd4b   :  { %v1559_v53 = vsel %vm454_vm4, %v3439_v48, 0.0 }
 0xd4c   :  { %1560 = vadd.xlane.f32.xlu1 %v1559_v53  ;;  %v1578_v54 = vpack.c.bf16 %v1570_v50, %v1570_v50 }
 0xd4e   :  { %2642 = vmatmul.mubr.msk.bf16.vlgmr.msra.gmra.mrb[20].mxu1 %vm454_vm4, %v1578_v54 }
 0xd4f   :  { %2652 = vmatpush3.bf16.msra.mxu1 %v1691_v55  ;;  %2653 = vmatprep.mubr.msk.bf16.mxu1 %vm2884_vm2, %v2883_v6 }
 0xd50   :  { %2663 = vmatprep.subr.bf16.mxu1 %v2883_v6 }
 0xd59   :  { %1881 = vrot.lane.b32.xlu0 %v3348_v51, %s2889_s8 }
 0xd5d   :  { %1930 = vrot.lane.b32.xlu1 %v3351_v52, %s2889_s8 }
 0xd6f   :  { %v1543_v57 = vpop.xlane.xlu1 %1542 }
 0xd70   :  { %2861 = vrcp.f32 %v1543_v57  ;;  %v2799_v57 = vld [vmem:[%s3611_s20] sm:$0xff]  }
 0xd73   :  { %v1833_v52 = vpop.permute.xlu1 %1832 }
 0xd74   :  { %v1838_v13 = vsel %vm485_vm5, %v1833_v52, 0  ;;  %v2800_v52 = vld [vmem:[%s3611_s20 + $0x8] sm:$0xff]  }
 0xd7a   :  { %v2862_v58 = vpop.eup %2861 }
 0xd7b   :  { %v1571_v59 = vmul.f32 %v2862_v58, %v3403_v2 }
 0xd7d   :  { %v1579_v62 = vpack.c.bf16 %v1571_v59, %v1571_v59 }
 0xd7f   :  { %2648 = vmatmul.mubr.msk.bf16.vlgmr.msra.gmra.mrb[56].mxu0 %vm454_vm4, %v1579_v62 }
 0xd80   :  { %2658 = vmatpush3.bf16.msra.mxu0 %v1740_v63  ;;  %2659 = vmatprep.mubr.msk.bf16.mxu0 %vm2884_vm2, %v2883_v6 }
 0xd81   :  { %2669 = vmatprep.subr.bf16.mxu0 %v2883_v6 }
 0xd97   :  { %v1546_v51 = vpop.xlane.xlu0 %1545 }
 0xd98   :  { %2863 = vrcp.f32 %v1546_v51 }
 0xd9b   :  { %v1784_v5 = vpop.permute.xlu0 %1783 }
 0xd9c   :  { %v1789_v32 = vsel %vm485_vm5, %v1784_v5, 0 }
 0xda2   :  { %v2864_v0 = vpop.eup %2863 }
 0xda3   :  { %v1572_v4 = vmul.f32 %v2864_v0, %v3412_v25 }
 0xda4   :  { %v1549_v7 = vpop.xlane.xlu1 %1548 }
 0xda5   :  { %v1580_v23 = vpack.c.bf16 %v1572_v4, %v1572_v4  ;;  %2865 = vrcp.f32 %v1549_v7 }
 0xda7   :  { %2654 = vmatmul.mubr.msk.bf16.vlgmr.msra.gmra.mrb[24].mxu1 %vm454_vm4, %v1580_v23 }
 0xda8   :  { %2664 = vmatpush3.bf16.msra.mxu1 %v1789_v32  ;;  %2665 = vmatprep.mubr.msk.bf16.mxu1 %vm2884_vm2, %v2883_v6  ;;  %v1555_v17 = vpop.xlane.xlu1 %1554 }
 0xda9   :  { %2675 = vmatprep.subr.bf16.mxu1 %v2883_v6  ;;  %2867 = vrcp.f32 %v1555_v17 }
 0xdaf   :  { %v2866_v2 = vpop.eup %2865 }
 0xdb0   :  { %v1573_v9 = vmul.f32 %v2866_v2, %v3419_v3 }
 0xdb2   :  { %v1581_v10 = vpack.c.bf16 %v1573_v9, %v1573_v9 }
 0xdb3   :  { %v2868_v12 = vpop.eup %2867 }
 0xdb4   :  { %2660 = vmatmul.mubr.msk.bf16.vlgmr.msra.gmra.mrb[60].mxu0 %vm454_vm4, %v1581_v10  ;;  %v1575_v14 = vmul.f32 %v2868_v12, %v3423_v29 }
 0xdb5   :  { %2670 = vmatpush3.bf16.msra.mxu0 %v1838_v13  ;;  %2671 = vmatprep.mubr.msk.bf16.mxu0 %vm2884_vm2, %v2883_v6 }
 0xdb6   :  { %2681 = vmatprep.subr.bf16.mxu0 %v2883_v6  ;;  %v1583_v30 = vpack.c.bf16 %v1575_v14, %v1575_v14 }
 0xdbc   :  { %2672 = vmatmul.mubr.msk.bf16.vlgmr.msra.gmra.mrb[64].mxu0 %vm454_vm4, %v1583_v30 }
 0xdbd   :  { %2683 = vmatprep.mubr.msk.bf16.mxu0 %vm2884_vm2, %v2883_v6 }
 0xdcc   :  { %v1552_v11 = vpop.xlane.xlu0 %1551 }
 0xdcd   :  { %2869 = vrcp.f32 %v1552_v11 }
 0xdd0   :  { %v1558_v15 = vpop.xlane.xlu0 %1557 }
 0xdd1   :  { %2871 = vrcp.f32 %v1558_v15 }
 0xdd4   :  { %v1882_v22 = vpop.permute.xlu0 %1881 }
 0xdd5   :  { %v1887_v16 = vsel %vm485_vm5, %v1882_v22, 0 }
 0xdd7   :  { %v2870_v18 = vpop.eup %2869 }
 0xdd8   :  { %v1574_v21 = vmul.f32 %v2870_v18, %v3431_v43 }
 0xdd9   :  { %v1561_v24 = vpop.xlane.xlu1 %1560 }
 0xdda   :  { %2873 = vrcp.f32 %v1561_v24  ;;  %v1582_v25 = vpack.c.bf16 %v1574_v21, %v1574_v21 }
 0xddb   :  { %v2872_v26 = vpop.eup %2871 }
 0xddc   :  { %2666 = vmatmul.mubr.msk.bf16.vlgmr.msra.gmra.mrb[28].mxu1 %vm454_vm4, %v1582_v25  ;;  %v1576_v1 = vmul.f32 %v2872_v26, %v3435_v49 }
 0xddd   :  { %v1931_v20 = vpop.permute.xlu1 %1930  ;;  %2676 = vmatpush3.bf16.msra.mxu1 %v1887_v16  ;;  %2677 = vmatprep.mubr.msk.bf16.mxu1 %vm2884_vm2, %v2883_v6 }
 0xdde   :  { %v1936_v27 = vsel %vm485_vm5, %v1931_v20, 0  ;;  %2687 = vmatprep.subr.bf16.mxu1 %v2883_v6  ;;  %v1584_v3 = vpack.c.bf16 %v1576_v1, %v1576_v1 }
 0xddf   :  { %2682 = vmatpush3.bf16.msra.mxu0 %v1936_v27  ;;  %v2396_v27 = vld [vmem:[%s3612_s21] ss:$0 sm:$0xff] }
 0xde4   :  { %v2874_v28 = vpop.eup %2873  ;;  %2678 = vmatmul.mubr.msk.bf16.vlgmr.msra.gmra.mrb[32].mxu1 %vm454_vm4, %v1584_v3 }
 0xde5   :  { %v1577_v29 = vmul.f32 %v2874_v28, %v3439_v48  ;;  %2691 = vmatprep.mubr.msk.bf16.mxu1 %vm2884_vm2, %v2883_v6  ;;  %2688 = vmatpush3.bf16.msra.mxu1 %v2799_v57 }
 0xde6   :  { %2689 = vmatprep.subr.bf16.mxu1 %v2883_v6 }
 0xde7   :  { %v1585_v33 = vpack.c.bf16 %v1577_v29, %v1577_v29 }
 0xde9   :  { %2684 = vmatmul.mubr.msk.bf16.vlgmr.msra.gmra.mrb[68].mxu0 %vm454_vm4, %v1585_v33  ;;  %2690 = vmatpush3.bf16.msra.mxu1 %v2800_v52  ;;  %v2400_v52 = vld [vmem:[%s3615_s22] ss:$0 sm:$0xff] }
 0xdea   :  { %2207 = vmatprep.mubr.bf16.mxu0 %v2886_v34  ;;  %2695 = vmatprep.subr.bf16.mxu1 %v2883_v6 }
 0xe21   :  { %v1629_v36 = vpop.f32.mrb[20].mxu1 }
 0xe22   :  { %v2643_v38 = vpop.f32.mrb[21].mxu1 }
 0xe23   :  { %v1632_v39 = vpop.f32.mrb[22].mxu1 }
 0xe24   :  { %v2644_v40 = vpop.f32.mrb[23].mxu1 }
 0xe52   :  { %v1678_v42 = vpop.f32.mrb[56].mxu0 }
 0xe53   :  { %v2649_v43 = vpop.f32.mrb[57].mxu0 }
 0xe54   :  { %v1681_v19 = vpop.f32.mrb[58].mxu0 }
 0xe55   :  { %v2650_v44 = vpop.f32.mrb[59].mxu0 }
 0xe7a   :  { %v1727_v45 = vpop.f32.mrb[24].mxu1 }
 0xe7b   :  { %v2655_v46 = vpop.f32.mrb[25].mxu1 }
 0xe7c   :  { %v1730_v47 = vpop.f32.mrb[26].mxu1 }
 0xe7d   :  { %v2656_v49 = vpop.f32.mrb[27].mxu1 }
 0xe87   :  { %v1776_v41 = vpop.f32.mrb[60].mxu0 }
 0xe88   :  { %v2755_v37 = vpack.i.bf16 %v1776_v41, %v1727_v45  ;;  %v2661_v48 = vpop.f32.mrb[61].mxu0 }
 0xe89   :  { %v1779_v50 = vpop.f32.mrb[62].mxu0  ;;  %v2803_v48 = vld [vmem:[%s3613_s24 + $0x4] ss:$8 sps:$4 sm:$0xff]  }
 0xe8a   :  { %v2662_v53 = vpop.f32.mrb[63].mxu0  ;;  %2756 = vrot.lane.b32.xlu0 %v2755_v37, %s2890_s12  ;;  %v2801_v50 = vld [vmem:[%s3613_s24] ss:$8 sps:$4 sm:$0xff]   ;;  %2175 = vmatprep.subr.bf16.mxu0 %v2803_v48 }
 0xe8b   :  { %2176 = vmatpush1.bf16.msra.mxu0 %v2801_v50  ;;  %v2804_v53 = vld [vmem:[%s3613_s24 + $0x10] ss:$8 sps:$4 sm:$0xff]  }
 0xe8f   :  { %v1874_v34 = vpop.f32.mrb[64].mxu0 }
 0xe90   :  { %v2673_v54 = vpop.f32.mrb[65].mxu0 }
 0xe91   :  { %v1877_v55 = vpop.f32.mrb[66].mxu0  ;;  %v2807_v54 = vld [vmem:[%s3614_s26] sm:$0xff]  }
 0xe92   :  { %v2674_v56 = vpop.f32.mrb[67].mxu0 }
 0xeaf   :  { %v1825_v58 = vpop.f32.mrb[28].mxu1 }
 0xeb0   :  { %v2760_v59 = vpack.i.bf16 %v1874_v34, %v1825_v58  ;;  %v2667_v62 = vpop.f32.mrb[29].mxu1  ;;  %v2806_v34 = vld [vmem:[%s3613_s24 + $0x14] ss:$8 sps:$4 sm:$0xff]  }
 0xeb1   :  { %v1828_v63 = vpop.f32.mrb[30].mxu1  ;;  %2177 = vmatprep.subr.bf16.mxu0 %v2806_v34 }
 0xeb2   :  { %2761 = vrot.lane.b32.xlu1 %v2760_v59, %s2891_s29  ;;  %v2668_v51 = vpop.f32.mrb[31].mxu1  ;;  %2178 = vmatpush1.bf16.msra.mxu0 %v2804_v53 }
 0xeb7   :  { %v1923_v0 = vpop.f32.mrb[32].mxu1 }
 0xeb8   :  { %v2679_v4 = vpop.f32.mrb[33].mxu1 }
 0xeb9   :  { %v1926_v5 = vpop.f32.mrb[34].mxu1 }
 0xeba   :  { %v2680_v7 = vpop.f32.mrb[35].mxu1 }
 0xebb   :  { %v2401_v7 = vld [vmem:[%s3616_s23] ss:$0 sm:$0xff] }
 0xebc   :  { %v1972_v23 = vpop.f32.mrb[68].mxu0 }
 0xebd   :  { %v2765_v32 = vpack.i.bf16 %v1972_v23, %v1923_v0  ;;  %v2685_v17 = vpop.f32.mrb[69].mxu0 }
 0xebe   :  { %v1975_v2 = vpop.f32.mrb[70].mxu0 }
 0xebf   :  { %v2686_v9 = vpop.f32.mrb[71].mxu0  ;;  %2766 = vrot.lane.b32.xlu0 %v2765_v32, %s2892_s30 }
 0xec0   :  { %v2808_v9 = vld [vmem:[%s3614_s26 + $0x8] sm:$0xff]  }
 0xefc   :  { %v2757_v10 = vpop.permute.xlu0 %2756 }
 0xefd   :  { %v2759_v13 = vunpack.i.h.bf16 %v2757_v10  ;;  %v2758_v14 = vunpack.i.l.bf16 %v2757_v10  ;;  %v2809_v10 = vld [vmem:[%s3614_s26 + $0x10] sm:$0xff]  }
 0xeff   :  { %v2003_v18 = vsel %vm454_vm4, %v1678_v42, %v2759_v13  ;;  %v2002_v21 = vsel %vm454_vm4, %v1629_v36, %v2758_v14  ;;  %v2811_v13 = vld [vmem:[%s3614_s26 + $0x20] sm:$0xff]   ;;  %v2812_v14 = vld [vmem:[%s3614_s26 + $0x28] sm:$0xff]  }
 0xf24   :  { %v2762_v12 = vpop.permute.xlu1 %2761 }
 0xf25   :  { %v2764_v30 = vunpack.i.h.bf16 %v2762_v12  ;;  %v2763_v11 = vunpack.i.l.bf16 %v2762_v12  ;;  %v2810_v12 = vld [vmem:[%s3614_s26 + $0x18] sm:$0xff]  }
 0xf27   :  { %v2005_v25 = vsel %vm359_vm3, %v2003_v18, %v2764_v30  ;;  %v2004_v26 = vsel %vm359_vm3, %v2002_v21, %v2763_v11  ;;  %v2813_v30 = vld [vmem:[%s3614_s26 + $0x30] sm:$0xff]   ;;  %v2814_v11 = vld [vmem:[%s3614_s26 + $0x38] sm:$0xff]  }
 0xf31   :  { %v2767_v15 = vpop.permute.xlu0 %2766 }
 0xf32   :  { %v2769_v22 = vunpack.i.h.bf16 %v2767_v15  ;;  %v2768_v24 = vunpack.i.l.bf16 %v2767_v15  ;;  %v2080_v15 = vld [vmem:[%s3617_s25] sm:$0x3] }
 0xf33   :  { %v2149_v18 = vrot.slane %v2080_v15, %v711_v61 }
 0xf34   :  { %v2008_v16 = vsel %vm2006_vm6, %v2005_v25, %v2769_v22  ;;  %v2007_v20 = vsel %vm2006_vm6, %v2004_v26, %v2768_v24 }
 0xf35   :  { %v2009_v1 = vpack.c.bf16 %v2008_v16, %v2007_v20 }
 0xf37   :  { %2692 = vmatmul.mubr.msk.bf16.vlgmr.msra.gmra.mrb[36].mxu1 %vm121_vm0, %v2009_v1  ;;  %v2145_v1 = vrot.slane %v2080_v15, %v707_v8 }
 0xf38   :  { %2711 = vmatprep.mubr.msk.bf16.mxu1 %vm2884_vm2, %v2883_v6  ;;  %2696 = vmatpush3.bf16.msra.mxu1 %v2807_v54 }
 0xf39   :  { %2697 = vmatprep.subr.bf16.mxu1 %v2883_v6 }
 0xf3c   :  { %2698 = vmatpush3.bf16.msra.mxu1 %v2808_v9 }
 0xf3d   :  { %2699 = vmatprep.subr.bf16.mxu1 %v2883_v6 }
 0xf40   :  { %2700 = vmatpush3.bf16.msra.mxu1 %v2809_v10 }
 0xf41   :  { %2701 = vmatprep.subr.bf16.mxu1 %v2883_v6 }
 0xf44   :  { %2702 = vmatpush3.bf16.msra.mxu1 %v2810_v12 }
 0xf45   :  { %2703 = vmatprep.subr.bf16.mxu1 %v2883_v6 }
 0xf48   :  { %2704 = vmatpush3.bf16.msra.mxu1 %v2811_v13 }
 0xf49   :  { %2705 = vmatprep.subr.bf16.mxu1 %v2883_v6 }
 0xf4c   :  { %2706 = vmatpush3.bf16.msra.mxu1 %v2812_v14 }
 0xf4d   :  { %2707 = vmatprep.subr.bf16.mxu1 %v2883_v6 }
 0xf50   :  { %2708 = vmatpush3.bf16.msra.mxu1 %v2813_v30 }
 0xf51   :  { %2709 = vmatprep.subr.bf16.mxu1 %v2883_v6 }
 0xf54   :  { %2710 = vmatpush3.bf16.msra.mxu1 %v2814_v11 }
0x100a   :  { %v2065_v3 = vpop.f32.mrb[36].mxu1 }
0x100b   :  { %v2066_v28 = vadd.f32 %v2396_v27, %v2065_v3  ;;  %v2693_v29 = vpop.f32.mrb[37].mxu1 }
0x100c   :  { %v2068_v33 = vpop.f32.mrb[38].mxu1 }
0x100d   :  { %v3508_v36 = vadd.f32 %v2066_v28, %v3264_v31  ;;  %v2069_v38 = vadd.f32 %v2396_v27, %v2068_v33  ;;  %v2694_v39 = vpop.f32.mrb[39].mxu1 }
0x100f   :  { %v3511_v40 = vadd.f32 %v2069_v38, %v3267_v35  ;;  %v2098_v42 = vsel %vm121_vm0, %v3508_v36, 0.0 }
0x1010   :  { %2099 = vadd.xlane.f32.xlu1 %v2098_v42 }
0x1011   :  { %v2101_v43 = vsel %vm121_vm0, %v3511_v40, 0.0 }
0x1012   :  { %2102 = vadd.xlane.f32.xlu0 %v2101_v43 }
0x109d   :  { %v2100_v19 = vpop.xlane.xlu1 %2099 }
0x109e   :  { %v2104_v44 = vmul.f32 0.03125, %v2100_v19 }
0x109f   :  { %v2103_v45 = vpop.xlane.xlu0 %2102 }
0x10a0   :  { %v2106_v46 = vsub.f32 %v3508_v36, %v2104_v44  ;;  %v2105_v31 = vmul.f32 0.03125, %v2103_v45 }
0x10a2   :  { %v2107_v47 = vsub.f32 %v3511_v40, %v2105_v31  ;;  %v2108_v49 = vmul.f32 %v2106_v46, %v2106_v46 }
0x10a4   :  { %v2110_v35 = vsel %vm121_vm0, %v2108_v49, 0.0  ;;  %v2109_v41 = vmul.f32 %v2107_v47, %v2107_v47 }
0x10a5   :  { %2111 = vadd.xlane.f32.xlu0 %v2110_v35 }
0x10a6   :  { %v2113_v37 = vsel %vm121_vm0, %v2109_v41, 0.0 }
0x10a9   :  { %2114 = vadd.xlane.f32.xlu0 %v2113_v37 }
0x1132   :  { %v2112_v55 = vpop.xlane.xlu0 %2111 }
0x1133   :  { %v2116_v56 = vmul.f32 0.03125, %v2112_v55 }
0x1135   :  { %v2118_v57 = vadd.f32 1e-05, %v2116_v56 }
0x1136   :  { %v2115_v58 = vpop.xlane.xlu0 %2114 }
0x1137   :  { %2875 = vrsqrt.f32 %v2118_v57  ;;  %v2117_v59 = vmul.f32 0.03125, %v2115_v58 }
0x1139   :  { %v2119_v62 = vadd.f32 1e-05, %v2117_v59 }
0x113b   :  { %2877 = vrsqrt.f32 %v2119_v62 }
0x1141   :  { %v2876_v63 = vpop.eup %2875 }
0x1142   :  { %v2122_v51 = vmul.f32 %v2876_v63, %v2106_v46  ;;  %v2407_v46 = vld [vmem:[%s3618_s27] ss:$0 sm:$0xff] }
0x1144   :  { %v2130_v4 = vmul.f32 %v2400_v52, %v2122_v51 }
0x1145   :  { %v2878_v0 = vpop.eup %2877 }
0x1146   :  { %v2123_v5 = vmul.f32 %v2878_v0, %v2107_v47  ;;  %v2138_v32 = vadd.f32 %v2401_v7, %v2130_v4 }
0x1148   :  { %v2131_v23 = vmul.f32 %v2400_v52, %v2123_v5 }
0x114a   :  { %v2139_v17 = vadd.f32 %v2401_v7, %v2131_v23 }
0x114c   :  { %v2140_v2 = vpack.c.bf16 %v2139_v17, %v2138_v32 }
0x114e   :  { %2406 = vmatmul.mubr.msk.bf16.vlgmr.msra.gmra.mrb[72].mxu0 %vm121_vm0, %v2140_v2 }
0x1221   :  { %v2209_v21 = vpop.f32.mrb[72].mxu0 }
0x1222   :  { %v2211_v22 = vpop.f32.mrb[73].mxu0  ;;  %v2210_v33 = vadd.f32 %v2209_v21, %v2145_v1 }
0x1223   :  { %v2212_v24 = vadd.f32 %v2211_v22, %v2149_v18  ;;  %v2213_v25 = vpop.f32.mrb[74].mxu0 }
0x1224   :  { %v2215_v26 = vpop.f32.mrb[75].mxu0  ;;  %v2214_v43 = vadd.f32 %v2213_v25, %v2145_v1 }
0x1225   :  { %v2220_v16 = vmul.f32 0.70710677, %v2212_v24  ;;  %v2216_v20 = vadd.f32 %v2215_v26, %v2149_v18  ;;  %v2218_v3 = vmul.f32 0.5, %v2212_v24 }
0x1227   :  { %2879 = verf.f32 %v2220_v16  ;;  %v2221_v6 = vmul.f32 0.70710677, %v2216_v20  ;;  %v2219_v61 = vmul.f32 0.5, %v2216_v20 }
0x1229   :  { %2881 = verf.f32 %v2221_v6 }
0x1231   :  { %v2880_v27 = vpop.eup %2879 }
0x1232   :  { %v2224_v28 = vadd.f32 1.0, %v2880_v27 }
0x1233   :  { %v2882_v29 = vpop.eup %2881 }
0x1234   :  { %v2226_v38 = vmul.f32 %v2224_v28, %v2218_v3  ;;  %v2225_v39 = vadd.f32 1.0, %v2882_v29 }
0x1236   :  { %v2228_v42 = vmul.f32 %v2226_v38, %v2210_v33  ;;  %v2227_v19 = vmul.f32 %v2225_v39, %v2219_v61 }
0x1238   :  { %v2229_v44 = vmul.f32 %v2227_v19, %v2214_v43 }
0x123a   :  { %v2230_v45 = vpack.c.bf16 %v2229_v44, %v2228_v42 }
0x123c   :  { %2712 = vmatmul.mubr.bf16.vlgmr.msra.gmra.mrb[40].mxu1 %v2230_v45 }
0x130f   :  { %v2319_v60 = vpop.f32.mrb[40].mxu1 }
0x1310   :  { %v2320_v8 = vadd.f32 %v2407_v46, %v2319_v60  ;;  %v2713_v31 = vpop.f32.mrb[41].mxu1 }
0x1311   :  { %v2322_v47 = vpop.f32.mrb[42].mxu1 }
0x1312   :  { %v2326_v49 = vadd.f32 %v2320_v8, %v3508_v36  ;;  %v2323_v35 = vadd.f32 %v2407_v46, %v2322_v47  ;;  %v2714_v41 = vpop.f32.mrb[43].mxu1 }
0x1314   :  { %2328 = vst.msk [vmem:[%s3619_s28] sm:$0xff] %vm121_vm0, %v2326_v49  ;;  %v2327_v37 = vadd.f32 %v2323_v35, %v3511_v40 }
0x1316   :  { %2329 = vst.msk [vmem:[%s3619_s28 + $0x8] sm:$0xff] %vm121_vm0, %v2327_v37 }

// kernel: forward.9
= control target key start
LH: loop header
LB: loop body
LE: loop exit
PB: predicated region body
PF: predicated region fallthrough
CT: control target
= control target key end

     0   :  { %s3690_s0 = inlined_call_operand.vmem [shape: f32[16,32], index: 0, kind: input, shape index: {}]   ;;  %s3691_s1 = inlined_call_operand.vmem [shape: f32[32,128], index: 1, kind: input, shape index: {}]   ;;  %s3692_s2 = inlined_call_operand.vmem [shape: f32[1,32], index: 2, kind: input, shape index: {}]   ;;  %s3693_s3 = inlined_call_operand.vmem [shape: f32[1,32], index: 3, kind: input, shape index: {}]   ;;  %s3694_s4 = inlined_call_operand.vmem [shape: f32[1,128], index: 4, kind: input, shape index: {}]   ;;  %s3695_s5 = inlined_call_operand.vmem [shape: f32[1,128], index: 5, kind: input, shape index: {}]   ;;  %s3696_s6 = inlined_call_operand.vmem [shape: bf16[32,16], index: 6, kind: input, shape index: {}]   ;;  %s3697_s7 = inlined_call_operand.vmem [shape: bf16[128,32], index: 7, kind: input, shape index: {}]   ;;  %s3698_s8 = inlined_call_operand.vmem [shape: bf16[16,32], index: 8, kind: input, shape index: {}]   ;;  %s3699_s9 = inlined_call_operand.vmem [shape: f32[1,32], index: 9, kind: input, shape index: {}]   ;;  %s3700_s10 = inlined_call_operand.vmem [shape: f32[1,32], index: 10, kind: input, shape index: {}]   ;;  %s3701_s11 = inlined_call_operand.vmem [shape: f32[1,32], index: 11, kind: input, shape index: {}]   ;;  %s3702_s12 = inlined_call_operand.vmem [shape: bf16[32,256], index: 12, kind: input, shape index: {}]   ;;  %s3703_s13 = inlined_call_operand.vmem [shape: f32[1,256], index: 13, kind: input, shape index: {}]   ;;  %s3704_s14 = inlined_call_operand.vmem [shape: bf16[128,32], index: 14, kind: input, shape index: {}]   ;;  %s3705_s15 = inlined_call_operand.vmem [shape: f32[1,32], index: 15, kind: input, shape index: {}]   ;;  %s3706_s16 = inlined_call_operand.vmem [shape: f32[1,32], index: 16, kind: input, shape index: {}]   ;;  %s3707_s17 = inlined_call_operand.vmem [shape: f32[1,32], index: 17, kind: input, shape index: {}]   ;;  %s3708_s18 = inlined_call_operand.vmem [shape: bf16[32,32], index: 18, kind: input, shape index: {}]   ;;  %s3709_s19 = inlined_call_operand.vmem [shape: bf16[32,64], index: 19, kind: input, shape index: {}]   ;;  %s3710_s20 = inlined_call_operand.vmem [shape: bf16[32,32], index: 20, kind: input, shape index: {}]   ;;  %s3711_s21 = inlined_call_operand.vmem [shape: f32[1,32], index: 21, kind: input, shape index: {}]   ;;  %s3712_s22 = inlined_call_operand.vmem [shape: f32[1,32], index: 22, kind: input, shape index: {}]   ;;  %s3713_s23 = inlined_call_operand.vmem [shape: f32[1,32], index: 23, kind: input, shape index: {}]   ;;  %s3714_s24 = inlined_call_operand.vmem [shape: bf16[32,256], index: 24, kind: input, shape index: {}]   ;;  %s3715_s25 = inlined_call_operand.vmem [shape: f32[1,256], index: 25, kind: input, shape index: {}]   ;;  %s3716_s26 = inlined_call_operand.vmem [shape: bf16[128,32], index: 26, kind: input, shape index: {}]   ;;  %s3717_s27 = inlined_call_operand.vmem [shape: f32[1,32], index: 27, kind: input, shape index: {}]   ;;  %s3718_s28 = inlined_call_operand.hbm [shape: f32[16,32], index: 28, kind: output, shape index: {}]  }
   0x1   :  { %3724 = sst [smem:[#allocation5_spill]] %s3690_s0 }
   0x2   :  { %3725 = sst [smem:[#allocation6_spill]] %s3691_s1 }
   0x3   :  { %3726 = sst [smem:[#allocation7_spill]] %s3692_s2 }
   0x4   :  { %3727 = sst [smem:[#allocation8_spill]] %s3693_s3 }
   0x5   :  { %3728 = sst [smem:[#allocation9_spill]] %s3694_s4 }
   0x6   :  { %3729 = sst [smem:[#allocation10_spill]] %s3695_s5 }
   0x7   :  { %3730 = sst [smem:[#allocation11_spill]] %s3696_s6 }
   0x8   :  { %3731 = sst [smem:[#allocation12_spill]] %s3697_s7 }
   0x9   :  { %3732 = sst [smem:[#allocation13_spill]] %s3698_s8 }
   0xa   :  { %3733 = sst [smem:[#allocation14_spill]] %s3699_s9 }
   0xb   :  { %3734 = sst [smem:[#allocation15_spill]] %s3700_s10 }
   0xc   :  { %3735 = sst [smem:[#allocation16_spill]] %s3701_s11 }
   0xd   :  { %3736 = sst [smem:[#allocation17_spill]] %s3702_s12 }
   0xe   :  { %s3737_s9 = sld [smem:[#allocation6_spill]]  ;;  %vm124_vm0 = vcmask 261120   ;;  %s3738_s7 = sld [smem:[#allocation5_spill]] }
  0x14   :  { %v93_v0 = vld [vmem:[%s3737_s9] sm:$0xff]  ;;  %v95_v1 = vld [vmem:[%s3737_s9 + $0x10] sm:$0xff]  ;;  %v94_v2 = vld [vmem:[%s3737_s9 + $0x8] sm:$0xff] }
  0x15   :  { %168 = vadd.xlane.f32.xlu0 %v93_v0  ;;  %172 = vadd.xlane.f32.xlu1 %v95_v1  ;;  %v96_v3 = vld [vmem:[%s3737_s9 + $0x18] sm:$0xff]  ;;  %v3134_v4 = vld [vmem:[%s3738_s7] sm:$0xff]  ;;  %v3139_v5 = vld [vmem:[%s3738_s7 + $0x8] sm:$0xff] }
  0x16   :  { %v125_v6 = vsel %vm124_vm0, %v3134_v4, 0.0  ;;  %v128_v7 = vsel %vm124_vm0, %v3139_v5, 0.0 }
  0x19   :  { %170 = vadd.xlane.f32.xlu0 %v94_v2  ;;  %174 = vadd.xlane.f32.xlu1 %v96_v3 }
  0x1d   :  { %126 = vadd.xlane.f32.xlu0 %v125_v6  ;;  %129 = vadd.xlane.f32.xlu1 %v128_v7 }
  0x1e   :  { %33 = vsyncpa [#allocation3], 0  ;;  %s3739_s5 = sld [smem:[#allocation12_spill]]  ;;  %v180_v9 = vlaneseq  ;;  %s3740_s3 = sld [smem:[#allocation11_spill]]  ;;  %v2962_v49 = vmov 0.0   ;;  %vm2963_vm2 = vmmov 0  }
  0x1f   :  { %2546 = vmatprep.subr.bf16.mxu0 %v2962_v49  ;;  %2550 = vmatprep.mubr.msk.bf16.mxu0 %vm2963_vm2, %v2962_v49  ;;  %s3741_s11 = sld [smem:[#allocation9_spill]]  ;;  %s3742_s7 = sld [smem:[#allocation10_spill]]  ;;  %vm399_vm3 = vcmask 130048   ;;  %vm1148_vm4 = vcmask 64512   ;;  %vm1627_vm5 = vcmask 1043456   ;;  %vm2042_vm6 = vcmask 195584  }
  0x20   :  { %v181_v10 = vand.u32 127, %v180_v9  ;;  %s3743_s4 = sld [smem:[#allocation7_spill]]  ;;  %s3744_s30 = sld [smem:[#allocation8_spill]] }
  0x21   :  { %s3746_s29 = sld [smem:[#allocation14_spill]]  ;;  %s3747_s12 = sld [smem:[#allocation17_spill]] }
  0x22   :  { %vm182_vm1 = vcmp.lt.s32.totalorder %v181_v10, 26  ;;  %s2969_s2 = smov 8   ;;  %s2970_s1 = smov 16  }
  0x23   :  { %s2972_s6 = smov [#allocation2]  }
  0x24   :  { %v2821_v8 = vld [vmem:[%s3739_s5] sm:$0xff]   ;;  %v2822_v41 = vld [vmem:[%s3739_s5 + $0x8] sm:$0xff]   ;;  %v2823_v42 = vld [vmem:[%s3739_s5 + $0x10] sm:$0xff]   ;;  %s2371_s10 = sshll.u32 %s2972_s6, 4  ;;  %s2372_s10 = int_to_ptr.vmem [resolvable:$true] %s2371_s10 }
  0x25   :  { %2554 = vmatprep.subr.bf16.mxu1 %v2821_v8  ;;  %v2824_v43 = vld [vmem:[%s3739_s5 + $0x18] sm:$0xff]   ;;  %v2825_v44 = vld [vmem:[%s3739_s5 + $0x20] sm:$0xff]   ;;  %v2826_v45 = vld [vmem:[%s3739_s5 + $0x28] sm:$0xff]   ;;  %p2943_p1 = scmp.lt.s32.totalorder %s2372_s10, %s2372_s10 }
  0x26   :  { %2555 = vmatpush3.bf16.msra.mxu1 %v2821_v8  ;;  %v2827_v46 = vld [vmem:[%s3739_s5 + $0x30] sm:$0xff]   ;;  %v2828_v47 = vld [vmem:[%s3739_s5 + $0x38] sm:$0xff]   ;;  %v2829_v48 = vld [vmem:[%s3740_s3] sm:$0xff]   ;;  %s3745_s5 = sld [smem:[#allocation13_spill]] }
  0x27   :  { %2556 = vmatprep.subr.bf16.mxu1 %v2822_v41  ;;  %2547 = vmatpush3.bf16.msra.mxu0 %v2829_v48  ;;  %v2830_v50 = vld [vmem:[%s3740_s3 + $0x8] sm:$0xff]   ;;  %v2384_v10 = vld [vmem:[%s3741_s11] ss:$0 sm:$0xff]  ;;  %s2964_s3 = smov 112  }
  0x28   :  { %2548 = vmatprep.subr.bf16.mxu0 %v2962_v49 }
  0x2a   :  { %2557 = vmatpush3.bf16.msra.mxu1 %v2822_v41 }
  0x2b   :  { %2558 = vmatprep.subr.bf16.mxu1 %v2823_v42  ;;  %2549 = vmatpush3.bf16.msra.mxu0 %v2830_v50 }
  0x2c   :  { %2574 = vmatprep.subr.bf16.mxu0 %v2962_v49 }
  0x2e   :  { %2559 = vmatpush3.bf16.msra.mxu1 %v2823_v42 }
  0x2f   :  { %2560 = vmatprep.subr.bf16.mxu1 %v2824_v43 }
  0x32   :  { %2561 = vmatpush3.bf16.msra.mxu1 %v2824_v43 }
  0x33   :  { %2562 = vmatprep.subr.bf16.mxu1 %v2825_v44 }
  0x36   :  { %2563 = vmatpush3.bf16.msra.mxu1 %v2825_v44 }
  0x37   :  { %2564 = vmatprep.subr.bf16.mxu1 %v2826_v45 }
  0x3a   :  { %2565 = vmatpush3.bf16.msra.mxu1 %v2826_v45 }
  0x3b   :  { %2566 = vmatprep.subr.bf16.mxu1 %v2827_v46 }
  0x3e   :  { %2567 = vmatpush3.bf16.msra.mxu1 %v2827_v46 }
  0x3f   :  { %2568 = vmatprep.subr.bf16.mxu1 %v2828_v47 }
  0x42   :  { %2569 = vmatpush3.bf16.msra.mxu1 %v2828_v47 }
  0x43   :  { %2604 = vmatprep.subr.bf16.mxu1 %v2962_v49 }
  0xa2   :  { %v169_v11 = vpop.xlane.xlu0 %168  ;;  %v173_v12 = vpop.xlane.xlu1 %172 }
  0xa3   :  { %v176_v13 = vmul.f32 0.03846154, %v169_v11  ;;  %v178_v14 = vmul.f32 0.03846154, %v173_v12 }
  0xa5   :  { %v3149_v15 = vsub.f32 %v93_v0, %v176_v13  ;;  %v3151_v16 = vsub.f32 %v95_v1, %v178_v14 }
  0xa6   :  { %v171_v17 = vpop.xlane.xlu0 %170  ;;  %v175_v18 = vpop.xlane.xlu1 %174 }
  0xa7   :  { %v177_v19 = vmul.f32 0.03846154, %v171_v17  ;;  %v179_v20 = vmul.f32 0.03846154, %v175_v18  ;;  %v187_v21 = vsel %vm182_vm1, %v3149_v15, 0.0  ;;  %v189_v22 = vsel %vm182_vm1, %v3151_v16, 0.0 }
  0xa8   :  { %v191_v23 = vmul.f32 %v187_v21, %v187_v21  ;;  %v193_v28 = vmul.f32 %v189_v22, %v189_v22  ;;  %v2385_v17 = vld [vmem:[%s3742_s7] ss:$0 sm:$0xff] }
  0xa9   :  { %v3157_v24 = vsub.f32 %v94_v2, %v177_v19  ;;  %v3159_v25 = vsub.f32 %v96_v3, %v179_v20 }
  0xaa   :  { %195 = vadd.xlane.f32.xlu0 %v191_v23  ;;  %v127_v26 = vpop.xlane.xlu0 %126  ;;  %v130_v27 = vpop.xlane.xlu1 %129 }
  0xab   :  { %v132_v29 = vmul.f32 0.03125, %v127_v26  ;;  %v188_v30 = vsel %vm182_vm1, %v3157_v24, 0.0  ;;  %v133_v31 = vmul.f32 0.03125, %v130_v27  ;;  %v190_v32 = vsel %vm182_vm1, %v3159_v25, 0.0 }
  0xac   :  { %v192_v33 = vmul.f32 %v188_v30, %v188_v30  ;;  %v194_v36 = vmul.f32 %v190_v32, %v190_v32 }
  0xad   :  { %v3166_v34 = vsub.f32 %v3134_v4, %v132_v29  ;;  %v3169_v35 = vsub.f32 %v3139_v5, %v133_v31 }
  0xae   :  { %197 = vadd.xlane.f32.xlu1 %v192_v33  ;;  %199 = vadd.xlane.f32.xlu0 %v193_v28 }
  0xaf   :  { %v136_v37 = vmul.f32 %v3166_v34, %v3166_v34  ;;  %v137_v38 = vmul.f32 %v3169_v35, %v3169_v35 }
  0xb1   :  { %v138_v39 = vsel %vm124_vm0, %v136_v37, 0.0  ;;  %v141_v40 = vsel %vm124_vm0, %v137_v38, 0.0 }
  0xb2   :  { %201 = vadd.xlane.f32.xlu1 %v194_v36  ;;  %139 = vadd.xlane.f32.xlu0 %v138_v39 }
  0xb6   :  { %142 = vadd.xlane.f32.xlu1 %v141_v40 }
 0x137   :  { %v196_v51 = vpop.xlane.xlu0 %195 }
 0x138   :  { %v203_v52 = vmul.f32 0.03846154, %v196_v51 }
 0x13a   :  { %v207_v53 = vadd.f32 1e-05, %v203_v52 }
 0x13b   :  { %v198_v54 = vpop.xlane.xlu1 %197  ;;  %v200_v55 = vpop.xlane.xlu0 %199 }
 0x13c   :  { %2866 = vrsqrt.f32 %v207_v53  ;;  %v204_v56 = vmul.f32 0.03846154, %v198_v54  ;;  %v205_v57 = vmul.f32 0.03846154, %v200_v55 }
 0x13e   :  { %v208_v58 = vadd.f32 1e-05, %v204_v56  ;;  %v209_v59 = vadd.f32 1e-05, %v205_v57 }
 0x13f   :  { %v202_v60 = vpop.xlane.xlu1 %201  ;;  %v140_v61 = vpop.xlane.xlu0 %139 }
 0x140   :  { %2868 = vrsqrt.f32 %v208_v58  ;;  %v206_v62 = vmul.f32 0.03846154, %v202_v60  ;;  %v144_v63 = vmul.f32 0.03125, %v140_v61 }
 0x141   :  { %2870 = vrsqrt.f32 %v209_v59 }
 0x142   :  { %v210_v0 = vadd.f32 1e-05, %v206_v62  ;;  %v146_v1 = vadd.f32 1e-05, %v144_v63 }
 0x143   :  { %v143_v2 = vpop.xlane.xlu1 %142 }
 0x144   :  { %2872 = vrsqrt.f32 %v210_v0  ;;  %v145_v3 = vmul.f32 0.03125, %v143_v2 }
 0x145   :  { %2874 = vrsqrt.f32 %v146_v1 }
 0x146   :  { %v2867_v6 = vpop.eup %2866  ;;  %v147_v7 = vadd.f32 1e-05, %v145_v3 }
 0x147   :  { %v215_v8 = vmul.f32 %v2867_v6, %v3149_v15 }
 0x148   :  { %2876 = vrsqrt.f32 %v147_v7 }
 0x149   :  { %v225_v14 = vmul.f32 %v2384_v10, %v215_v8 }
 0x14a   :  { %v2869_v11 = vpop.eup %2868 }
 0x14b   :  { %v2871_v12 = vpop.eup %2870  ;;  %v216_v13 = vmul.f32 %v2869_v11, %v3157_v24  ;;  %v235_v15 = vadd.f32 %v2385_v17, %v225_v14  ;;  %v2382_v24 = vld [vmem:[%s3743_s4] ss:$0 sm:$0xff] }
 0x14c   :  { %v217_v18 = vmul.f32 %v2871_v12, %v3151_v16 }
 0x14d   :  { %v226_v19 = vmul.f32 %v2384_v10, %v216_v13 }
 0x14e   :  { %v2873_v20 = vpop.eup %2872  ;;  %v227_v26 = vmul.f32 %v2384_v10, %v217_v18 }
 0x14f   :  { %v2875_v21 = vpop.eup %2874  ;;  %v236_v22 = vadd.f32 %v2385_v17, %v226_v19  ;;  %v218_v23 = vmul.f32 %v2873_v20, %v3159_v25  ;;  %v2383_v25 = vld [vmem:[%s3744_s30] ss:$0 sm:$0xff] }
 0x150   :  { %v150_v27 = vmul.f32 %v2875_v21, %v3166_v34  ;;  %v237_v16 = vadd.f32 %v2385_v17, %v227_v26 }
 0x151   :  { %v296_v28 = vpack.c.bf16 %v236_v22, %v235_v15  ;;  %v228_v29 = vmul.f32 %v2384_v10, %v218_v23 }
 0x152   :  { %v2877_v30 = vpop.eup %2876  ;;  %v158_v33 = vmul.f32 %v2382_v24, %v150_v27 }
 0x153   :  { %v151_v31 = vmul.f32 %v2877_v30, %v3169_v35  ;;  %2570 = vmatprep.mubr.bf16.mxu1 %v296_v28  ;;  %v238_v32 = vadd.f32 %v2385_v17, %v228_v29 }
 0x154   :  { %v166_v34 = vadd.f32 %v2383_v25, %v158_v33 }
 0x155   :  { %v297_v36 = vpack.c.bf16 %v238_v32, %v237_v16  ;;  %v159_v37 = vmul.f32 %v2382_v24, %v151_v31  ;;  %v2831_v24 = vld [vmem:[%s3745_s5] sm:$0xff]  }
 0x157   :  { %2571 = vmatmul.mubr.bf16.vlgmr.msra.gmra.mrb[0].mxu1 %v297_v36  ;;  %v167_v38 = vadd.f32 %v2383_v25, %v159_v37  ;;  %v2401_v37 = vld [vmem:[%s3746_s29] ss:$0 sm:$0xff]  ;;  %s3748_s29 = sld [smem:[#allocation15_spill]] }
 0x158   :  { %2620 = vmatprep.mubr.msk.bf16.mxu1 %vm2963_vm2, %v2962_v49 }
 0x159   :  { %v239_v39 = vpack.c.bf16 %v167_v38, %v166_v34 }
 0x15b   :  { %2551 = vmatmul.mubr.msk.bf16.vlgmr.msra.gmra.mrb[0].mxu0 %vm124_vm0, %v239_v39 }
 0x15c   :  { %2576 = vmatprep.mubr.msk.bf16.mxu0 %vm2963_vm2, %v2962_v49 }
 0x22a   :  { %v2572_v35 = vpop.f32.mrb[0].mxu1 }
 0x22b   :  { %v380_v40 = vpop.f32.mrb[1].mxu1 }
 0x22c   :  { %v2573_v41 = vpop.f32.mrb[2].mxu1 }
 0x22d   :  { %v398_v42 = vpack.c.bf16 %v2573_v41, %v2572_v35  ;;  %v383_v43 = vpop.f32.mrb[3].mxu1 }
 0x22e   :  { %v397_v44 = vpack.c.bf16 %v383_v43, %v380_v40  ;;  %v289_v45 = vpop.f32.mrb[0].mxu0 }
 0x22f   :  { %v2552_v46 = vpop.f32.mrb[1].mxu0  ;;  %v395_v51 = vpack.c.bf16 %v289_v45, %v289_v45  ;;  %v450_v52 = vsel %vm399_vm3, %v398_v42, 0 }
 0x230   :  { %v404_v47 = vsel %vm399_vm3, %v397_v44, 0  ;;  %v292_v48 = vpop.f32.mrb[2].mxu0 }
 0x231   :  { %v2553_v50 = vpop.f32.mrb[3].mxu0  ;;  %2575 = vmatpush3.bf16.xpose.msra.mxu0 %v404_v47  ;;  %v396_v53 = vpack.c.bf16 %v292_v48, %v292_v48 }
 0x232   :  { %2580 = vmatprep.subr.bf16.mxu0 %v2962_v49 }
 0x238   :  { %2577 = vmatmul.mubr.msk.bf16.vlgmr.msra.gmra.mrb[4].mxu0 %vm399_vm3, %v395_v51 }
 0x239   :  { %2581 = vmatpush3.bf16.xpose.msra.mxu0 %v450_v52  ;;  %2582 = vmatprep.mubr.msk.bf16.mxu0 %vm2963_vm2, %v2962_v49 }
 0x23a   :  { %2586 = vmatprep.subr.bf16.mxu0 %v2962_v49 }
 0x240   :  { %2583 = vmatmul.mubr.msk.bf16.vlgmr.msra.gmra.mrb[8].mxu0 %vm399_vm3, %v396_v53 }
 0x241   :  { %2588 = vmatprep.mubr.msk.bf16.mxu0 %vm2963_vm2, %v2962_v49 }
 0x30b   :  { %v440_v54 = vpop.f32.mrb[4].mxu0 }
 0x30c   :  { %v492_v55 = vmul.f32 0.25, %v440_v54  ;;  %v2578_v56 = vpop.f32.mrb[5].mxu0 }
 0x30d   :  { %v443_v57 = vpop.f32.mrb[6].mxu0  ;;  %v2832_v56 = vld [vmem:[%s3747_s12] ss:$8 sps:$4 sm:$0xff]  }
 0x30e   :  { %v2579_v58 = vpop.f32.mrb[7].mxu0  ;;  %v494_v59 = vsel %vm399_vm3, %v492_v55, -inf  ;;  %v2835_v57 = vld [vmem:[%s3747_s12 + $0x10] ss:$8 sps:$4 sm:$0xff]  }
 0x30f   :  { %495 = vmax.xlane.f32.xlu0 %v494_v59  ;;  %v2837_v58 = vld [vmem:[%s3747_s12 + $0x14] ss:$8 sps:$4 sm:$0xff]   ;;  %v2965_v59 = vmov 0  }
 0x313   :  { %v486_v60 = vpop.f32.mrb[8].mxu0 }
 0x314   :  { %v493_v61 = vmul.f32 0.25, %v486_v60  ;;  %v2584_v62 = vpop.f32.mrb[9].mxu0  ;;  %v2838_v60 = vld [vmem:[%s3704_s14] sm:$0xff]  }
 0x315   :  { %v489_v63 = vpop.f32.mrb[10].mxu0  ;;  %2605 = vmatpush3.bf16.msra.mxu1 %v2838_v60 }
 0x316   :  { %v2585_v0 = vpop.f32.mrb[11].mxu0  ;;  %v497_v1 = vsel %vm399_vm3, %v493_v61, -inf  ;;  %2606 = vmatprep.subr.bf16.mxu1 %v2962_v49 }
 0x317   :  { %498 = vmax.xlane.f32.xlu1 %v497_v1 }
 0x39c   :  { %v496_v2 = vpop.xlane.xlu0 %495 }
 0x39d   :  { %v500_v3 = vsub.f32 %v492_v55, %v496_v2  ;;  %v2834_v55 = vld [vmem:[%s3747_s12 + $0x4] ss:$8 sps:$4 sm:$0xff]   ;;  %s3749_s12 = sld [smem:[#allocation16_spill]] }
 0x39f   :  { %v502_v6 = vmul.f32 1.442695, %v500_v3 }
 0x3a1   :  { %2878 = vpow2.f32 %v502_v6  ;;  %v2404_v6 = vld [vmem:[%s3748_s29] ss:$0 sm:$0xff] }
 0x3a4   :  { %v499_v7 = vpop.xlane.xlu1 %498 }
 0x3a5   :  { %v501_v8 = vsub.f32 %v493_v61, %v499_v7 }
 0x3a7   :  { %v504_v10 = vmul.f32 1.442695, %v501_v8 }
 0x3a9   :  { %2880 = vpow2.f32 %v504_v10 }
 0x3ab   :  { %v2879_v11 = vpop.eup %2878 }
 0x3ac   :  { %v506_v12 = vsel %vm399_vm3, %v2879_v11, 0.0 }
 0x3ad   :  { %507 = vadd.xlane.f32.xlu0 %v506_v12  ;;  %v2405_v12 = vld [vmem:[%s3749_s12] ss:$0 sm:$0xff] }
 0x3b3   :  { %v2881_v13 = vpop.eup %2880 }
 0x3b4   :  { %v509_v14 = vsel %vm399_vm3, %v2881_v13, 0.0 }
 0x3b5   :  { %510 = vadd.xlane.f32.xlu1 %v509_v14 }
 0x3c3   :  { %519 = vrot.lane.b32.xlu0 %v397_v44, %s2964_s3 }
 0x3c6   :  { %566 = vrot.lane.b32.xlu1 %v398_v42, %s2964_s3 }
 0x43a   :  { %v508_v17 = vpop.xlane.xlu0 %507 }
 0x43b   :  { %2882 = vrcp.f32 %v508_v17 }
 0x43e   :  { %v520_v18 = vpop.permute.xlu0 %519 }
 0x43f   :  { %2587 = vmatpush3.bf16.msra.mxu0 %v520_v18 }
 0x440   :  { %2592 = vmatprep.subr.bf16.mxu0 %v2962_v49 }
 0x442   :  { %v511_v19 = vpop.xlane.xlu1 %510 }
 0x443   :  { %2884 = vrcp.f32 %v511_v19  ;;  %v2839_v19 = vld [vmem:[%s3704_s14 + $0x8] sm:$0xff]  }
 0x444   :  { %2607 = vmatpush3.bf16.msra.mxu1 %v2839_v19 }
 0x445   :  { %v2883_v20 = vpop.eup %2882  ;;  %2608 = vmatprep.subr.bf16.mxu1 %v2962_v49 }
 0x446   :  { %v514_v21 = vmul.f32 %v2883_v20, %v2879_v11  ;;  %v567_v22 = vpop.permute.xlu1 %566  ;;  %v2840_v20 = vld [vmem:[%s3704_s14 + $0x10] sm:$0xff]  }
 0x448   :  { %v516_v15 = vpack.c.bf16 %v514_v21, %v514_v21  ;;  %2609 = vmatpush3.bf16.msra.mxu1 %v2840_v20  ;;  %v2841_v21 = vld [vmem:[%s3704_s14 + $0x18] sm:$0xff]  }
 0x449   :  { %2610 = vmatprep.subr.bf16.mxu1 %v2962_v49 }
 0x44a   :  { %2589 = vmatmul.mubr.msk.bf16.vlgmr.msra.gmra.mrb[12].mxu0 %vm399_vm3, %v516_v15  ;;  %v2842_v15 = vld [vmem:[%s3704_s14 + $0x20] sm:$0xff]  }
 0x44b   :  { %2593 = vmatpush3.bf16.msra.mxu0 %v567_v22  ;;  %2594 = vmatprep.mubr.msk.bf16.mxu0 %vm2963_vm2, %v2962_v49  ;;  %v2843_v22 = vld [vmem:[%s3704_s14 + $0x28] sm:$0xff]  }
 0x44c   :  { %2598 = vmatprep.subr.bf16.mxu0 %v2962_v49  ;;  %2611 = vmatpush3.bf16.msra.mxu1 %v2841_v21  ;;  %v2420_v21 = vld [vmem:[%s3706_s16] ss:$0 sm:$0xff] }
 0x44d   :  { %v2885_v23 = vpop.eup %2884  ;;  %2612 = vmatprep.subr.bf16.mxu1 %v2962_v49 }
 0x44e   :  { %v515_v26 = vmul.f32 %v2885_v23, %v2881_v13  ;;  %v2844_v23 = vld [vmem:[%s3704_s14 + $0x30] sm:$0xff]  }
 0x450   :  { %v517_v27 = vpack.c.bf16 %v515_v26, %v515_v26  ;;  %2613 = vmatpush3.bf16.msra.mxu1 %v2842_v15  ;;  %v2845_v26 = vld [vmem:[%s3704_s14 + $0x38] sm:$0xff]   ;;  %s2971_s14 = smov 24  }
 0x451   :  { %2614 = vmatprep.subr.bf16.mxu1 %v2962_v49 }
 0x452   :  { %2595 = vmatmul.mubr.msk.bf16.vlgmr.msra.gmra.mrb[16].mxu0 %vm399_vm3, %v517_v27  ;;  %v3334_v27 = vshrl.u32 %v180_v9, 7 }
 0x453   :  { %2600 = vmatprep.mubr.msk.bf16.mxu0 %vm2963_vm2, %v2962_v49  ;;  %2599 = vmatpush3.bf16.msra.mxu0 %v2831_v24 }
 0x454   :  { %772 = vmatprep.subr.bf16.mxu0 %v2834_v55  ;;  %2615 = vmatpush3.bf16.msra.mxu1 %v2843_v22  ;;  %v745_v24 = vsub.s32 1, %v3334_v27  ;;  %v741_v9 = vsub.s32 0, %v3334_v27 }
 0x455   :  { %2616 = vmatprep.subr.bf16.mxu1 %v2962_v49 }
 0x458   :  { %2617 = vmatpush3.bf16.msra.mxu1 %v2844_v23 }
 0x459   :  { %2618 = vmatprep.subr.bf16.mxu1 %v2962_v49 }
 0x45c   :  { %2619 = vmatpush3.bf16.msra.mxu1 %v2845_v26 }
 0x45d   :  { %2652 = vmatprep.subr.bf16.mxu1 %v2962_v49 }
 0x51d   :  { %v559_v28 = vpop.f32.mrb[12].mxu0 }
 0x51e   :  { %v2590_v29 = vpop.f32.mrb[13].mxu0 }
 0x51f   :  { %v562_v30 = vpop.f32.mrb[14].mxu0 }
 0x520   :  { %v2591_v31 = vpop.f32.mrb[15].mxu0 }
 0x525   :  { %v606_v16 = vpop.f32.mrb[16].mxu0 }
 0x526   :  { %v612_v32 = vpack.c.bf16 %v606_v16, %v559_v28  ;;  %v2596_v33 = vpop.f32.mrb[17].mxu0  ;;  %v677_v28 = vld [vmem:[%s3703_s13] sm:$0x3] }
 0x527   :  { %v609_v25 = vpop.f32.mrb[18].mxu0  ;;  %v746_v29 = vrot.slane %v677_v28, %v745_v24 }
 0x528   :  { %v2597_v36 = vpop.f32.mrb[19].mxu0  ;;  %2601 = vmatmul.mubr.msk.bf16.vlgmr.msra.gmra.mrb[20].mxu0 %vm399_vm3, %v612_v32 }
 0x529   :  { %773 = vmatpush1.bf16.msra.mxu0 %v2832_v56  ;;  %804 = vmatprep.mubr.bf16.mxu0 %v2965_v59 }
 0x52a   :  { %774 = vmatprep.subr.bf16.mxu0 %v2837_v58 }
 0x52d   :  { %775 = vmatpush1.bf16.msra.mxu0 %v2835_v57 }
 0x52e   :  { %2624 = vmatprep.subr.bf16.mxu0 %v2962_v49 }
 0x5fb   :  { %v662_v34 = vpop.f32.mrb[20].mxu0 }
 0x5fc   :  { %v663_v38 = vadd.f32 %v2401_v37, %v662_v34  ;;  %v2602_v39 = vpop.f32.mrb[21].mxu0  ;;  %v742_v34 = vrot.slane %v677_v28, %v741_v9  ;;  %v2421_v28 = vld [vmem:[%s3707_s17] ss:$0 sm:$0xff]  ;;  %s2966_s17 = smov 120  }
 0x5fd   :  { %v665_v35 = vpop.f32.mrb[22].mxu0 }
 0x5fe   :  { %v3265_v40 = vadd.f32 %v663_v38, %v3134_v4  ;;  %v666_v41 = vadd.f32 %v2401_v37, %v665_v35  ;;  %v2603_v42 = vpop.f32.mrb[23].mxu0 }
 0x600   :  { %v3268_v43 = vadd.f32 %v666_v41, %v3139_v5  ;;  %v695_v44 = vsel %vm124_vm0, %v3265_v40, 0.0 }
 0x601   :  { %696 = vadd.xlane.f32.xlu1 %v695_v44 }
 0x602   :  { %v698_v45 = vsel %vm124_vm0, %v3268_v43, 0.0 }
 0x603   :  { %699 = vadd.xlane.f32.xlu0 %v698_v45 }
 0x68e   :  { %v697_v46 = vpop.xlane.xlu1 %696 }
 0x68f   :  { %v701_v47 = vmul.f32 0.03125, %v697_v46 }
 0x690   :  { %v700_v48 = vpop.xlane.xlu0 %699 }
 0x691   :  { %v703_v50 = vsub.f32 %v3265_v40, %v701_v47  ;;  %v702_v4 = vmul.f32 0.03125, %v700_v48 }
 0x693   :  { %v704_v51 = vsub.f32 %v3268_v43, %v702_v4  ;;  %v705_v52 = vmul.f32 %v703_v50, %v703_v50 }
 0x695   :  { %v707_v5 = vsel %vm124_vm0, %v705_v52, 0.0  ;;  %v706_v53 = vmul.f32 %v704_v51, %v704_v51  ;;  %v2411_v52 = vld [vmem:[%s3705_s15] ss:$0 sm:$0xff] }
 0x696   :  { %708 = vadd.xlane.f32.xlu0 %v707_v5 }
 0x697   :  { %v710_v54 = vsel %vm124_vm0, %v706_v53, 0.0 }
 0x698   :  { %711 = vadd.xlane.f32.xlu1 %v710_v54 }
 0x723   :  { %v709_v61 = vpop.xlane.xlu0 %708 }
 0x724   :  { %v713_v62 = vmul.f32 0.03125, %v709_v61 }
 0x725   :  { %v712_v63 = vpop.xlane.xlu1 %711 }
 0x726   :  { %v715_v0 = vadd.f32 1e-05, %v713_v62  ;;  %v714_v1 = vmul.f32 0.03125, %v712_v63 }
 0x728   :  { %2886 = vrsqrt.f32 %v715_v0  ;;  %v716_v2 = vadd.f32 1e-05, %v714_v1 }
 0x72a   :  { %2888 = vrsqrt.f32 %v716_v2 }
 0x732   :  { %v2887_v3 = vpop.eup %2886 }
 0x733   :  { %v719_v7 = vmul.f32 %v2887_v3, %v703_v50 }
 0x734   :  { %v2889_v8 = vpop.eup %2888 }
 0x735   :  { %v727_v10 = vmul.f32 %v2404_v6, %v719_v7  ;;  %v720_v11 = vmul.f32 %v2889_v8, %v704_v51 }
 0x737   :  { %v728_v13 = vmul.f32 %v2404_v6, %v720_v11  ;;  %v735_v14 = vadd.f32 %v2405_v12, %v727_v10  ;;  %v2846_v10 = vld [vmem:[%s3708_s18] sm:$0xff]   ;;  %v2847_v11 = vld [vmem:[%s3708_s18 + $0x8] sm:$0xff]   ;;  %s2938_s18 = scalar_lea.vmem %s2372_s10, 256 }
 0x738   :  { %p2939_p0 = scmp.ne.s32.totalorder %s2372_s10, %s2938_s18  ;;  %p2944_p2 = scmp.lt.s32.totalorder %s2938_s18, %s2938_s18 }
 0x739   :  { %v736_v17 = vadd.f32 %v2405_v12, %v728_v13 }
 0x73a   :  { %p2945_p3 = por %p2944_p2, %p2943_p1 }
 0x73b   :  { %v737_v18 = vpack.c.bf16 %v736_v17, %v735_v14 }
 0x73c   :  { %p2946_p4 = pnand %p2945_p3, %p2939_p0 }
 0x73d   :  { %2410 = vmatmul.mubr.msk.bf16.vlgmr.msra.gmra.mrb[24].mxu0 %vm124_vm0, %v737_v18 }
 0x73e   :  { %2628 = vmatprep.mubr.msk.bf16.mxu0 %vm2963_vm2, %v2962_v49  ;;  %2625 = vmatpush3.bf16.msra.mxu0 %v2846_v10 }
 0x73f   :  { %2626 = vmatprep.subr.bf16.mxu0 %v2962_v49 }
 0x742   :  { %2627 = vmatpush3.bf16.msra.mxu0 %v2847_v11 }
 0x743   :  { %2632 = vmatprep.subr.bf16.mxu0 %v2962_v49 }
 0x810   :  { %v806_v30 = vpop.f32.mrb[24].mxu0 }
 0x811   :  { %v808_v31 = vpop.f32.mrb[25].mxu0  ;;  %v807_v42 = vadd.f32 %v806_v30, %v742_v34 }
 0x812   :  { %v809_v16 = vadd.f32 %v808_v31, %v746_v29  ;;  %v810_v32 = vpop.f32.mrb[26].mxu0 }
 0x813   :  { %v812_v33 = vpop.f32.mrb[27].mxu0  ;;  %v811_v48 = vadd.f32 %v810_v32, %v742_v34 }
 0x814   :  { %v817_v25 = vmul.f32 0.70710677, %v809_v16  ;;  %v813_v36 = vadd.f32 %v812_v33, %v746_v29  ;;  %v815_v39 = vmul.f32 0.5, %v809_v16  ;;  %v2848_v16 = vld [vmem:[%s3709_s19] sm:$0xff]   ;;  %v2849_v33 = vld [vmem:[%s3709_s19 + $0x8] sm:$0xff]   ;;  %s2967_s19 = smov 104  }
 0x816   :  { %2890 = verf.f32 %v817_v25  ;;  %v818_v37 = vmul.f32 0.70710677, %v813_v36  ;;  %v816_v45 = vmul.f32 0.5, %v813_v36 }
 0x818   :  { %2892 = verf.f32 %v818_v37 }
 0x820   :  { %v2891_v38 = vpop.eup %2890 }
 0x821   :  { %v821_v35 = vadd.f32 1.0, %v2891_v38 }
 0x822   :  { %v2893_v41 = vpop.eup %2892 }
 0x823   :  { %v823_v44 = vmul.f32 %v821_v35, %v815_v39  ;;  %v822_v46 = vadd.f32 1.0, %v2893_v41 }
 0x825   :  { %v825_v47 = vmul.f32 %v823_v44, %v807_v42  ;;  %v824_v50 = vmul.f32 %v822_v46, %v816_v45 }
 0x827   :  { %v826_v4 = vmul.f32 %v824_v50, %v811_v48 }
 0x829   :  { %v827_v51 = vpack.c.bf16 %v826_v4, %v825_v47 }
 0x82b   :  { %2621 = vmatmul.mubr.bf16.vlgmr.msra.gmra.mrb[4].mxu1 %v827_v51 }
 0x82c   :  { %2654 = vmatprep.mubr.msk.bf16.mxu1 %vm2963_vm2, %v2962_v49 }
 0x8fe   :  { %v916_v5 = vpop.f32.mrb[4].mxu1 }
 0x8ff   :  { %v917_v53 = vadd.f32 %v2411_v52, %v916_v5  ;;  %v2622_v54 = vpop.f32.mrb[5].mxu1 }
 0x900   :  { %v919_v55 = vpop.f32.mrb[6].mxu1 }
 0x901   :  { %v3351_v56 = vadd.f32 %v917_v53, %v3265_v40  ;;  %v920_v57 = vadd.f32 %v2411_v52, %v919_v55  ;;  %v2623_v58 = vpop.f32.mrb[7].mxu1 }
 0x903   :  { %v3354_v60 = vadd.f32 %v920_v57, %v3268_v43  ;;  %v940_v61 = vsel %vm124_vm0, %v3351_v56, 0.0 }
 0x904   :  { %941 = vadd.xlane.f32.xlu0 %v940_v61 }
 0x905   :  { %v943_v62 = vsel %vm124_vm0, %v3354_v60, 0.0 }
 0x906   :  { %944 = vadd.xlane.f32.xlu1 %v943_v62 }
 0x991   :  { %v942_v63 = vpop.xlane.xlu0 %941 }
 0x992   :  { %v946_v0 = vmul.f32 0.03125, %v942_v63 }
 0x993   :  { %v945_v1 = vpop.xlane.xlu1 %944 }
 0x994   :  { %v948_v2 = vsub.f32 %v3351_v56, %v946_v0  ;;  %v947_v40 = vmul.f32 0.03125, %v945_v1 }
 0x996   :  { %v949_v3 = vsub.f32 %v3354_v60, %v947_v40  ;;  %v950_v6 = vmul.f32 %v948_v2, %v948_v2 }
 0x998   :  { %v952_v43 = vsel %vm124_vm0, %v950_v6, 0.0  ;;  %v951_v7 = vmul.f32 %v949_v3, %v949_v3 }
 0x999   :  { %953 = vadd.xlane.f32.xlu0 %v952_v43 }
 0x99a   :  { %v955_v8 = vsel %vm124_vm0, %v951_v7, 0.0 }
 0x99b   :  { %956 = vadd.xlane.f32.xlu1 %v955_v8 }
 0xa26   :  { %v954_v12 = vpop.xlane.xlu0 %953 }
 0xa27   :  { %v958_v13 = vmul.f32 0.03125, %v954_v12 }
 0xa28   :  { %v957_v14 = vpop.xlane.xlu1 %956 }
 0xa29   :  { %v960_v17 = vadd.f32 1e-05, %v958_v13  ;;  %v959_v18 = vmul.f32 0.03125, %v957_v14 }
 0xa2b   :  { %2894 = vrsqrt.f32 %v960_v17  ;;  %v961_v19 = vadd.f32 1e-05, %v959_v18 }
 0xa2d   :  { %2896 = vrsqrt.f32 %v961_v19 }
 0xa35   :  { %v2895_v20 = vpop.eup %2894 }
 0xa36   :  { %v964_v15 = vmul.f32 %v2895_v20, %v948_v2 }
 0xa37   :  { %v2897_v22 = vpop.eup %2896 }
 0xa38   :  { %v972_v23 = vmul.f32 %v2420_v21, %v964_v15  ;;  %v965_v26 = vmul.f32 %v2897_v22, %v949_v3 }
 0xa3a   :  { %v973_v29 = vmul.f32 %v2420_v21, %v965_v26  ;;  %v980_v30 = vadd.f32 %v2421_v28, %v972_v23 }
 0xa3c   :  { %v981_v31 = vadd.f32 %v2421_v28, %v973_v29 }
 0xa3e   :  { %v982_v32 = vpack.c.bf16 %v981_v31, %v980_v30 }
 0xa40   :  { %2629 = vmatmul.mubr.msk.bf16.vlgmr.msra.gmra.mrb[28].mxu0 %vm124_vm0, %v982_v32 }
 0xa41   :  { %2633 = vmatpush3.bf16.msra.mxu0 %v2848_v16  ;;  %2636 = vmatprep.mubr.msk.bf16.mxu0 %vm2963_vm2, %v2962_v49 }
 0xa42   :  { %2634 = vmatprep.subr.bf16.mxu0 %v2962_v49 }
 0xa45   :  { %2635 = vmatpush3.bf16.msra.mxu0 %v2849_v33 }
 0xa46   :  { %2640 = vmatprep.subr.bf16.mxu0 %v2962_v49 }
 0xa48   :  { %2637 = vmatmul.mubr.msk.bf16.vlgmr.msra.gmra.mrb[32].mxu0 %vm124_vm0, %v982_v32 }
 0xa49   :  { %2642 = vmatprep.mubr.msk.bf16.mxu0 %vm2963_vm2, %v2962_v49 }
 0xb13   :  { %v1032_v25 = vpop.f32.mrb[28].mxu0 }
 0xb14   :  { %v2630_v36 = vpop.f32.mrb[29].mxu0  ;;  %v1132_v48 = vpack.c.bf16 %v1032_v25, %v1032_v25 }
 0xb15   :  { %v1035_v37 = vpop.f32.mrb[30].mxu0 }
 0xb16   :  { %v2631_v34 = vpop.f32.mrb[31].mxu0  ;;  %v2781_v38 = vpack.i.bf16 %v1035_v37, %v1032_v25  ;;  %v1133_v4 = vpack.c.bf16 %v1035_v37, %v1035_v37 }
 0xb18   :  { %2782 = vrot.lane.b32.xlu1 %v2781_v38, %s2966_s17 }
 0xb1b   :  { %v1085_v39 = vpop.f32.mrb[32].mxu0 }
 0xb1c   :  { %v2638_v35 = vpop.f32.mrb[33].mxu0  ;;  %v3392_v41 = vpack.c.bf16 %v1085_v39, %v1085_v39 }
 0xb1d   :  { %v1088_v42 = vpop.f32.mrb[34].mxu0 }
 0xb1e   :  { %v2639_v44 = vpop.f32.mrb[35].mxu0  ;;  %v1153_v45 = vsel %vm1148_vm4, %v3392_v41, 0  ;;  %v2786_v46 = vpack.i.bf16 %v1088_v42, %v1085_v39  ;;  %v3398_v47 = vpack.c.bf16 %v1088_v42, %v1088_v42 }
 0xb1f   :  { %2641 = vmatpush3.bf16.xpose.msra.mxu0 %v1153_v45 }
 0xb20   :  { %2787 = vrot.lane.b32.xlu1 %v2786_v46, %s2964_s3  ;;  %2777 = vrot.lane.b32.xlu0 %v2786_v46, %s2966_s17  ;;  %v1199_v50 = vsel %vm1148_vm4, %v3398_v47, 0 }
 0xb21   :  { %2646 = vmatprep.subr.bf16.mxu0 %v2962_v49 }
 0xb24   :  { %2792 = vrot.lane.b32.xlu1 %v2781_v38, %s2964_s3  ;;  %2797 = vrot.lane.b32.xlu0 %v2786_v46, %s2967_s19  ;;  %s2968_s3 = smov 96  }
 0xb26   :  { %2643 = vmatmul.mubr.msk.bf16.vlgmr.msra.gmra.mrb[36].mxu0 %vm1148_vm4, %v1132_v48 }
 0xb27   :  { %2647 = vmatpush3.bf16.xpose.msra.mxu0 %v1199_v50  ;;  %2648 = vmatprep.mubr.msk.bf16.mxu0 %vm2963_vm2, %v2962_v49 }
 0xb28   :  { %2802 = vrot.lane.b32.xlu1 %v2781_v38, %s2967_s19  ;;  %2658 = vmatprep.subr.bf16.mxu0 %v2962_v49 }
 0xb2e   :  { %2649 = vmatmul.mubr.msk.bf16.vlgmr.msra.gmra.mrb[40].mxu0 %vm1148_vm4, %v1133_v4 }
 0xb2f   :  { %2660 = vmatprep.mubr.msk.bf16.mxu0 %vm2963_vm2, %v2962_v49 }
 0xb8a   :  { %v2783_v51 = vpop.permute.xlu1 %2782 }
 0xb8b   :  { %v2784_v0 = vunpack.i.l.bf16 %v2783_v51  ;;  %v2785_v1 = vunpack.i.h.bf16 %v2783_v51 }
 0xb8d   :  { %v1134_v6 = vpack.c.bf16 %v2784_v0, %v2784_v0  ;;  %v1135_v43 = vpack.c.bf16 %v2785_v1, %v2785_v1 }
 0xb92   :  { %v2778_v52 = vpop.permute.xlu0 %2777  ;;  %v2788_v54 = vpop.permute.xlu1 %2787 }
 0xb93   :  { %v2780_v5 = vunpack.i.h.bf16 %v2778_v52  ;;  %v2779_v53 = vunpack.i.l.bf16 %v2778_v52  ;;  %v2789_v58 = vunpack.i.l.bf16 %v2788_v54  ;;  %v2790_v63 = vunpack.i.h.bf16 %v2788_v54 }
 0xb95   :  { %v3410_v55 = vpack.c.bf16 %v2780_v5, %v2780_v5  ;;  %v3412_v57 = vpack.c.bf16 %v2779_v53, %v2779_v53  ;;  %v3420_v2 = vpack.c.bf16 %v2789_v58, %v2789_v58  ;;  %v3422_v40 = vpack.c.bf16 %v2790_v63, %v2790_v63 }
 0xb96   :  { %v2798_v3 = vpop.permute.xlu0 %2797  ;;  %v2793_v7 = vpop.permute.xlu1 %2792 }
 0xb97   :  { %v1245_v61 = vsel %vm1148_vm4, %v3412_v57, 0  ;;  %v1291_v62 = vsel %vm1148_vm4, %v3410_v55, 0  ;;  %v2799_v8 = vunpack.i.l.bf16 %v2798_v3  ;;  %v1337_v10 = vsel %vm1148_vm4, %v3420_v2, 0 }
 0xb98   :  { %2653 = vmatpush3.bf16.xpose.msra.mxu1 %v1245_v61  ;;  %2659 = vmatpush3.bf16.xpose.msra.mxu0 %v1291_v62  ;;  %v2800_v11 = vunpack.i.h.bf16 %v2798_v3  ;;  %v1383_v12 = vsel %vm1148_vm4, %v3422_v40, 0  ;;  %v2794_v13 = vunpack.i.l.bf16 %v2793_v7  ;;  %v2795_v14 = vunpack.i.h.bf16 %v2793_v7 }
 0xb99   :  { %2664 = vmatprep.subr.bf16.mxu1 %v2962_v49  ;;  %2670 = vmatprep.subr.bf16.mxu0 %v2962_v49  ;;  %v3435_v17 = vpack.c.bf16 %v2799_v8, %v2799_v8 }
 0xb9a   :  { %v3438_v18 = vpack.c.bf16 %v2800_v11, %v2800_v11  ;;  %v1136_v19 = vpack.c.bf16 %v2794_v13, %v2794_v13  ;;  %v1137_v20 = vpack.c.bf16 %v2795_v14, %v2795_v14  ;;  %v2803_v21 = vpop.permute.xlu1 %2802 }
 0xb9b   :  { %v1429_v15 = vsel %vm1148_vm4, %v3435_v17, 0  ;;  %v2804_v23 = vunpack.i.l.bf16 %v2803_v21  ;;  %v2805_v26 = vunpack.i.h.bf16 %v2803_v21 }
 0xb9c   :  { %v1475_v22 = vsel %vm1148_vm4, %v3438_v18, 0 }
 0xb9d   :  { %v1138_v28 = vpack.c.bf16 %v2804_v23, %v2804_v23  ;;  %v1139_v29 = vpack.c.bf16 %v2805_v26, %v2805_v26 }
 0xb9f   :  { %2655 = vmatmul.mubr.msk.bf16.vlgmr.msra.gmra.mrb[8].mxu1 %vm1148_vm4, %v1134_v6  ;;  %2661 = vmatmul.mubr.msk.bf16.vlgmr.msra.gmra.mrb[44].mxu0 %vm1148_vm4, %v1135_v43 }
 0xba0   :  { %2665 = vmatpush3.bf16.xpose.msra.mxu1 %v1337_v10  ;;  %2671 = vmatpush3.bf16.xpose.msra.mxu0 %v1383_v12 }
 0xba1   :  { %2666 = vmatprep.mubr.msk.bf16.mxu1 %vm2963_vm2, %v2962_v49  ;;  %2672 = vmatprep.mubr.msk.bf16.mxu0 %vm2963_vm2, %v2962_v49 }
 0xba2   :  { %2676 = vmatprep.subr.bf16.mxu1 %v2962_v49  ;;  %2682 = vmatprep.subr.bf16.mxu0 %v2962_v49 }
 0xba7   :  { %2667 = vmatmul.mubr.msk.bf16.vlgmr.msra.gmra.mrb[12].mxu1 %vm1148_vm4, %v1136_v19  ;;  %2673 = vmatmul.mubr.msk.bf16.vlgmr.msra.gmra.mrb[48].mxu0 %vm1148_vm4, %v1137_v20 }
 0xba8   :  { %2677 = vmatpush3.bf16.xpose.msra.mxu1 %v1429_v15  ;;  %2683 = vmatpush3.bf16.xpose.msra.mxu0 %v1475_v22 }
 0xba9   :  { %2678 = vmatprep.mubr.msk.bf16.mxu1 %vm2963_vm2, %v2962_v49  ;;  %2684 = vmatprep.mubr.msk.bf16.mxu0 %vm2963_vm2, %v2962_v49 }
 0xbaa   :  { %2694 = vmatprep.subr.bf16.mxu0 %v2962_v49  ;;  %2688 = vmatprep.subr.bf16.mxu1 %v2962_v49 }
 0xbaf   :  { %2679 = vmatmul.mubr.msk.bf16.vlgmr.msra.gmra.mrb[16].mxu1 %vm1148_vm4, %v1138_v28  ;;  %2685 = vmatmul.mubr.msk.bf16.vlgmr.msra.gmra.mrb[52].mxu0 %vm1148_vm4, %v1139_v29 }
 0xbb0   :  { %2690 = vmatprep.mubr.msk.bf16.mxu1 %vm2963_vm2, %v2962_v49  ;;  %2696 = vmatprep.mubr.msk.bf16.mxu0 %vm2963_vm2, %v2962_v49 }
 0xbf9   :  { %v1189_v30 = vpop.f32.mrb[36].mxu0 }
 0xbfa   :  { %v1517_v31 = vmul.f32 0.35355338, %v1189_v30  ;;  %v2644_v16 = vpop.f32.mrb[37].mxu0 }
 0xbfb   :  { %v1192_v32 = vpop.f32.mrb[38].mxu0 }
 0xbfc   :  { %v2645_v33 = vpop.f32.mrb[39].mxu0  ;;  %v1525_v25 = vsel %vm1148_vm4, %v1517_v31, -inf }
 0xbfd   :  { %1526 = vmax.xlane.f32.xlu0 %v1525_v25 }
 0xc01   :  { %v1235_v36 = vpop.f32.mrb[40].mxu0 }
 0xc02   :  { %v1518_v37 = vmul.f32 0.35355338, %v1235_v36  ;;  %v2650_v34 = vpop.f32.mrb[41].mxu0 }
 0xc03   :  { %v1238_v38 = vpop.f32.mrb[42].mxu0 }
 0xc04   :  { %v2651_v39 = vpop.f32.mrb[43].mxu0  ;;  %v1528_v35 = vsel %vm1148_vm4, %v1518_v37, -inf }
 0xc05   :  { %1529 = vmax.xlane.f32.xlu1 %v1528_v35 }
 0xc72   :  { %v1281_v42 = vpop.f32.mrb[8].mxu1  ;;  %v1327_v45 = vpop.f32.mrb[44].mxu0 }
 0xc73   :  { %v3460_v44 = vmul.f32 0.35355338, %v1281_v42  ;;  %v2656_v46 = vpop.f32.mrb[9].mxu1  ;;  %v2662_v48 = vpop.f32.mrb[45].mxu0  ;;  %v3462_v4 = vmul.f32 0.35355338, %v1327_v45 }
 0xc74   :  { %v1284_v50 = vpop.f32.mrb[10].mxu1  ;;  %v1330_v51 = vpop.f32.mrb[46].mxu0 }
 0xc75   :  { %v2657_v52 = vpop.f32.mrb[11].mxu1  ;;  %v1531_v5 = vsel %vm1148_vm4, %v3460_v44, -inf  ;;  %v2663_v53 = vpop.f32.mrb[47].mxu0  ;;  %v1534_v54 = vsel %vm1148_vm4, %v3462_v4, -inf }
 0xc76   :  { %1532 = vmax.xlane.f32.xlu0 %v1531_v5 }
 0xc7a   :  { %1535 = vmax.xlane.f32.xlu0 %v1534_v54  ;;  %v1373_v58 = vpop.f32.mrb[12].mxu1  ;;  %v1419_v61 = vpop.f32.mrb[48].mxu0 }
 0xc7b   :  { %v3468_v62 = vmul.f32 0.35355338, %v1373_v58  ;;  %v2668_v63 = vpop.f32.mrb[13].mxu1  ;;  %v3470_v0 = vmul.f32 0.35355338, %v1419_v61  ;;  %v2674_v1 = vpop.f32.mrb[49].mxu0 }
 0xc7c   :  { %v1376_v3 = vpop.f32.mrb[14].mxu1  ;;  %v1422_v6 = vpop.f32.mrb[50].mxu0 }
 0xc7d   :  { %v2669_v43 = vpop.f32.mrb[15].mxu1  ;;  %v1537_v7 = vsel %vm1148_vm4, %v3468_v62, -inf  ;;  %v2675_v8 = vpop.f32.mrb[51].mxu0  ;;  %v1540_v10 = vsel %vm1148_vm4, %v3470_v0, -inf }
 0xc7e   :  { %1538 = vmax.xlane.f32.xlu0 %v1537_v7  ;;  %1541 = vmax.xlane.f32.xlu1 %v1540_v10 }
 0xc82   :  { %v1465_v11 = vpop.f32.mrb[16].mxu1  ;;  %v1511_v13 = vpop.f32.mrb[52].mxu0 }
 0xc83   :  { %v3476_v12 = vmul.f32 0.35355338, %v1465_v11  ;;  %v2680_v14 = vpop.f32.mrb[17].mxu1  ;;  %v2686_v19 = vpop.f32.mrb[53].mxu0  ;;  %v1524_v30 = vmul.f32 0.35355338, %v1511_v13 }
 0xc84   :  { %v1468_v20 = vpop.f32.mrb[18].mxu1  ;;  %v1514_v21 = vpop.f32.mrb[54].mxu0 }
 0xc85   :  { %v2681_v15 = vpop.f32.mrb[19].mxu1  ;;  %v1543_v22 = vsel %vm1148_vm4, %v3476_v12, -inf  ;;  %v2687_v23 = vpop.f32.mrb[55].mxu0  ;;  %v1546_v32 = vsel %vm1148_vm4, %v1524_v30, -inf }
 0xc86   :  { %1544 = vmax.xlane.f32.xlu0 %v1543_v22 }
 0xc8a   :  { %v1527_v26 = vpop.xlane.xlu0 %1526 }
 0xc8b   :  { %v1549_v28 = vsub.f32 %v1517_v31, %v1527_v26 }
 0xc8d   :  { %v1557_v29 = vmul.f32 1.442695, %v1549_v28 }
 0xc8f   :  { %1672 = vrot.lane.b32.xlu1 %v3398_v47, %s2968_s3  ;;  %2898 = vpow2.f32 %v1557_v29 }
 0xc92   :  { %v1530_v47 = vpop.xlane.xlu1 %1529 }
 0xc93   :  { %1721 = vrot.lane.b32.xlu1 %v3412_v57, %s2968_s3  ;;  %v1550_v57 = vsub.f32 %v1518_v37, %v1530_v47 }
 0xc99   :  { %v3486_v16 = vpop.eup %2898 }
 0xc9a   :  { %v1573_v33 = vsel %vm1148_vm4, %v3486_v16, 0.0 }
 0xc9c   :  { %1622 = vrot.lane.b32.xlu0 %v3392_v41, %s2968_s3  ;;  %v1559_v41 = vmul.f32 1.442695, %v1550_v57 }
 0xc9e   :  { %2900 = vpow2.f32 %v1559_v41 }
 0xca8   :  { %v3493_v31 = vpop.eup %2900 }
 0xca9   :  { %v1576_v25 = vsel %vm1148_vm4, %v3493_v31, 0.0 }
 0xcb7   :  { %1547 = vmax.xlane.f32.xlu1 %v1546_v32 }
 0xcbb   :  { %1574 = vadd.xlane.f32.xlu0 %v1573_v33 }
 0xcc8   :  { %1770 = vrot.lane.b32.xlu1 %v3410_v55, %s2968_s3 }
 0xcec   :  { %1577 = vadd.xlane.f32.xlu1 %v1576_v25 }
 0xcfd   :  { %1868 = vrot.lane.b32.xlu1 %v3422_v40, %s2968_s3 }
 0xd03   :  { %v1533_v36 = vpop.xlane.xlu0 %1532 }
 0xd04   :  { %v1551_v34 = vsub.f32 %v3460_v44, %v1533_v36 }
 0xd06   :  { %v1561_v38 = vmul.f32 1.442695, %v1551_v34 }
 0xd07   :  { %v1536_v39 = vpop.xlane.xlu0 %1535 }
 0xd08   :  { %2902 = vpow2.f32 %v1561_v38  ;;  %v1552_v55 = vsub.f32 %v3462_v4, %v1536_v39 }
 0xd0a   :  { %v1563_v42 = vmul.f32 1.442695, %v1552_v55 }
 0xd0b   :  { %v1542_v37 = vpop.xlane.xlu1 %1541  ;;  %v1539_v35 = vpop.xlane.xlu0 %1538 }
 0xd0c   :  { %v1554_v45 = vsub.f32 %v3470_v0, %v1542_v37  ;;  %2904 = vpow2.f32 %v1563_v42  ;;  %v1553_v61 = vsub.f32 %v3468_v62, %v1539_v35 }
 0xd0e   :  { %v1567_v4 = vmul.f32 1.442695, %v1554_v45  ;;  %v1565_v63 = vmul.f32 1.442695, %v1553_v61 }
 0xd0f   :  { %v1673_v46 = vpop.permute.xlu1 %1672 }
 0xd10   :  { %v1678_v48 = vsel %vm1627_vm5, %v1673_v46, 0  ;;  %2906 = vpow2.f32 %v1567_v4 }
 0xd11   :  { %2695 = vmatpush3.bf16.msra.mxu0 %v1678_v48  ;;  %2908 = vpow2.f32 %v1565_v63 }
 0xd12   :  { %v3503_v50 = vpop.eup %2902  ;;  %2706 = vmatprep.subr.bf16.mxu0 %v2962_v49 }
 0xd13   :  { %v1545_v40 = vpop.xlane.xlu0 %1544  ;;  %v1579_v44 = vsel %vm1148_vm4, %v3503_v50, 0.0  ;;  %v1722_v3 = vpop.permute.xlu1 %1721 }
 0xd14   :  { %1580 = vadd.xlane.f32.xlu0 %v1579_v44  ;;  %v1555_v0 = vsub.f32 %v3476_v12, %v1545_v40  ;;  %v1727_v21 = vsel %vm1627_vm5, %v1722_v3, 0 }
 0xd16   :  { %v3510_v5 = vpop.eup %2904  ;;  %v1569_v1 = vmul.f32 1.442695, %v1555_v0 }
 0xd17   :  { %v1623_v51 = vpop.permute.xlu0 %1622  ;;  %v1582_v53 = vsel %vm1148_vm4, %v3510_v5, 0.0 }
 0xd18   :  { %v1629_v52 = vsel %vm1627_vm5, %v1623_v51, 0  ;;  %2910 = vpow2.f32 %v1569_v1 }
 0xd19   :  { %2689 = vmatpush3.bf16.msra.mxu1 %v1629_v52 }
 0xd1a   :  { %2700 = vmatprep.subr.bf16.mxu1 %v2962_v49  ;;  %v3514_v54 = vpop.eup %2906 }
 0xd1b   :  { %v1588_v58 = vsel %vm1148_vm4, %v3514_v54, 0.0  ;;  %v3522_v6 = vpop.eup %2908 }
 0xd1c   :  { %v1585_v11 = vsel %vm1148_vm4, %v3522_v6, 0.0 }
 0xd21   :  { %1583 = vadd.xlane.f32.xlu1 %v1582_v53 }
 0xd22   :  { %v3526_v13 = vpop.eup %2910 }
 0xd25   :  { %1589 = vadd.xlane.f32.xlu1 %v1588_v58 }
 0xd2a   :  { %1819 = vrot.lane.b32.xlu0 %v3420_v2, %s2968_s3  ;;  %v1591_v2 = vsel %vm1148_vm4, %v3526_v13, 0.0 }
 0xd44   :  { %v1548_v43 = vpop.xlane.xlu1 %1547 }
 0xd45   :  { %v1556_v7 = vsub.f32 %v1524_v30, %v1548_v43 }
 0xd47   :  { %v1571_v8 = vmul.f32 1.442695, %v1556_v7 }
 0xd48   :  { %v1575_v10 = vpop.xlane.xlu0 %1574  ;;  %v1771_v15 = vpop.permute.xlu1 %1770 }
 0xd49   :  { %2912 = vrcp.f32 %v1575_v10  ;;  %1586 = vadd.xlane.f32.xlu0 %v1585_v11  ;;  %v1776_v29 = vsel %vm1627_vm5, %v1771_v15, 0 }
 0xd4a   :  { %2914 = vpow2.f32 %v1571_v8 }
 0xd4d   :  { %1592 = vadd.xlane.f32.xlu0 %v1591_v2 }
 0xd53   :  { %v2913_v62 = vpop.eup %2912 }
 0xd54   :  { %v3530_v12 = vpop.eup %2914  ;;  %v1605_v14 = vmul.f32 %v2913_v62, %v3486_v16 }
 0xd55   :  { %v1594_v19 = vsel %vm1148_vm4, %v3530_v12, 0.0 }
 0xd56   :  { %1595 = vadd.xlane.f32.xlu1 %v1594_v19  ;;  %v1613_v20 = vpack.c.bf16 %v1605_v14, %v1605_v14 }
 0xd58   :  { %2691 = vmatmul.mubr.msk.bf16.vlgmr.msra.gmra.mrb[20].mxu1 %vm1148_vm4, %v1613_v20 }
 0xd59   :  { %2701 = vmatpush3.bf16.msra.mxu1 %v1727_v21  ;;  %2702 = vmatprep.mubr.msk.bf16.mxu1 %vm2963_vm2, %v2962_v49 }
 0xd5a   :  { %2712 = vmatprep.subr.bf16.mxu1 %v2962_v49 }
 0xd63   :  { %1917 = vrot.lane.b32.xlu0 %v3435_v17, %s2968_s3 }
 0xd67   :  { %1966 = vrot.lane.b32.xlu1 %v3438_v18, %s2968_s3 }
 0xd79   :  { %v1578_v22 = vpop.xlane.xlu1 %1577 }
 0xd7a   :  { %2916 = vrcp.f32 %v1578_v22  ;;  %v2850_v22 = vld [vmem:[%s3710_s20] sm:$0xff]  }
 0xd7d   :  { %v1869_v18 = vpop.permute.xlu1 %1868 }
 0xd7e   :  { %v1874_v38 = vsel %vm1627_vm5, %v1869_v18, 0  ;;  %v2851_v18 = vld [vmem:[%s3710_s20 + $0x8] sm:$0xff]  }
 0xd84   :  { %v2917_v23 = vpop.eup %2916 }
 0xd85   :  { %v1606_v26 = vmul.f32 %v2917_v23, %v3493_v31 }
 0xd87   :  { %v1614_v28 = vpack.c.bf16 %v1606_v26, %v1606_v26 }
 0xd89   :  { %2697 = vmatmul.mubr.msk.bf16.vlgmr.msra.gmra.mrb[56].mxu0 %vm1148_vm4, %v1614_v28 }
 0xd8a   :  { %2707 = vmatpush3.bf16.msra.mxu0 %v1776_v29  ;;  %2708 = vmatprep.mubr.msk.bf16.mxu0 %vm2963_vm2, %v2962_v49 }
 0xd8b   :  { %2718 = vmatprep.subr.bf16.mxu0 %v2962_v49 }
 0xda1   :  { %v1581_v17 = vpop.xlane.xlu0 %1580 }
 0xda2   :  { %2918 = vrcp.f32 %v1581_v17 }
 0xda5   :  { %v1820_v32 = vpop.permute.xlu0 %1819 }
 0xda6   :  { %v1825_v57 = vsel %vm1627_vm5, %v1820_v32, 0 }
 0xdac   :  { %v2919_v30 = vpop.eup %2918 }
 0xdad   :  { %v1607_v16 = vmul.f32 %v2919_v30, %v3503_v50 }
 0xdae   :  { %v1584_v33 = vpop.xlane.xlu1 %1583 }
 0xdaf   :  { %v1615_v47 = vpack.c.bf16 %v1607_v16, %v1607_v16  ;;  %2920 = vrcp.f32 %v1584_v33 }
 0xdb1   :  { %2703 = vmatmul.mubr.msk.bf16.vlgmr.msra.gmra.mrb[24].mxu1 %vm1148_vm4, %v1615_v47 }
 0xdb2   :  { %2713 = vmatpush3.bf16.msra.mxu1 %v1825_v57  ;;  %2714 = vmatprep.mubr.msk.bf16.mxu1 %vm2963_vm2, %v2962_v49  ;;  %v1590_v41 = vpop.xlane.xlu1 %1589 }
 0xdb3   :  { %2724 = vmatprep.subr.bf16.mxu1 %v2962_v49  ;;  %2922 = vrcp.f32 %v1590_v41 }
 0xdb9   :  { %v2921_v31 = vpop.eup %2920 }
 0xdba   :  { %v1608_v25 = vmul.f32 %v2921_v31, %v3510_v5 }
 0xdbc   :  { %v1616_v36 = vpack.c.bf16 %v1608_v25, %v1608_v25 }
 0xdbd   :  { %v2923_v34 = vpop.eup %2922 }
 0xdbe   :  { %2709 = vmatmul.mubr.msk.bf16.vlgmr.msra.gmra.mrb[60].mxu0 %vm1148_vm4, %v1616_v36  ;;  %v1610_v39 = vmul.f32 %v2923_v34, %v3514_v54 }
 0xdbf   :  { %2719 = vmatpush3.bf16.msra.mxu0 %v1874_v38  ;;  %2720 = vmatprep.mubr.msk.bf16.mxu0 %vm2963_vm2, %v2962_v49 }
 0xdc0   :  { %2730 = vmatprep.subr.bf16.mxu0 %v2962_v49  ;;  %v1618_v55 = vpack.c.bf16 %v1610_v39, %v1610_v39 }
 0xdc6   :  { %2721 = vmatmul.mubr.msk.bf16.vlgmr.msra.gmra.mrb[64].mxu0 %vm1148_vm4, %v1618_v55 }
 0xdc7   :  { %2732 = vmatprep.mubr.msk.bf16.mxu0 %vm2963_vm2, %v2962_v49 }
 0xdd6   :  { %v1587_v37 = vpop.xlane.xlu0 %1586 }
 0xdd7   :  { %2924 = vrcp.f32 %v1587_v37 }
 0xdda   :  { %v1593_v35 = vpop.xlane.xlu0 %1592 }
 0xddb   :  { %2926 = vrcp.f32 %v1593_v35 }
 0xdde   :  { %v1918_v46 = vpop.permute.xlu0 %1917 }
 0xddf   :  { %v1923_v44 = vsel %vm1627_vm5, %v1918_v46, 0 }
 0xde1   :  { %v2925_v42 = vpop.eup %2924 }
 0xde2   :  { %v1609_v45 = vmul.f32 %v2925_v42, %v3522_v6 }
 0xde3   :  { %v1596_v48 = vpop.xlane.xlu1 %1595 }
 0xde4   :  { %2928 = vrcp.f32 %v1596_v48  ;;  %v1617_v50 = vpack.c.bf16 %v1609_v45, %v1609_v45 }
 0xde5   :  { %v2927_v40 = vpop.eup %2926 }
 0xde6   :  { %2715 = vmatmul.mubr.msk.bf16.vlgmr.msra.gmra.mrb[28].mxu1 %vm1148_vm4, %v1617_v50  ;;  %v1611_v51 = vmul.f32 %v2927_v40, %v3526_v13 }
 0xde7   :  { %v1967_v4 = vpop.permute.xlu1 %1966  ;;  %2725 = vmatpush3.bf16.msra.mxu1 %v1923_v44  ;;  %2726 = vmatprep.mubr.msk.bf16.mxu1 %vm2963_vm2, %v2962_v49 }
 0xde8   :  { %v1972_v52 = vsel %vm1627_vm5, %v1967_v4, 0  ;;  %2736 = vmatprep.subr.bf16.mxu1 %v2962_v49  ;;  %v1619_v5 = vpack.c.bf16 %v1611_v51, %v1611_v51 }
 0xde9   :  { %2731 = vmatpush3.bf16.msra.mxu0 %v1972_v52  ;;  %v2444_v52 = vld [vmem:[%s3711_s21] ss:$0 sm:$0xff] }
 0xdee   :  { %v2929_v53 = vpop.eup %2928  ;;  %2727 = vmatmul.mubr.msk.bf16.vlgmr.msra.gmra.mrb[32].mxu1 %vm1148_vm4, %v1619_v5 }
 0xdef   :  { %v1612_v54 = vmul.f32 %v2929_v53, %v3530_v12  ;;  %2740 = vmatprep.mubr.msk.bf16.mxu1 %vm2963_vm2, %v2962_v49  ;;  %2737 = vmatpush3.bf16.msra.mxu1 %v2850_v22 }
 0xdf0   :  { %2738 = vmatprep.subr.bf16.mxu1 %v2962_v49 }
 0xdf1   :  { %v1620_v58 = vpack.c.bf16 %v1612_v54, %v1612_v54 }
 0xdf3   :  { %2733 = vmatmul.mubr.msk.bf16.vlgmr.msra.gmra.mrb[68].mxu0 %vm1148_vm4, %v1620_v58  ;;  %2739 = vmatpush3.bf16.msra.mxu1 %v2851_v18  ;;  %v2448_v18 = vld [vmem:[%s3712_s22] ss:$0 sm:$0xff] }
 0xdf4   :  { %2243 = vmatprep.mubr.bf16.mxu0 %v2965_v59  ;;  %2744 = vmatprep.subr.bf16.mxu1 %v2962_v49 }
 0xe2b   :  { %v1665_v61 = vpop.f32.mrb[20].mxu1 }
 0xe2c   :  { %v2692_v63 = vpop.f32.mrb[21].mxu1 }
 0xe2d   :  { %v1668_v0 = vpop.f32.mrb[22].mxu1 }
 0xe2e   :  { %v2693_v1 = vpop.f32.mrb[23].mxu1 }
 0xe5c   :  { %v1714_v3 = vpop.f32.mrb[56].mxu0 }
 0xe5d   :  { %v2698_v6 = vpop.f32.mrb[57].mxu0 }
 0xe5e   :  { %v1717_v43 = vpop.f32.mrb[58].mxu0 }
 0xe5f   :  { %v2699_v7 = vpop.f32.mrb[59].mxu0 }
 0xe84   :  { %v1763_v8 = vpop.f32.mrb[24].mxu1 }
 0xe85   :  { %v2704_v10 = vpop.f32.mrb[25].mxu1 }
 0xe86   :  { %v1766_v11 = vpop.f32.mrb[26].mxu1 }
 0xe87   :  { %v2705_v13 = vpop.f32.mrb[27].mxu1 }
 0xe91   :  { %v1812_v2 = vpop.f32.mrb[60].mxu0 }
 0xe92   :  { %v2806_v62 = vpack.i.bf16 %v1812_v2, %v1763_v8  ;;  %v2710_v12 = vpop.f32.mrb[61].mxu0 }
 0xe93   :  { %v1815_v14 = vpop.f32.mrb[62].mxu0  ;;  %v2854_v12 = vld [vmem:[%s3714_s24 + $0x4] ss:$8 sps:$4 sm:$0xff]  }
 0xe94   :  { %v2711_v19 = vpop.f32.mrb[63].mxu0  ;;  %2807 = vrot.lane.b32.xlu0 %v2806_v62, %s2969_s2  ;;  %v2852_v14 = vld [vmem:[%s3714_s24] ss:$8 sps:$4 sm:$0xff]   ;;  %2211 = vmatprep.subr.bf16.mxu0 %v2854_v12 }
 0xe95   :  { %2212 = vmatpush1.bf16.msra.mxu0 %v2852_v14  ;;  %v2855_v19 = vld [vmem:[%s3714_s24 + $0x10] ss:$8 sps:$4 sm:$0xff]  }
 0xe99   :  { %v1910_v59 = vpop.f32.mrb[64].mxu0 }
 0xe9a   :  { %v2722_v20 = vpop.f32.mrb[65].mxu0 }
 0xe9b   :  { %v1913_v21 = vpop.f32.mrb[66].mxu0  ;;  %v2858_v20 = vld [vmem:[%s3716_s26] sm:$0xff]  }
 0xe9c   :  { %v2723_v15 = vpop.f32.mrb[67].mxu0 }
 0xeb9   :  { %v1861_v23 = vpop.f32.mrb[28].mxu1 }
 0xeba   :  { %v2811_v26 = vpack.i.bf16 %v1910_v59, %v1861_v23  ;;  %v2716_v28 = vpop.f32.mrb[29].mxu1  ;;  %v2857_v59 = vld [vmem:[%s3714_s24 + $0x14] ss:$8 sps:$4 sm:$0xff]  }
 0xebb   :  { %v1864_v29 = vpop.f32.mrb[30].mxu1  ;;  %2213 = vmatprep.subr.bf16.mxu0 %v2857_v59 }
 0xebc   :  { %2812 = vrot.lane.b32.xlu1 %v2811_v26, %s2970_s1  ;;  %v2717_v17 = vpop.f32.mrb[31].mxu1  ;;  %2214 = vmatpush1.bf16.msra.mxu0 %v2855_v19 }
 0xec1   :  { %v1959_v30 = vpop.f32.mrb[32].mxu1 }
 0xec2   :  { %v2728_v16 = vpop.f32.mrb[33].mxu1 }
 0xec3   :  { %v1962_v32 = vpop.f32.mrb[34].mxu1 }
 0xec4   :  { %v2729_v33 = vpop.f32.mrb[35].mxu1 }
 0xec5   :  { %v2449_v33 = vld [vmem:[%s3713_s23] ss:$0 sm:$0xff] }
 0xec6   :  { %v2008_v47 = vpop.f32.mrb[68].mxu0 }
 0xec7   :  { %v2816_v57 = vpack.i.bf16 %v2008_v47, %v1959_v30  ;;  %v2734_v41 = vpop.f32.mrb[69].mxu0 }
 0xec8   :  { %v2011_v31 = vpop.f32.mrb[70].mxu0 }
 0xec9   :  { %v2735_v25 = vpop.f32.mrb[71].mxu0  ;;  %2817 = vrot.lane.b32.xlu0 %v2816_v57, %s2971_s14 }
 0xeca   :  { %v2859_v25 = vld [vmem:[%s3716_s26 + $0x8] sm:$0xff]  }
 0xf06   :  { %v2808_v36 = vpop.permute.xlu0 %2807 }
 0xf07   :  { %v2810_v38 = vunpack.i.h.bf16 %v2808_v36  ;;  %v2809_v39 = vunpack.i.l.bf16 %v2808_v36  ;;  %v2860_v36 = vld [vmem:[%s3716_s26 + $0x10] sm:$0xff]  }
 0xf09   :  { %v2039_v42 = vsel %vm1148_vm4, %v1714_v3, %v2810_v38  ;;  %v2038_v45 = vsel %vm1148_vm4, %v1665_v61, %v2809_v39  ;;  %v2862_v38 = vld [vmem:[%s3716_s26 + $0x20] sm:$0xff]   ;;  %v2863_v39 = vld [vmem:[%s3716_s26 + $0x28] sm:$0xff]  }
 0xf2e   :  { %v2813_v34 = vpop.permute.xlu1 %2812 }
 0xf2f   :  { %v2815_v55 = vunpack.i.h.bf16 %v2813_v34  ;;  %v2814_v37 = vunpack.i.l.bf16 %v2813_v34  ;;  %v2861_v34 = vld [vmem:[%s3716_s26 + $0x18] sm:$0xff]  }
 0xf31   :  { %v2041_v50 = vsel %vm399_vm3, %v2039_v42, %v2815_v55  ;;  %v2040_v40 = vsel %vm399_vm3, %v2038_v45, %v2814_v37  ;;  %v2864_v55 = vld [vmem:[%s3716_s26 + $0x30] sm:$0xff]   ;;  %v2865_v37 = vld [vmem:[%s3716_s26 + $0x38] sm:$0xff]  }
 0xf3b   :  { %v2818_v35 = vpop.permute.xlu0 %2817 }
 0xf3c   :  { %v2820_v46 = vunpack.i.h.bf16 %v2818_v35  ;;  %v2819_v48 = vunpack.i.l.bf16 %v2818_v35  ;;  %v2116_v35 = vld [vmem:[%s3715_s25] sm:$0x3] }
 0xf3d   :  { %v2185_v42 = vrot.slane %v2116_v35, %v745_v24 }
 0xf3e   :  { %v2044_v44 = vsel %vm2042_vm6, %v2041_v50, %v2820_v46  ;;  %v2043_v4 = vsel %vm2042_vm6, %v2040_v40, %v2819_v48 }
 0xf3f   :  { %v2045_v51 = vpack.c.bf16 %v2044_v44, %v2043_v4 }
 0xf41   :  { %2741 = vmatmul.mubr.msk.bf16.vlgmr.msra.gmra.mrb[36].mxu1 %vm124_vm0, %v2045_v51  ;;  %v2181_v51 = vrot.slane %v2116_v35, %v741_v9 }
 0xf42   :  { %2760 = vmatprep.mubr.msk.bf16.mxu1 %vm2963_vm2, %v2962_v49  ;;  %2745 = vmatpush3.bf16.msra.mxu1 %v2858_v20 }
 0xf43   :  { %2746 = vmatprep.subr.bf16.mxu1 %v2962_v49 }
 0xf46   :  { %2747 = vmatpush3.bf16.msra.mxu1 %v2859_v25 }
 0xf47   :  { %2748 = vmatprep.subr.bf16.mxu1 %v2962_v49 }
 0xf4a   :  { %2749 = vmatpush3.bf16.msra.mxu1 %v2860_v36 }
 0xf4b   :  { %2750 = vmatprep.subr.bf16.mxu1 %v2962_v49 }
 0xf4e   :  { %2751 = vmatpush3.bf16.msra.mxu1 %v2861_v34 }
 0xf4f   :  { %2752 = vmatprep.subr.bf16.mxu1 %v2962_v49 }
 0xf52   :  { %2753 = vmatpush3.bf16.msra.mxu1 %v2862_v38 }
 0xf53   :  { %2754 = vmatprep.subr.bf16.mxu1 %v2962_v49 }
 0xf56   :  { %2755 = vmatpush3.bf16.msra.mxu1 %v2863_v39 }
 0xf57   :  { %2756 = vmatprep.subr.bf16.mxu1 %v2962_v49 }
 0xf5a   :  { %2757 = vmatpush3.bf16.msra.mxu1 %v2864_v55 }
 0xf5b   :  { %2758 = vmatprep.subr.bf16.mxu1 %v2962_v49 }
 0xf5e   :  { %2759 = vmatpush3.bf16.msra.mxu1 %v2865_v37 }
0x1014   :  { %v2101_v5 = vpop.f32.mrb[36].mxu1 }
0x1015   :  { %v2102_v53 = vadd.f32 %v2444_v52, %v2101_v5  ;;  %v2742_v54 = vpop.f32.mrb[37].mxu1 }
0x1016   :  { %v2104_v58 = vpop.f32.mrb[38].mxu1 }
0x1017   :  { %v3600_v61 = vadd.f32 %v2102_v53, %v3351_v56  ;;  %v2105_v63 = vadd.f32 %v2444_v52, %v2104_v58  ;;  %v2743_v0 = vpop.f32.mrb[39].mxu1 }
0x1019   :  { %v3603_v1 = vadd.f32 %v2105_v63, %v3354_v60  ;;  %v2134_v3 = vsel %vm124_vm0, %v3600_v61, 0.0 }
0x101a   :  { %2135 = vadd.xlane.f32.xlu1 %v2134_v3 }
0x101b   :  { %v2137_v6 = vsel %vm124_vm0, %v3603_v1, 0.0 }
0x101c   :  { %2138 = vadd.xlane.f32.xlu0 %v2137_v6 }
0x10a7   :  { %v2136_v43 = vpop.xlane.xlu1 %2135 }
0x10a8   :  { %v2140_v7 = vmul.f32 0.03125, %v2136_v43 }
0x10a9   :  { %v2139_v8 = vpop.xlane.xlu0 %2138 }
0x10aa   :  { %v2142_v10 = vsub.f32 %v3600_v61, %v2140_v7  ;;  %v2141_v56 = vmul.f32 0.03125, %v2139_v8 }
0x10ac   :  { %v2143_v11 = vsub.f32 %v3603_v1, %v2141_v56  ;;  %v2144_v13 = vmul.f32 %v2142_v10, %v2142_v10 }
0x10ae   :  { %v2146_v60 = vsel %vm124_vm0, %v2144_v13, 0.0  ;;  %v2145_v2 = vmul.f32 %v2143_v11, %v2143_v11 }
0x10af   :  { %2147 = vadd.xlane.f32.xlu0 %v2146_v60 }
0x10b0   :  { %v2149_v62 = vsel %vm124_vm0, %v2145_v2, 0.0 }
0x10b3   :  { %2150 = vadd.xlane.f32.xlu0 %v2149_v62 }
0x113c   :  { %v2148_v21 = vpop.xlane.xlu0 %2147 }
0x113d   :  { %v2152_v15 = vmul.f32 0.03125, %v2148_v21 }
0x113f   :  { %v2154_v22 = vadd.f32 1e-05, %v2152_v15 }
0x1140   :  { %v2151_v23 = vpop.xlane.xlu0 %2150 }
0x1141   :  { %2930 = vrsqrt.f32 %v2154_v22  ;;  %v2153_v26 = vmul.f32 0.03125, %v2151_v23 }
0x1143   :  { %v2155_v28 = vadd.f32 1e-05, %v2153_v26 }
0x1145   :  { %2932 = vrsqrt.f32 %v2155_v28 }
0x114b   :  { %v2931_v29 = vpop.eup %2930 }
0x114c   :  { %v2158_v17 = vmul.f32 %v2931_v29, %v2142_v10  ;;  %v2455_v10 = vld [vmem:[%s3717_s27] ss:$0 sm:$0xff] }
0x114e   :  { %v2166_v16 = vmul.f32 %v2448_v18, %v2158_v17 }
0x114f   :  { %v2933_v30 = vpop.eup %2932 }
0x1150   :  { %v2159_v32 = vmul.f32 %v2933_v30, %v2143_v11  ;;  %v2174_v57 = vadd.f32 %v2449_v33, %v2166_v16 }
0x1152   :  { %v2167_v47 = vmul.f32 %v2448_v18, %v2159_v32 }
0x1154   :  { %v2175_v41 = vadd.f32 %v2449_v33, %v2167_v47 }
0x1156   :  { %v2176_v31 = vpack.c.bf16 %v2175_v41, %v2174_v57 }
0x1158   :  { %2454 = vmatmul.mubr.msk.bf16.vlgmr.msra.gmra.mrb[72].mxu0 %vm124_vm0, %v2176_v31 }
0x122b   :  { %v2245_v45 = vpop.f32.mrb[72].mxu0 }
0x122c   :  { %v2247_v46 = vpop.f32.mrb[73].mxu0  ;;  %v2246_v58 = vadd.f32 %v2245_v45, %v2181_v51 }
0x122d   :  { %v2248_v48 = vadd.f32 %v2247_v46, %v2185_v42  ;;  %v2249_v50 = vpop.f32.mrb[74].mxu0 }
0x122e   :  { %v2251_v40 = vpop.f32.mrb[75].mxu0  ;;  %v2250_v6 = vadd.f32 %v2249_v50, %v2181_v51 }
0x122f   :  { %v2256_v44 = vmul.f32 0.70710677, %v2248_v48  ;;  %v2252_v4 = vadd.f32 %v2251_v40, %v2185_v42  ;;  %v2254_v5 = vmul.f32 0.5, %v2248_v48 }
0x1231   :  { %2934 = verf.f32 %v2256_v44  ;;  %v2257_v49 = vmul.f32 0.70710677, %v2252_v4  ;;  %v2255_v24 = vmul.f32 0.5, %v2252_v4 }
0x1233   :  { %2936 = verf.f32 %v2257_v49 }
0x123b   :  { %v2935_v52 = vpop.eup %2934 }
0x123c   :  { %v2260_v53 = vadd.f32 1.0, %v2935_v52 }
0x123d   :  { %v2937_v54 = vpop.eup %2936 }
0x123e   :  { %v2262_v63 = vmul.f32 %v2260_v53, %v2254_v5  ;;  %v2261_v0 = vadd.f32 1.0, %v2937_v54 }
0x1240   :  { %v2264_v3 = vmul.f32 %v2262_v63, %v2246_v58  ;;  %v2263_v43 = vmul.f32 %v2261_v0, %v2255_v24 }
0x1242   :  { %v2265_v7 = vmul.f32 %v2263_v43, %v2250_v6 }
0x1244   :  { %v2266_v8 = vpack.c.bf16 %v2265_v7, %v2264_v3 }
0x1246   :  { %2761 = vmatmul.mubr.bf16.vlgmr.msra.gmra.mrb[40].mxu1 %v2266_v8 }
0x1319   :  { %v2355_v27 = vpop.f32.mrb[40].mxu1 }
0x131a   :  { %v2356_v9 = vadd.f32 %v2455_v10, %v2355_v27  ;;  %v2762_v56 = vpop.f32.mrb[41].mxu1 }
0x131b   :  { %v2358_v11 = vpop.f32.mrb[42].mxu1 }
0x131c   :  { %v2362_v13 = vadd.f32 %v2356_v9, %v3600_v61  ;;  %v2359_v60 = vadd.f32 %v2455_v10, %v2358_v11  ;;  %v2763_v2 = vpop.f32.mrb[43].mxu1 }
0x131e   :  { %2364 = vst.msk [vmem:[#allocation2] sm:$0xff] %vm124_vm0, %v2362_v13  ;;  %v2363_v62 = vadd.f32 %v2359_v60, %v3603_v1 }
0x1320   :  { %2365 = vst.msk [vmem:[#allocation2 + $0x8] sm:$0xff] %vm124_vm0, %v2363_v62 }
0x1321   :  { %2949 = shalt.err (!%p2946_p4)
}
0x1322   :  { %s2950_s0 = scalar_lea.hbm %s3718_s28, 256 }
0x1323   :  { %p2951_p5 = scmp.ne.s32.totalorder %s3718_s28, %s2950_s0  ;;  %p2954_p6 = scmp.lt.u32.totalorder %s2950_s0, %s3718_s28 }
0x1325   :  { %p2956_p7 = pnand %p2954_p6, %p2951_p5 }
0x1327   :  { %2959 = shalt.err (!%p2956_p7)
}
0x1328   :  { %s2973_s17 = smov 128  }
0x1329   :  { %2377 = dma.vmem_to_hbm [thread:$0]  %s2372_s10, 256, %s3718_s28, [#allocation3], %s2973_s17, %s2973_s17, %s2969_s2  }
0x132a   :  { %2960 = dma.done.wait [#allocation3], 256  }
0x132b   :  { %2961 = vsyncadd [#allocation3], 4294967040 }
0x132c   :  { %2381 = vsyncpa [#allocation3], 1 }

</bundles_post_ra>
